<compile_context>
chip_gen: v7x
topology: tpu7x:2x2x1
jax: 0.10.0
libtpu: 0.0.40
codegen_flags: <defaults>
</compile_context>

<pallas_src>
import numpy as np
import jax
import jax.numpy as jnp
from jax import lax
from jax.experimental import pallas as pl
from jax.experimental.pallas import tpu as pltpu


def _round_up(x, m):
    return (x + m - 1) // m * m


def _make_kernel(B_blk, Cin, Cout, K, P, HW, Wd, S_Cp, S_V2, S_M):
    def kernel(x_ref, w_ref, mask_ref, c_ref, o_ref):
        # x_ref    : (B_blk, Cin, S_xpad) VMEM   flat NCDHW spatial, zero padded
        # w_ref    : (Cout, K^3*Cin)      VMEM   tap-major / ci-minor, * 1/NPOOL
        # mask_ref : (1, S_M)             VMEM   pooling-anchor mask (resident)
        # c_ref    : (1, 1)               SMEM   sum(conv_bias) + sum(extra bias)
        # o_ref    : (1, B_blk, 128)      VMEM   per-step output slab
        mask = mask_ref[...]                       # stays resident across steps
        const = c_ref[0, 0]

        for b in range(B_blk):
            # ---- 3-D VALID conv on the MXU ------------------------------
            # Only the K*K (kh,kw) offsets need a misaligned lane extraction;
            # the kd shifts are lane-aligned slices of that view.
            acc = [None, None]                     # two accumulation chains
            t = 0
            for kh in range(K):
                for kw in range(K):
                    off = kh * Wd + kw
                    xs = x_ref[b, :, off:off + S_V2]           # (Cin, S_V2)
                    for kd in range(K):
                        col = ((kd * K + kh) * K + kw) * Cin
                        wk = w_ref[:, col:col + Cin]           # (Cout, Cin)
                        rhs = xs[:, kd * HW:kd * HW + S_Cp]    # (Cin, S_Cp)
                        term = jnp.dot(wk, rhs,
                                       preferred_element_type=jnp.float32)
                        c = t & 1
                        acc[c] = term if acc[c] is None else acc[c] + term
                        t += 1
            conv = (acc[0] + acc[1]) if acc[1] is not None else acc[0]

            # ---- max_pool3d (window == stride == P): shifted elementwise max
            m = conv[:, 0:S_M]
            for pd in range(P):
                for ph in range(P):
                    for pw in range(P):
                        if pd == 0 and ph == 0 and pw == 0:
                            continue
                        poff = pd * HW + ph * Wd + pw
                        m = jnp.maximum(m, conv[:, poff:poff + S_M])

            # ---- masked mean (1/NPOOL already folded into the weights),
            #      summed over channels, plus folded biases -----------------
            total = jnp.sum(m * mask) + const
            o_ref[0, b:b + 1, :] = jnp.full((1, 128), total, jnp.float32)

    return kernel


def model_forward(x, conv_w, conv_b, bias, pool_size):
    """x: (N, Cin, D, H, W) float32. Returns (N, 1, 1, 1) float32."""
    N, Cin, D, H, W = x.shape
    Cout, Cin_w, kD, kH, kW = conv_w.shape
    assert Cin_w == Cin and kD == kH == kW
    K = int(kD)
    p = int(pool_size)

    Do, Ho, Wo = D - K + 1, H - K + 1, W - K + 1
    Dp, Hp, Wp = Do // p, Ho // p, Wo // p
    assert Dp >= 1 and Hp >= 1 and Wp >= 1
    # Invariant: pooled windows never read past the valid conv extent, so the
    # flat-shift conv's row/depth boundary garbage is never selected by any
    # pooling window (and the anchor mask zeroes every non-anchor lane).
    assert Dp * p <= Do and Hp * p <= Ho and Wp * p <= Wo

    HW = H * W
    S = D * HW
    KT = K * K * K
    S_C = S - (K - 1) * (HW + W + 1)          # valid flat conv extent
    S_M = S_C - (p - 1) * (HW + W + 1)        # valid flat pooled-max extent
    NPOOL = Dp * Hp * Wp
    S_Cp = _round_up(S_C, 128)                # lane-padded matmul width
    S_V2 = (K - 1) * HW + S_Cp                # lanes needed per (kh,kw) view
    S_xpad = _round_up((K - 1) * (W + 1) + S_V2, 128)
    assert S_xpad >= S

    # Batch packing: amortize per-grid-step overhead (v5e/v6e serial grid)
    # while keeping >= 2 grid steps whenever N >= 2 (v7x has 2 TensorCores).
    B_blk = max(1, min(4, N // 2))
    G = pl.cdiv(N, B_blk)
    N_pad = G * B_blk

    x_f = x.reshape(N, Cin, S).astype(jnp.float32)
    x_f = jnp.pad(x_f, ((0, N_pad - N), (0, 0), (0, S_xpad - S)))

    # Weights: tap-major / ci-minor columns, pre-scaled by 1/NPOOL
    # (a positive scale commutes with max-pool and with the mean).
    w_r = (jnp.transpose(conv_w, (0, 2, 3, 4, 1)).reshape(Cout, KT * Cin)
           * (1.0 / float(NPOOL))).astype(jnp.float32)

    # conv bias & extra bias commute with max-pool / mean -> one scalar.
    const = (jnp.sum(conv_b) + jnp.sum(bias)).astype(jnp.float32).reshape(1, 1)

    # Pooling-anchor mask, computed once on the host (compile-time pattern).
    sidx = np.arange(S_M)
    d0 = sidx // HW
    r = sidx - d0 * HW
    h0 = r // W
    w0 = r - h0 * W
    anchor = ((d0 % p == 0) & (d0 < Dp * p) &
              (h0 % p == 0) & (h0 < Hp * p) &
              (w0 % p == 0) & (w0 < Wp * p))
    mask = jnp.asarray(anchor.astype(np.float32).reshape(1, S_M))

    kernel = _make_kernel(B_blk, Cin, Cout, K, p, HW, W, S_Cp, S_V2, S_M)

    out = pl.pallas_call(
        kernel,
        out_shape=jax.ShapeDtypeStruct((G, B_blk, 128), jnp.float32),
        grid=(G,),
        in_specs=[
            pl.BlockSpec((B_blk, Cin, S_xpad), lambda g: (g, 0, 0)),   # x block
            pl.BlockSpec((Cout, KT * Cin), lambda g: (0, 0)),          # weights (resident)
            pl.BlockSpec((1, S_M), lambda g: (0, 0)),                  # anchor mask (resident)
            pl.BlockSpec(memory_space=pltpu.MemorySpace.SMEM),         # folded bias scalar
        ],
        out_specs=pl.BlockSpec((1, B_blk, 128), lambda g: (g, 0, 0)),
        compiler_params=pltpu.CompilerParams(
            dimension_semantics=("parallel",)),
    )(x_f, w_r, mask, const)

    return out[:, :, 0].reshape(N_pad)[:N].reshape(N, 1, 1, 1)


def reference_forward(x, conv_w, conv_b, bias, pool_size):
    N, Cin, D, H, W = x.shape
    Cout = conv_w.shape[0]
    dn = lax.conv_dimension_numbers(x.shape, conv_w.shape,
                                    ('NCDHW', 'OIDHW', 'NCDHW'))
    conv = lax.conv_general_dilated(x, conv_w, (1, 1, 1), 'VALID',
                                    dimension_numbers=dn)
    conv = conv + conv_b.reshape(1, Cout, 1, 1, 1)
    p = int(pool_size)
    pooled = lax.reduce_window(conv, -jnp.inf, lax.max,
                               (1, 1, p, p, p), (1, 1, p, p, p), 'VALID')
    mean = pooled.mean(axis=(2, 3, 4), keepdims=True)
    y = mean + bias[None, ...]
    return jnp.sum(y, axis=1)  # sum over dim=1, keepdim=False -> (N,1,1,1)


if __name__ == "__main__":
    # Small shapes consistent with the module (sum_dim=1, cubic kernel, pool=2)
    N, Cin, Cout = 2, 3, 8
    D, H, W = 8, 16, 16
    ksize, divisor, pool_size = 3, 2.0, 2

    key = jax.random.PRNGKey(0)
    k1, k2, k3, k4 = jax.random.split(key, 4)
    conv_w = (jax.random.normal(k1, (Cout, Cin, ksize, ksize, ksize),
                                jnp.float32) * 0.1) / divisor
    conv_b = (jax.random.normal(k2, (Cout,), jnp.float32) * 0.1) / divisor
    bias = jax.random.normal(k3, (Cout, 1, 1, 1), jnp.float32)
    x = jax.random.normal(k4, (N, Cin, D, H, W), jnp.float32)

    out = jax.block_until_ready(model_forward(x, conv_w, conv_b, bias, pool_size))
    ref = jax.block_until_ready(reference_forward(x, conv_w, conv_b, bias, pool_size))

    assert out.shape == (N, 1, 1, 1), out.shape
    if not np.allclose(np.asarray(out), np.asarray(ref), rtol=3e-2, atol=3e-2):
        raise AssertionError(
            f"mismatch: kernel={np.asarray(out).ravel()} ref={np.asarray(ref).ravel()}")
    print("KERNEL_OK")
</pallas_src>

<mosaic_0001>
module attributes {stable_mosaic.version = 11 : i64} {
  func.func @kernel(%arg0: i32, %arg1: memref<1x3x2176xf32, #tpu.memory_space<vmem>>, %arg2: memref<8x81xf32, #tpu.memory_space<vmem>>, %arg3: memref<1x1229xf32, #tpu.memory_space<vmem>>, %arg4: memref<1x1xf32, #tpu.memory_space<smem>>, %arg5: memref<1x1x128xf32, #tpu.memory_space<vmem>>) attributes {dimension_semantics = [#tpu.dimension_semantics<parallel>], iteration_bounds = array<i64: 2>, scalar_prefetch = 0 : i64, scratch_operands = 0 : i64, tpu.core_type = #tpu.core_type<tc>, window_params = [{transform_indices = @transform_0, window_bounds = array<i64: 1, 3, 2176>}, {pipeline_mode = #tpu.pipeline_mode<synchronous>, transform_indices = @transform_1, window_bounds = array<i64: 8, 81>}, {pipeline_mode = #tpu.pipeline_mode<synchronous>, transform_indices = @transform_2, window_bounds = array<i64: 1, 1229>}, {transform_indices = @transform_3, window_bounds = array<i64: 1, 1>}, {transform_indices = @transform_4, window_bounds = array<i64: 1, 1, 128>}]} {
    %c0 = arith.constant 0 : index
    %c0_0 = arith.constant 0 : index
    %0 = vector.load %arg3[%c0, %c0_0] : memref<1x1229xf32, #tpu.memory_space<vmem>>, vector<1x1229xf32>
    %c0_1 = arith.constant 0 : index
    %c0_2 = arith.constant 0 : index
    %1 = memref.load %arg4[%c0_1, %c0_2] : memref<1x1xf32, #tpu.memory_space<smem>>
    %c0_3 = arith.constant 0 : index
    %c0_4 = arith.constant 0 : index
    %c0_5 = arith.constant 0 : index
    %2 = vector.load %arg1[%c0_3, %c0_4, %c0_5] : memref<1x3x2176xf32, #tpu.memory_space<vmem>>, vector<1x3x2048xf32>
    %3 = vector.shape_cast %2 : vector<1x3x2048xf32> to vector<3x2048xf32>
    %c0_6 = arith.constant 0 : index
    %c0_7 = arith.constant 0 : index
    %4 = vector.load %arg2[%c0_6, %c0_7] : memref<8x81xf32, #tpu.memory_space<vmem>>, vector<8x3xf32>
    %5 = vector.extract_strided_slice %3 {offsets = [0, 0], sizes = [3, 1536], strides = [1, 1]} : vector<3x2048xf32> to vector<3x1536xf32>
    %cst = arith.constant dense<0.000000e+00> : vector<8x1536xf32>
    %6 = tpu.matmul %4, %5, %cst {dimension_numbers = #tpu.dot_dimension_numbers<[1], [0], [0], [1], [0, 0, 1, 1], [], []>} : vector<8x3xf32>, vector<3x1536xf32>, vector<8x1536xf32> -> vector<8x1536xf32>
    %c0_8 = arith.constant 0 : index
    %c27 = arith.constant 27 : index
    %7 = vector.load %arg2[%c0_8, %c27] : memref<8x81xf32, #tpu.memory_space<vmem>>, vector<8x3xf32>
    %8 = vector.extract_strided_slice %3 {offsets = [0, 256], sizes = [3, 1536], strides = [1, 1]} : vector<3x2048xf32> to vector<3x1536xf32>
    %cst_9 = arith.constant dense<0.000000e+00> : vector<8x1536xf32>
    %9 = tpu.matmul %7, %8, %cst_9 {dimension_numbers = #tpu.dot_dimension_numbers<[1], [0], [0], [1], [0, 0, 1, 1], [], []>} : vector<8x3xf32>, vector<3x1536xf32>, vector<8x1536xf32> -> vector<8x1536xf32>
    %c0_10 = arith.constant 0 : index
    %c54 = arith.constant 54 : index
    %10 = vector.load %arg2[%c0_10, %c54] : memref<8x81xf32, #tpu.memory_space<vmem>>, vector<8x3xf32>
    %11 = vector.extract_strided_slice %3 {offsets = [0, 512], sizes = [3, 1536], strides = [1, 1]} : vector<3x2048xf32> to vector<3x1536xf32>
    %cst_11 = arith.constant dense<0.000000e+00> : vector<8x1536xf32>
    %12 = tpu.matmul %10, %11, %cst_11 {dimension_numbers = #tpu.dot_dimension_numbers<[1], [0], [0], [1], [0, 0, 1, 1], [], []>} : vector<8x3xf32>, vector<3x1536xf32>, vector<8x1536xf32> -> vector<8x1536xf32>
    %13 = arith.addf %6, %12 : vector<8x1536xf32>
    %c0_12 = arith.constant 0 : index
    %c0_13 = arith.constant 0 : index
    %c1 = arith.constant 1 : index
    %14 = vector.load %arg1[%c0_12, %c0_13, %c1] : memref<1x3x2176xf32, #tpu.memory_space<vmem>>, vector<1x3x2048xf32>
    %15 = vector.shape_cast %14 : vector<1x3x2048xf32> to vector<3x2048xf32>
    %c0_14 = arith.constant 0 : index
    %c3 = arith.constant 3 : index
    %16 = vector.load %arg2[%c0_14, %c3] : memref<8x81xf32, #tpu.memory_space<vmem>>, vector<8x3xf32>
    %17 = vector.extract_strided_slice %15 {offsets = [0, 0], sizes = [3, 1536], strides = [1, 1]} : vector<3x2048xf32> to vector<3x1536xf32>
    %cst_15 = arith.constant dense<0.000000e+00> : vector<8x1536xf32>
    %18 = tpu.matmul %16, %17, %cst_15 {dimension_numbers = #tpu.dot_dimension_numbers<[1], [0], [0], [1], [0, 0, 1, 1], [], []>} : vector<8x3xf32>, vector<3x1536xf32>, vector<8x1536xf32> -> vector<8x1536xf32>
    %19 = arith.addf %9, %18 : vector<8x1536xf32>
    %c0_16 = arith.constant 0 : index
    %c30 = arith.constant 30 : index
    %20 = vector.load %arg2[%c0_16, %c30] : memref<8x81xf32, #tpu.memory_space<vmem>>, vector<8x3xf32>
    %21 = vector.extract_strided_slice %15 {offsets = [0, 256], sizes = [3, 1536], strides = [1, 1]} : vector<3x2048xf32> to vector<3x1536xf32>
    %cst_17 = arith.constant dense<0.000000e+00> : vector<8x1536xf32>
    %22 = tpu.matmul %20, %21, %cst_17 {dimension_numbers = #tpu.dot_dimension_numbers<[1], [0], [0], [1], [0, 0, 1, 1], [], []>} : vector<8x3xf32>, vector<3x1536xf32>, vector<8x1536xf32> -> vector<8x1536xf32>
    %23 = arith.addf %13, %22 : vector<8x1536xf32>
    %c0_18 = arith.constant 0 : index
    %c57 = arith.constant 57 : index
    %24 = vector.load %arg2[%c0_18, %c57] : memref<8x81xf32, #tpu.memory_space<vmem>>, vector<8x3xf32>
    %25 = vector.extract_strided_slice %15 {offsets = [0, 512], sizes = [3, 1536], strides = [1, 1]} : vector<3x2048xf32> to vector<3x1536xf32>
    %cst_19 = arith.constant dense<0.000000e+00> : vector<8x1536xf32>
    %26 = tpu.matmul %24, %25, %cst_19 {dimension_numbers = #tpu.dot_dimension_numbers<[1], [0], [0], [1], [0, 0, 1, 1], [], []>} : vector<8x3xf32>, vector<3x1536xf32>, vector<8x1536xf32> -> vector<8x1536xf32>
    %27 = arith.addf %19, %26 : vector<8x1536xf32>
    %c0_20 = arith.constant 0 : index
    %c0_21 = arith.constant 0 : index
    %c2 = arith.constant 2 : index
    %28 = vector.load %arg1[%c0_20, %c0_21, %c2] : memref<1x3x2176xf32, #tpu.memory_space<vmem>>, vector<1x3x2048xf32>
    %29 = vector.shape_cast %28 : vector<1x3x2048xf32> to vector<3x2048xf32>
    %c0_22 = arith.constant 0 : index
    %c6 = arith.constant 6 : index
    %30 = vector.load %arg2[%c0_22, %c6] : memref<8x81xf32, #tpu.memory_space<vmem>>, vector<8x3xf32>
    %31 = vector.extract_strided_slice %29 {offsets = [0, 0], sizes = [3, 1536], strides = [1, 1]} : vector<3x2048xf32> to vector<3x1536xf32>
    %cst_23 = arith.constant dense<0.000000e+00> : vector<8x1536xf32>
    %32 = tpu.matmul %30, %31, %cst_23 {dimension_numbers = #tpu.dot_dimension_numbers<[1], [0], [0], [1], [0, 0, 1, 1], [], []>} : vector<8x3xf32>, vector<3x1536xf32>, vector<8x1536xf32> -> vector<8x1536xf32>
    %33 = arith.addf %23, %32 : vector<8x1536xf32>
    %c0_24 = arith.constant 0 : index
    %c33 = arith.constant 33 : index
    %34 = vector.load %arg2[%c0_24, %c33] : memref<8x81xf32, #tpu.memory_space<vmem>>, vector<8x3xf32>
    %35 = vector.extract_strided_slice %29 {offsets = [0, 256], sizes = [3, 1536], strides = [1, 1]} : vector<3x2048xf32> to vector<3x1536xf32>
    %cst_25 = arith.constant dense<0.000000e+00> : vector<8x1536xf32>
    %36 = tpu.matmul %34, %35, %cst_25 {dimension_numbers = #tpu.dot_dimension_numbers<[1], [0], [0], [1], [0, 0, 1, 1], [], []>} : vector<8x3xf32>, vector<3x1536xf32>, vector<8x1536xf32> -> vector<8x1536xf32>
    %37 = arith.addf %27, %36 : vector<8x1536xf32>
    %c0_26 = arith.constant 0 : index
    %c60 = arith.constant 60 : index
    %38 = vector.load %arg2[%c0_26, %c60] : memref<8x81xf32, #tpu.memory_space<vmem>>, vector<8x3xf32>
    %39 = vector.extract_strided_slice %29 {offsets = [0, 512], sizes = [3, 1536], strides = [1, 1]} : vector<3x2048xf32> to vector<3x1536xf32>
    %cst_27 = arith.constant dense<0.000000e+00> : vector<8x1536xf32>
    %40 = tpu.matmul %38, %39, %cst_27 {dimension_numbers = #tpu.dot_dimension_numbers<[1], [0], [0], [1], [0, 0, 1, 1], [], []>} : vector<8x3xf32>, vector<3x1536xf32>, vector<8x1536xf32> -> vector<8x1536xf32>
    %41 = arith.addf %33, %40 : vector<8x1536xf32>
    %c0_28 = arith.constant 0 : index
    %c0_29 = arith.constant 0 : index
    %c16 = arith.constant 16 : index
    %42 = vector.load %arg1[%c0_28, %c0_29, %c16] : memref<1x3x2176xf32, #tpu.memory_space<vmem>>, vector<1x3x2048xf32>
    %43 = vector.shape_cast %42 : vector<1x3x2048xf32> to vector<3x2048xf32>
    %c0_30 = arith.constant 0 : index
    %c9 = arith.constant 9 : index
    %44 = vector.load %arg2[%c0_30, %c9] : memref<8x81xf32, #tpu.memory_space<vmem>>, vector<8x3xf32>
    %45 = vector.extract_strided_slice %43 {offsets = [0, 0], sizes = [3, 1536], strides = [1, 1]} : vector<3x2048xf32> to vector<3x1536xf32>
    %cst_31 = arith.constant dense<0.000000e+00> : vector<8x1536xf32>
    %46 = tpu.matmul %44, %45, %cst_31 {dimension_numbers = #tpu.dot_dimension_numbers<[1], [0], [0], [1], [0, 0, 1, 1], [], []>} : vector<8x3xf32>, vector<3x1536xf32>, vector<8x1536xf32> -> vector<8x1536xf32>
    %47 = arith.addf %37, %46 : vector<8x1536xf32>
    %c0_32 = arith.constant 0 : index
    %c36 = arith.constant 36 : index
    %48 = vector.load %arg2[%c0_32, %c36] : memref<8x81xf32, #tpu.memory_space<vmem>>, vector<8x3xf32>
    %49 = vector.extract_strided_slice %43 {offsets = [0, 256], sizes = [3, 1536], strides = [1, 1]} : vector<3x2048xf32> to vector<3x1536xf32>
    %cst_33 = arith.constant dense<0.000000e+00> : vector<8x1536xf32>
    %50 = tpu.matmul %48, %49, %cst_33 {dimension_numbers = #tpu.dot_dimension_numbers<[1], [0], [0], [1], [0, 0, 1, 1], [], []>} : vector<8x3xf32>, vector<3x1536xf32>, vector<8x1536xf32> -> vector<8x1536xf32>
    %51 = arith.addf %41, %50 : vector<8x1536xf32>
    %c0_34 = arith.constant 0 : index
    %c63 = arith.constant 63 : index
    %52 = vector.load %arg2[%c0_34, %c63] : memref<8x81xf32, #tpu.memory_space<vmem>>, vector<8x3xf32>
    %53 = vector.extract_strided_slice %43 {offsets = [0, 512], sizes = [3, 1536], strides = [1, 1]} : vector<3x2048xf32> to vector<3x1536xf32>
    %cst_35 = arith.constant dense<0.000000e+00> : vector<8x1536xf32>
    %54 = tpu.matmul %52, %53, %cst_35 {dimension_numbers = #tpu.dot_dimension_numbers<[1], [0], [0], [1], [0, 0, 1, 1], [], []>} : vector<8x3xf32>, vector<3x1536xf32>, vector<8x1536xf32> -> vector<8x1536xf32>
    %55 = arith.addf %47, %54 : vector<8x1536xf32>
    %c0_36 = arith.constant 0 : index
    %c0_37 = arith.constant 0 : index
    %c17 = arith.constant 17 : index
    %56 = vector.load %arg1[%c0_36, %c0_37, %c17] : memref<1x3x2176xf32, #tpu.memory_space<vmem>>, vector<1x3x2048xf32>
    %57 = vector.shape_cast %56 : vector<1x3x2048xf32> to vector<3x2048xf32>
    %c0_38 = arith.constant 0 : index
    %c12 = arith.constant 12 : index
    %58 = vector.load %arg2[%c0_38, %c12] : memref<8x81xf32, #tpu.memory_space<vmem>>, vector<8x3xf32>
    %59 = vector.extract_strided_slice %57 {offsets = [0, 0], sizes = [3, 1536], strides = [1, 1]} : vector<3x2048xf32> to vector<3x1536xf32>
    %cst_39 = arith.constant dense<0.000000e+00> : vector<8x1536xf32>
    %60 = tpu.matmul %58, %59, %cst_39 {dimension_numbers = #tpu.dot_dimension_numbers<[1], [0], [0], [1], [0, 0, 1, 1], [], []>} : vector<8x3xf32>, vector<3x1536xf32>, vector<8x1536xf32> -> vector<8x1536xf32>
    %61 = arith.addf %51, %60 : vector<8x1536xf32>
    %c0_40 = arith.constant 0 : index
    %c39 = arith.constant 39 : index
    %62 = vector.load %arg2[%c0_40, %c39] : memref<8x81xf32, #tpu.memory_space<vmem>>, vector<8x3xf32>
    %63 = vector.extract_strided_slice %57 {offsets = [0, 256], sizes = [3, 1536], strides = [1, 1]} : vector<3x2048xf32> to vector<3x1536xf32>
    %cst_41 = arith.constant dense<0.000000e+00> : vector<8x1536xf32>
    %64 = tpu.matmul %62, %63, %cst_41 {dimension_numbers = #tpu.dot_dimension_numbers<[1], [0], [0], [1], [0, 0, 1, 1], [], []>} : vector<8x3xf32>, vector<3x1536xf32>, vector<8x1536xf32> -> vector<8x1536xf32>
    %65 = arith.addf %55, %64 : vector<8x1536xf32>
    %c0_42 = arith.constant 0 : index
    %c66 = arith.constant 66 : index
    %66 = vector.load %arg2[%c0_42, %c66] : memref<8x81xf32, #tpu.memory_space<vmem>>, vector<8x3xf32>
    %67 = vector.extract_strided_slice %57 {offsets = [0, 512], sizes = [3, 1536], strides = [1, 1]} : vector<3x2048xf32> to vector<3x1536xf32>
    %cst_43 = arith.constant dense<0.000000e+00> : vector<8x1536xf32>
    %68 = tpu.matmul %66, %67, %cst_43 {dimension_numbers = #tpu.dot_dimension_numbers<[1], [0], [0], [1], [0, 0, 1, 1], [], []>} : vector<8x3xf32>, vector<3x1536xf32>, vector<8x1536xf32> -> vector<8x1536xf32>
    %69 = arith.addf %61, %68 : vector<8x1536xf32>
    %c0_44 = arith.constant 0 : index
    %c0_45 = arith.constant 0 : index
    %c18 = arith.constant 18 : index
    %70 = vector.load %arg1[%c0_44, %c0_45, %c18] : memref<1x3x2176xf32, #tpu.memory_space<vmem>>, vector<1x3x2048xf32>
    %71 = vector.shape_cast %70 : vector<1x3x2048xf32> to vector<3x2048xf32>
    %c0_46 = arith.constant 0 : index
    %c15 = arith.constant 15 : index
    %72 = vector.load %arg2[%c0_46, %c15] : memref<8x81xf32, #tpu.memory_space<vmem>>, vector<8x3xf32>
    %73 = vector.extract_strided_slice %71 {offsets = [0, 0], sizes = [3, 1536], strides = [1, 1]} : vector<3x2048xf32> to vector<3x1536xf32>
    %cst_47 = arith.constant dense<0.000000e+00> : vector<8x1536xf32>
    %74 = tpu.matmul %72, %73, %cst_47 {dimension_numbers = #tpu.dot_dimension_numbers<[1], [0], [0], [1], [0, 0, 1, 1], [], []>} : vector<8x3xf32>, vector<3x1536xf32>, vector<8x1536xf32> -> vector<8x1536xf32>
    %75 = arith.addf %65, %74 : vector<8x1536xf32>
    %c0_48 = arith.constant 0 : index
    %c42 = arith.constant 42 : index
    %76 = vector.load %arg2[%c0_48, %c42] : memref<8x81xf32, #tpu.memory_space<vmem>>, vector<8x3xf32>
    %77 = vector.extract_strided_slice %71 {offsets = [0, 256], sizes = [3, 1536], strides = [1, 1]} : vector<3x2048xf32> to vector<3x1536xf32>
    %cst_49 = arith.constant dense<0.000000e+00> : vector<8x1536xf32>
    %78 = tpu.matmul %76, %77, %cst_49 {dimension_numbers = #tpu.dot_dimension_numbers<[1], [0], [0], [1], [0, 0, 1, 1], [], []>} : vector<8x3xf32>, vector<3x1536xf32>, vector<8x1536xf32> -> vector<8x1536xf32>
    %79 = arith.addf %69, %78 : vector<8x1536xf32>
    %c0_50 = arith.constant 0 : index
    %c69 = arith.constant 69 : index
    %80 = vector.load %arg2[%c0_50, %c69] : memref<8x81xf32, #tpu.memory_space<vmem>>, vector<8x3xf32>
    %81 = vector.extract_strided_slice %71 {offsets = [0, 512], sizes = [3, 1536], strides = [1, 1]} : vector<3x2048xf32> to vector<3x1536xf32>
    %cst_51 = arith.constant dense<0.000000e+00> : vector<8x1536xf32>
    %82 = tpu.matmul %80, %81, %cst_51 {dimension_numbers = #tpu.dot_dimension_numbers<[1], [0], [0], [1], [0, 0, 1, 1], [], []>} : vector<8x3xf32>, vector<3x1536xf32>, vector<8x1536xf32> -> vector<8x1536xf32>
    %83 = arith.addf %75, %82 : vector<8x1536xf32>
    %c0_52 = arith.constant 0 : index
    %c0_53 = arith.constant 0 : index
    %c32 = arith.constant 32 : index
    %84 = vector.load %arg1[%c0_52, %c0_53, %c32] : memref<1x3x2176xf32, #tpu.memory_space<vmem>>, vector<1x3x2048xf32>
    %85 = vector.shape_cast %84 : vector<1x3x2048xf32> to vector<3x2048xf32>
    %c0_54 = arith.constant 0 : index
    %c18_55 = arith.constant 18 : index
    %86 = vector.load %arg2[%c0_54, %c18_55] : memref<8x81xf32, #tpu.memory_space<vmem>>, vector<8x3xf32>
    %87 = vector.extract_strided_slice %85 {offsets = [0, 0], sizes = [3, 1536], strides = [1, 1]} : vector<3x2048xf32> to vector<3x1536xf32>
    %cst_56 = arith.constant dense<0.000000e+00> : vector<8x1536xf32>
    %88 = tpu.matmul %86, %87, %cst_56 {dimension_numbers = #tpu.dot_dimension_numbers<[1], [0], [0], [1], [0, 0, 1, 1], [], []>} : vector<8x3xf32>, vector<3x1536xf32>, vector<8x1536xf32> -> vector<8x1536xf32>
    %89 = arith.addf %79, %88 : vector<8x1536xf32>
    %c0_57 = arith.constant 0 : index
    %c45 = arith.constant 45 : index
    %90 = vector.load %arg2[%c0_57, %c45] : memref<8x81xf32, #tpu.memory_space<vmem>>, vector<8x3xf32>
    %91 = vector.extract_strided_slice %85 {offsets = [0, 256], sizes = [3, 1536], strides = [1, 1]} : vector<3x2048xf32> to vector<3x1536xf32>
    %cst_58 = arith.constant dense<0.000000e+00> : vector<8x1536xf32>
    %92 = tpu.matmul %90, %91, %cst_58 {dimension_numbers = #tpu.dot_dimension_numbers<[1], [0], [0], [1], [0, 0, 1, 1], [], []>} : vector<8x3xf32>, vector<3x1536xf32>, vector<8x1536xf32> -> vector<8x1536xf32>
    %93 = arith.addf %83, %92 : vector<8x1536xf32>
    %c0_59 = arith.constant 0 : index
    %c72 = arith.constant 72 : index
    %94 = vector.load %arg2[%c0_59, %c72] : memref<8x81xf32, #tpu.memory_space<vmem>>, vector<8x3xf32>
    %95 = vector.extract_strided_slice %85 {offsets = [0, 512], sizes = [3, 1536], strides = [1, 1]} : vector<3x2048xf32> to vector<3x1536xf32>
    %cst_60 = arith.constant dense<0.000000e+00> : vector<8x1536xf32>
    %96 = tpu.matmul %94, %95, %cst_60 {dimension_numbers = #tpu.dot_dimension_numbers<[1], [0], [0], [1], [0, 0, 1, 1], [], []>} : vector<8x3xf32>, vector<3x1536xf32>, vector<8x1536xf32> -> vector<8x1536xf32>
    %97 = arith.addf %89, %96 : vector<8x1536xf32>
    %c0_61 = arith.constant 0 : index
    %c0_62 = arith.constant 0 : index
    %c33_63 = arith.constant 33 : index
    %98 = vector.load %arg1[%c0_61, %c0_62, %c33_63] : memref<1x3x2176xf32, #tpu.memory_space<vmem>>, vector<1x3x2048xf32>
    %99 = vector.shape_cast %98 : vector<1x3x2048xf32> to vector<3x2048xf32>
    %c0_64 = arith.constant 0 : index
    %c21 = arith.constant 21 : index
    %100 = vector.load %arg2[%c0_64, %c21] : memref<8x81xf32, #tpu.memory_space<vmem>>, vector<8x3xf32>
    %101 = vector.extract_strided_slice %99 {offsets = [0, 0], sizes = [3, 1536], strides = [1, 1]} : vector<3x2048xf32> to vector<3x1536xf32>
    %cst_65 = arith.constant dense<0.000000e+00> : vector<8x1536xf32>
    %102 = tpu.matmul %100, %101, %cst_65 {dimension_numbers = #tpu.dot_dimension_numbers<[1], [0], [0], [1], [0, 0, 1, 1], [], []>} : vector<8x3xf32>, vector<3x1536xf32>, vector<8x1536xf32> -> vector<8x1536xf32>
    %103 = arith.addf %93, %102 : vector<8x1536xf32>
    %c0_66 = arith.constant 0 : index
    %c48 = arith.constant 48 : index
    %104 = vector.load %arg2[%c0_66, %c48] : memref<8x81xf32, #tpu.memory_space<vmem>>, vector<8x3xf32>
    %105 = vector.extract_strided_slice %99 {offsets = [0, 256], sizes = [3, 1536], strides = [1, 1]} : vector<3x2048xf32> to vector<3x1536xf32>
    %cst_67 = arith.constant dense<0.000000e+00> : vector<8x1536xf32>
    %106 = tpu.matmul %104, %105, %cst_67 {dimension_numbers = #tpu.dot_dimension_numbers<[1], [0], [0], [1], [0, 0, 1, 1], [], []>} : vector<8x3xf32>, vector<3x1536xf32>, vector<8x1536xf32> -> vector<8x1536xf32>
    %107 = arith.addf %97, %106 : vector<8x1536xf32>
    %c0_68 = arith.constant 0 : index
    %c75 = arith.constant 75 : index
    %108 = vector.load %arg2[%c0_68, %c75] : memref<8x81xf32, #tpu.memory_space<vmem>>, vector<8x3xf32>
    %109 = vector.extract_strided_slice %99 {offsets = [0, 512], sizes = [3, 1536], strides = [1, 1]} : vector<3x2048xf32> to vector<3x1536xf32>
    %cst_69 = arith.constant dense<0.000000e+00> : vector<8x1536xf32>
    %110 = tpu.matmul %108, %109, %cst_69 {dimension_numbers = #tpu.dot_dimension_numbers<[1], [0], [0], [1], [0, 0, 1, 1], [], []>} : vector<8x3xf32>, vector<3x1536xf32>, vector<8x1536xf32> -> vector<8x1536xf32>
    %111 = arith.addf %103, %110 : vector<8x1536xf32>
    %c0_70 = arith.constant 0 : index
    %c0_71 = arith.constant 0 : index
    %c34 = arith.constant 34 : index
    %112 = vector.load %arg1[%c0_70, %c0_71, %c34] : memref<1x3x2176xf32, #tpu.memory_space<vmem>>, vector<1x3x2048xf32>
    %113 = vector.shape_cast %112 : vector<1x3x2048xf32> to vector<3x2048xf32>
    %c0_72 = arith.constant 0 : index
    %c24 = arith.constant 24 : index
    %114 = vector.load %arg2[%c0_72, %c24] : memref<8x81xf32, #tpu.memory_space<vmem>>, vector<8x3xf32>
    %115 = vector.extract_strided_slice %113 {offsets = [0, 0], sizes = [3, 1536], strides = [1, 1]} : vector<3x2048xf32> to vector<3x1536xf32>
    %cst_73 = arith.constant dense<0.000000e+00> : vector<8x1536xf32>
    %116 = tpu.matmul %114, %115, %cst_73 {dimension_numbers = #tpu.dot_dimension_numbers<[1], [0], [0], [1], [0, 0, 1, 1], [], []>} : vector<8x3xf32>, vector<3x1536xf32>, vector<8x1536xf32> -> vector<8x1536xf32>
    %117 = arith.addf %107, %116 : vector<8x1536xf32>
    %c0_74 = arith.constant 0 : index
    %c51 = arith.constant 51 : index
    %118 = vector.load %arg2[%c0_74, %c51] : memref<8x81xf32, #tpu.memory_space<vmem>>, vector<8x3xf32>
    %119 = vector.extract_strided_slice %113 {offsets = [0, 256], sizes = [3, 1536], strides = [1, 1]} : vector<3x2048xf32> to vector<3x1536xf32>
    %cst_75 = arith.constant dense<0.000000e+00> : vector<8x1536xf32>
    %120 = tpu.matmul %118, %119, %cst_75 {dimension_numbers = #tpu.dot_dimension_numbers<[1], [0], [0], [1], [0, 0, 1, 1], [], []>} : vector<8x3xf32>, vector<3x1536xf32>, vector<8x1536xf32> -> vector<8x1536xf32>
    %121 = arith.addf %111, %120 : vector<8x1536xf32>
    %c0_76 = arith.constant 0 : index
    %c78 = arith.constant 78 : index
    %122 = vector.load %arg2[%c0_76, %c78] : memref<8x81xf32, #tpu.memory_space<vmem>>, vector<8x3xf32>
    %123 = vector.extract_strided_slice %113 {offsets = [0, 512], sizes = [3, 1536], strides = [1, 1]} : vector<3x2048xf32> to vector<3x1536xf32>
    %cst_77 = arith.constant dense<0.000000e+00> : vector<8x1536xf32>
    %124 = tpu.matmul %122, %123, %cst_77 {dimension_numbers = #tpu.dot_dimension_numbers<[1], [0], [0], [1], [0, 0, 1, 1], [], []>} : vector<8x3xf32>, vector<3x1536xf32>, vector<8x1536xf32> -> vector<8x1536xf32>
    %125 = arith.addf %117, %124 : vector<8x1536xf32>
    %126 = arith.addf %125, %121 : vector<8x1536xf32>
    %127 = vector.extract_strided_slice %126 {offsets = [0, 0], sizes = [8, 1229], strides = [1, 1]} : vector<8x1536xf32> to vector<8x1229xf32>
    %128 = vector.extract_strided_slice %126 {offsets = [0, 1], sizes = [8, 1229], strides = [1, 1]} : vector<8x1536xf32> to vector<8x1229xf32>
    %129 = arith.maximumf %127, %128 : vector<8x1229xf32>
    %130 = vector.extract_strided_slice %126 {offsets = [0, 16], sizes = [8, 1229], strides = [1, 1]} : vector<8x1536xf32> to vector<8x1229xf32>
    %131 = arith.maximumf %129, %130 : vector<8x1229xf32>
    %132 = vector.extract_strided_slice %126 {offsets = [0, 17], sizes = [8, 1229], strides = [1, 1]} : vector<8x1536xf32> to vector<8x1229xf32>
    %133 = arith.maximumf %131, %132 : vector<8x1229xf32>
    %134 = vector.extract_strided_slice %126 {offsets = [0, 256], sizes = [8, 1229], strides = [1, 1]} : vector<8x1536xf32> to vector<8x1229xf32>
    %135 = arith.maximumf %133, %134 : vector<8x1229xf32>
    %136 = vector.extract_strided_slice %126 {offsets = [0, 257], sizes = [8, 1229], strides = [1, 1]} : vector<8x1536xf32> to vector<8x1229xf32>
    %137 = arith.maximumf %135, %136 : vector<8x1229xf32>
    %138 = vector.extract_strided_slice %126 {offsets = [0, 272], sizes = [8, 1229], strides = [1, 1]} : vector<8x1536xf32> to vector<8x1229xf32>
    %139 = arith.maximumf %137, %138 : vector<8x1229xf32>
    %140 = vector.extract_strided_slice %126 {offsets = [0, 273], sizes = [8, 1229], strides = [1, 1]} : vector<8x1536xf32> to vector<8x1229xf32>
    %141 = arith.maximumf %139, %140 : vector<8x1229xf32>
    %142 = vector.broadcast %0 : vector<1x1229xf32> to vector<8x1229xf32>
    %143 = arith.mulf %141, %142 : vector<8x1229xf32>
    %144 = vector.shape_cast %143 : vector<8x1229xf32> to vector<1x8x1229xf32>
    %cst_78 = arith.constant dense<0.000000e+00> : vector<1xf32>
    %145 = vector.multi_reduction <add>, %144, %cst_78 [1, 2] : vector<1x8x1229xf32> to vector<1xf32>
    %146 = vector.shape_cast %145 : vector<1xf32> to vector<1x1x1xf32>
    %147 = vector.extract %146[0, 0, 0] : f32 from vector<1x1x1xf32>
    %148 = arith.addf %147, %1 : f32
    %149 = vector.broadcast %148 : f32 to vector<1x128xf32>
    %c0_79 = arith.constant 0 : index
    %c0_80 = arith.constant 0 : index
    %c0_81 = arith.constant 0 : index
    %150 = vector.load %arg5[%c0_79, %c0_80, %c0_81] : memref<1x1x128xf32, #tpu.memory_space<vmem>>, vector<1x1x128xf32>
    %151 = vector.shape_cast %150 : vector<1x1x128xf32> to vector<1x128xf32>
    %152 = vector.shape_cast %149 : vector<1x128xf32> to vector<1x1x128xf32>
    tpu.vector_store %arg5[%c0_79, %c0_80, %c0_81], %152 {strides = array<i32>} : memref<1x1x128xf32, #tpu.memory_space<vmem>>, vector<1x1x128xf32>,
    return
  }
  func.func @transform_0(%arg0: i32) -> (i32, i32, i32) {
    %c0_i32 = arith.constant 0 : i32
    %c0_i32_0 = arith.constant 0 : i32
    %c0_i32_1 = arith.constant 0 : i32
    return %arg0, %c0_i32, %c0_i32_0 : i32, i32, i32
  }
  func.func @transform_1(%arg0: i32) -> (i32, i32) {
    %c0_i32 = arith.constant 0 : i32
    %c0_i32_0 = arith.constant 0 : i32
    %c0_i32_1 = arith.constant 0 : i32
    return %c0_i32, %c0_i32_0 : i32, i32
  }
  func.func @transform_2(%arg0: i32) -> (i32, i32) {
    %c0_i32 = arith.constant 0 : i32
    %c0_i32_0 = arith.constant 0 : i32
    %c0_i32_1 = arith.constant 0 : i32
    return %c0_i32, %c0_i32_0 : i32, i32
  }
  func.func @transform_3(%arg0: i32) -> (i32, i32) {
    %c0_i32 = arith.constant 0 : i32
    %c0_i32_0 = arith.constant 0 : i32
    %c0_i32_1 = arith.constant 0 : i32
    return %c0_i32, %c0_i32_0 : i32, i32
  }
  func.func @transform_4(%arg0: i32) -> (i32, i32, i32) {
    %c0_i32 = arith.constant 0 : i32
    %c0_i32_0 = arith.constant 0 : i32
    %c0_i32_1 = arith.constant 0 : i32
    return %arg0, %c0_i32, %c0_i32_0 : i32, i32, i32
  }
}

</mosaic_0001>

<bundles_post_ra>
// kernel: tpu_custom_call.1
= control target key start
LH: loop header
LB: loop body
LE: loop exit
PB: predicated region body
PF: predicated region fallthrough
CT: control target
= control target key end

     0   :  { %s16624_s0 = inlined_call_operand.vmem [shape: f32[2,3,2176], index: 0, kind: input, shape index: {}]   ;;  %s16625_s1 = inlined_call_operand.vmem [shape: f32[8,81], index: 1, kind: input, shape index: {}]   ;;  %s16626_s2 = inlined_call_operand.vmem [shape: f32[1,1229], index: 2, kind: input, shape index: {}]   ;;  %s16627_s3 = inlined_call_operand.<no memory space> [shape: f32[1,1], index: 3, kind: input, shape index: {}]   ;;  %s16628_s4 = inlined_call_operand.hbm [shape: f32[2,1,128], index: 4, kind: output, shape index: {}]  }
   0x1   :  { %9 = sst [smem:[#allocation2]] %s16627_s3 }
   0x2   :  { %10 = vsyncpa [#allocation4], 0 }
   0x3   :  { %12 = vsyncpa [#allocation4 + $0x1], 0  ;;  %s14533_s17 = smov 0   ;;  %s14535_s18 = smov 0  }
   0x4   :  { %s14537_s19 = smov 0   ;;  %s14539_s20 = smov 0  }
   0x5 LB: > { %s14554_s3 = sadd.s32 4294967295, %s14469_s20   ;;  %s13454_s21 = sadd.s32 4294967294, %s14469_s20   ;;  %s14469_s20 = sphi %s14539_s20, %s16634_s20   ;;  %s14465_s19 = sphi %s14537_s19, %s16633_s19   ;;  %s14461_s18 = sphi %s14535_s18, %s16632_s18   ;;  %s14457_s17 = sphi %s14533_s17, %s16631_s17  }
   0x6   : > { %s14558_s22 = sadd.s32 1, %s14469_s20   ;;  %s114_s23 = sadd.s32 1, %s14465_s19 }
   0x7   : > { %s111_s24 = ssub.s32 %s14469_s20, %s14558_s22  ;;  %p124_p0 = scmp.ne.s32.totalorder %s14465_s19, %s14461_s18 }
   0x8   : > { %p112_p1 = scmp.eq.s32.totalorder %s111_s24, 0  ;;  %p125_p2 = scmp.eq.s32.totalorder %s14554_s3, 1 }
   0x9   : > { %p130_p3 = scmp.ne.s32.totalorder %s14461_s18, %s14457_s17  ;;  %p131_p4 = scmp.eq.s32.totalorder %s13454_s21, 1 }
   0xa   : > { %s14569_s25 = scalar_select %p112_p1, %s14465_s19, %s114_s23  }
   0xb   : > { %p14571_p5 = por %p125_p2, %p124_p0  ;;  %p14575_p6 = por %p131_p4, %p130_p3 }
   0xc   : > { %p13457_p7 = scmp.ge.s32.totalorder %s14469_s20, 1  ;;  %p166_p8 = scmp.lt.s32.totalorder %s14469_s20, 3 }
   0xe   : > { %p167_p9 = pnand %p13457_p7, %p166_p8 }
   0xf   : > { %v14584_v0 = vld [vmem:[%s16625_s1] sm:$0xff] (!%p167_p9)  ;;  %p191_p10 = scmp.lt.s32.totalorder (!%p167_p9), %s14554_s3, 1  ;;  %s14471_s30 = smov (!%p167_p9), 74   ;;  %v14472_v1 = vmov (!%p167_p9), 0.0   ;;  %vm226_vm0 = vcmask (!%p167_p9), 1042432   ;;  %vm223_vm1 = vcmask (!%p167_p9), 23552  }
  0x10   : > { %170 = sbr.rel (%p167_p9) target bundleno = 1135 (0x46f), region = 36  ;;  %209 = vrot.lane.b32.xlu0 (!%p167_p9), %v14584_v0, %s14471_s30  ;;  %315 = vmatprep.mubr.f32.mxu0 (!%p167_p9), %v14472_v1  ;;  %s14473_s10 = smov (!%p167_p9), 127   ;;  %vm1169_vm2 = vcmask (!%p167_p9), 1039360   ;;  %vm3028_vm3 = vcmask (!%p167_p9), 1031168   ;;  %vm4469_vm4 = vcmask (!%p167_p9), 916480   ;;  %vm5910_vm5 = vcmask (!%p167_p9), 908288  }
  0x11   : > { %386 = vmatprep.mubr.f32.mxu1 (!%p167_p9), %v14472_v1  ;;  %s14474_s11 = smov (!%p167_p9), 125   ;;  %s14475_s12 = smov (!%p167_p9), 101   ;;  %vm7351_vm6 = vcmask (!%p167_p9), 900096   ;;  %vm8792_vm7 = vcmask (!%p167_p9), 785408   ;;  %vm10233_vm8 = vcmask (!%p167_p9), 777216   ;;  %vm11674_vm9 = vcmask (!%p167_p9), 769024  }
  0x12   : > { %s14476_s13 = smov (!%p167_p9), 98   ;;  %s14477_s14 = smov (!%p167_p9), 71   ;;  %vm13371_vm10 = vcmask (!%p167_p9), 629760  }
  0x13   : > { %s14478_s15 = smov (!%p167_p9), 126   ;;  %s14479_s16 = smov (!%p167_p9), 122  }
  0x14   : > { %s14480_s21 = smov (!%p167_p9), 95   ;;  %s14481_s23 = smov (!%p167_p9), 68  }
  0x15   : > { %s14482_s24 = smov (!%p167_p9), 112   ;;  %s14483_s28 = smov (!%p167_p9), 119  }
  0x16   : > { %s14484_s29 = smov (!%p167_p9), 92   ;;  %s14485_s30 = smov (!%p167_p9), 65  }
  0x17   : > { %s192_s5 = scalar_select %p191_p10, %s14554_s3, 1 }
  0x18   : > { %s14488_s7 = smov 89   ;;  %s14489_s8 = smov 62  }
  0x19   : > { %s14260_s6 = smul.u32 68, %s192_s5  ;;  %s14486_s5 = smov 111  }
  0x1b   : > { %s14594_s9 = scalar_lea.vmem %s16624_s0, %s14260_s6  ;;  %s14487_s6 = smov 116  }
  0x1c   : > { %v1118_v2 = vld [vmem:[%s14594_s9 + $0x8] sm:$0x77]  ;;  %v1117_v3 = vld [vmem:[%s14594_s9] sm:$0x77]  ;;  %v1119_v6 = vld [vmem:[%s14594_s9 + $0x10] sm:$0x77] }
  0x1d   : > { %1147 = vrot.lane.b32.xlu1 %v1118_v2, %s14473_s10  ;;  %v1137_v4 = vcombine.high %v1117_v3, %v1117_v3  ;;  %v1138_v5 = vcombine.high %v1118_v2, %v1118_v2  ;;  %v14604_v7 = vld [vmem:[%s14594_s9 + $0x10] sm:$0x77]  ;;  %v1139_v8 = vcombine.high %v1119_v6, %v1119_v6  ;;  %v14612_v10 = vld [vmem:[%s14594_s9 + $0x18] sm:$0x77]  ;;  %v14615_v11 = vld [vmem:[%s14594_s9 + $0x20] sm:$0x77] }
  0x1e   : > { %v14609_v9 = vcombine.high %v14604_v7, %v14604_v7  ;;  %v1120_v12 = vld [vmem:[%s14594_s9 + $0x18] sm:$0x77]  ;;  %v14620_v13 = vcombine.high %v14612_v10, %v14612_v10  ;;  %v14624_v14 = vcombine.high %v14615_v11, %v14615_v11  ;;  %v14627_v15 = vld [vmem:[%s14594_s9 + $0x28] sm:$0x77]  ;;  %v1121_v18 = vld [vmem:[%s14594_s9 + $0x20] sm:$0x77] }
  0x1f   : > { %1145 = vrot.lane.b32.xlu0 %v1137_v4, %s14473_s10  ;;  %v14634_v16 = vcombine.high %v14627_v15, %v14627_v15  ;;  %v1140_v17 = vcombine.high %v1120_v12, %v1120_v12  ;;  %v1141_v19 = vcombine.high %v1121_v18, %v1121_v18  ;;  %v1122_v20 = vld [vmem:[%s14594_s9 + $0x28] sm:$0x77]  ;;  %v1123_v22 = vld [vmem:[%s14594_s9 + $0x30] sm:$0x77]  ;;  %v1124_v24 = vld [vmem:[%s14594_s9 + $0x38] sm:$0x77] }
  0x20   : > { %13459 = vmatprep.subr.msk.mxu0 %vm226_vm0, %v14609_v9  ;;  %13462 = vmatprep.subr.msk.mxu1 %vm226_vm0, %v14620_v13  ;;  %v1142_v21 = vcombine.high %v1122_v20, %v1122_v20  ;;  %v2069_v23 = vcombine.high %v1123_v22, %v1123_v22  ;;  %v2525_v25 = vcombine.high %v1124_v24, %v1124_v24  ;;  %v2976_v26 = vld [vmem:[%s14594_s9] sm:$0x77]  ;;  %v2977_v29 = vld [vmem:[%s14594_s9 + $0x8] sm:$0x77]  ;;  %v2978_v31 = vld [vmem:[%s14594_s9 + $0x10] sm:$0x77] }
  0x21   : > { %1143 = vrot.lane.b32.xlu1 %v1117_v3, %s14473_s10  ;;  %13460 = vmatpush1.msk.msra.mxu0 %vm226_vm0, %v14604_v7  ;;  %v1125_v27 = vld [vmem:[%s14594_s9 + $0x40] sm:$0x7]  ;;  %v2996_v28 = vcombine.high %v2976_v26, %v2976_v26  ;;  %v2997_v30 = vcombine.high %v2977_v29, %v2977_v29  ;;  %v2998_v32 = vcombine.high %v2978_v31, %v2978_v31  ;;  %v2979_v33 = vld [vmem:[%s14594_s9 + $0x18] sm:$0x77]  ;;  %v2981_v37 = vld [vmem:[%s14594_s9 + $0x28] sm:$0x77] }
  0x22   : > { %13463 = vmatpush1.msk.msra.mxu1 %vm226_vm0, %v14612_v10  ;;  %13465 = vmatprep.subr.msk.mxu0 %vm226_vm0, %v14624_v14  ;;  %v2999_v34 = vcombine.high %v2979_v33, %v2979_v33  ;;  %v2980_v35 = vld [vmem:[%s14594_s9 + $0x20] sm:$0x77]  ;;  %v3001_v38 = vcombine.high %v2981_v37, %v2981_v37  ;;  %v2982_v39 = vld [vmem:[%s14594_s9 + $0x30] sm:$0x77]  ;;  %v2983_v41 = vld [vmem:[%s14594_s9 + $0x38] sm:$0x77] }
  0x23   : > { %1149 = vrot.lane.b32.xlu0 %v1138_v5, %s14473_s10  ;;  %13468 = vmatprep.subr.msk.mxu1 %vm226_vm0, %v14634_v16  ;;  %v3000_v36 = vcombine.high %v2980_v35, %v2980_v35  ;;  %v3510_v40 = vcombine.high %v2982_v39, %v2982_v39  ;;  %v3966_v42 = vcombine.high %v2983_v41, %v2983_v41  ;;  %v4417_v43 = vld [vmem:[%s14594_s9] sm:$0x77]  ;;  %v4418_v46 = vld [vmem:[%s14594_s9 + $0x8] sm:$0x77]  ;;  %v4419_v48 = vld [vmem:[%s14594_s9 + $0x10] sm:$0x77] }
  0x24   : > { %v2984_v44 = vld [vmem:[%s14594_s9 + $0x40] sm:$0x7]  ;;  %v4437_v45 = vcombine.high %v4417_v43, %v4417_v43  ;;  %v4438_v47 = vcombine.high %v4418_v46, %v4418_v46  ;;  %v4439_v49 = vcombine.high %v4419_v48, %v4419_v48  ;;  %v4420_v50 = vld [vmem:[%s14594_s9 + $0x18] sm:$0x77]  ;;  %v4422_v54 = vld [vmem:[%s14594_s9 + $0x28] sm:$0x77] }
  0x25   : > { %1151 = vrot.lane.b32.xlu1 %v1119_v6, %s14473_s10  ;;  %v4440_v51 = vcombine.high %v4420_v50, %v4420_v50  ;;  %v4421_v52 = vld [vmem:[%s14594_s9 + $0x20] sm:$0x77]  ;;  %v4442_v55 = vcombine.high %v4422_v54, %v4422_v54  ;;  %v4423_v56 = vld [vmem:[%s14594_s9 + $0x30] sm:$0x77]  ;;  %v206_v59 = vld [vmem:[%s14594_s9 + $0x38] sm:$0x77] }
  0x26   : > { %v4441_v53 = vcombine.high %v4421_v52, %v4421_v52  ;;  %v14717_v57 = vld [vmem:[%s14594_s9 + $0x30] sm:$0x77]  ;;  %v4951_v60 = vcombine.high %v4423_v56, %v4423_v56  ;;  %v222_v62 = vcombine.high %v206_v59, %v206_v59  ;;  %v4424_v63 = vld [vmem:[%s14594_s9 + $0x38] sm:$0x77]  ;;  %v199_v2 = vld [vmem:[%s14594_s9] sm:$0x77] }
  0x27   : > { %1128 = vrot.lane.b32.xlu0 %v14584_v0, %s14474_s11  ;;  %v14727_v61 = vcombine.high %v14717_v57, %v14717_v57  ;;  %v14739_v3 = vld [vmem:[%s14594_s9 + $0x8] sm:$0x77]  ;;  %v5407_v5 = vcombine.high %v4424_v63, %v4424_v63  ;;  %v679_v6 = vcombine.high %v199_v2, %v199_v2  ;;  %s14490_s11 = smov 110  }
  0x29   : > { %1153 = vrot.lane.b32.xlu1 %v1139_v8, %s14473_s10  ;;  %v14753_v8 = vcombine.high %v14739_v3, %v14739_v3 }
  0x2b   : > { %1155 = vrot.lane.b32.xlu0 %v1120_v12, %s14473_s10 }
  0x2d   : > { %1157 = vrot.lane.b32.xlu1 %v1140_v17, %s14473_s10  ;;  %v5858_v17 = vld [vmem:[%s14594_s9] sm:$0x77] }
  0x2f   : > { %1159 = vrot.lane.b32.xlu0 %v1121_v18, %s14473_s10 }
  0x31   : > { %1161 = vrot.lane.b32.xlu1 %v1141_v19, %s14473_s10  ;;  %v4425_v19 = vld [vmem:[%s14594_s9 + $0x40] sm:$0x7] }
  0x33   : > { %1163 = vrot.lane.b32.xlu0 %v1122_v20, %s14473_s10 }
  0x35   : > { %1165 = vrot.lane.b32.xlu1 %v1142_v21, %s14473_s10  ;;  %v5878_v21 = vcombine.high %v5858_v17, %v5858_v17 }
  0x37   : > { %1167 = vrot.lane.b32.xlu0 %v1123_v22, %s14473_s10 }
  0x39   : > { %1634 = vrot.lane.b32.xlu1 %v14584_v0, %s14475_s12  ;;  %s14491_s12 = smov 113  }
  0x3b   : > { %2066 = vrot.lane.b32.xlu0 %v14584_v0, %s14476_s13  ;;  %s14492_s13 = smov 86  }
  0x3d   : > { %2070 = vrot.lane.b32.xlu1 %v2069_v23, %s14473_s10 }
  0x3f   : > { %2072 = vrot.lane.b32.xlu0 %v1124_v24, %s14473_s10  ;;  %v5859_v24 = vld [vmem:[%s14594_s9 + $0x8] sm:$0x77] }
  0x41   : > { %2522 = vrot.lane.b32.xlu1 %v14584_v0, %s14477_s14  ;;  %s14493_s14 = smov 59  }
  0x43   : > { %2526 = vrot.lane.b32.xlu0 %v2525_v25, %s14473_s10 }
  0x45   : > { %2528 = vrot.lane.b32.xlu1 %v1125_v27, %s14473_s10 }
  0x47   : > { %3004 = vrot.lane.b32.xlu0 %v2996_v28, %s14478_s15  ;;  %v5879_v28 = vcombine.high %v5859_v24, %v5859_v24 }
  0x49   : > { %3006 = vrot.lane.b32.xlu1 %v2977_v29, %s14478_s15 }
  0x4b   : > { %3002 = vrot.lane.b32.xlu0 %v2976_v26, %s14478_s15 }
  0x4d   : > { %3008 = vrot.lane.b32.xlu1 %v2997_v30, %s14478_s15 }
  0x4f   : > { %3010 = vrot.lane.b32.xlu0 %v2978_v31, %s14478_s15  ;;  %v5860_v31 = vld [vmem:[%s14594_s9 + $0x10] sm:$0x77] }
  0x51   : > { %2987 = vrot.lane.b32.xlu1 %v14584_v0, %s14479_s16 }
  0x53   : > { %3012 = vrot.lane.b32.xlu0 %v2998_v32, %s14478_s15 }
  0x55   : > { %3014 = vrot.lane.b32.xlu1 %v2979_v33, %s14478_s15 }
  0x57   : > { %3016 = vrot.lane.b32.xlu0 %v2999_v34, %s14478_s15 }
  0x59   : > { %3018 = vrot.lane.b32.xlu1 %v2980_v35, %s14478_s15 }
  0x5b   : > { %3020 = vrot.lane.b32.xlu0 %v3000_v36, %s14478_s15 }
  0x5d   : > { %3022 = vrot.lane.b32.xlu1 %v2981_v37, %s14478_s15  ;;  %v5880_v37 = vcombine.high %v5860_v31, %v5860_v31 }
  0x5f   : > { %3024 = vrot.lane.b32.xlu0 %v3001_v38, %s14478_s15  ;;  %v5861_v38 = vld [vmem:[%s14594_s9 + $0x18] sm:$0x77] }
  0x61   : > { %3026 = vrot.lane.b32.xlu1 %v2982_v39, %s14478_s15 }
  0x63   : > { %3507 = vrot.lane.b32.xlu0 %v14584_v0, %s14480_s21 }
  0x65   : > { %3511 = vrot.lane.b32.xlu1 %v3510_v40, %s14478_s15 }
  0x67   : > { %3513 = vrot.lane.b32.xlu0 %v2983_v41, %s14478_s15 }
  0x69   : > { %3963 = vrot.lane.b32.xlu1 %v14584_v0, %s14481_s23 }
  0x6b   : > { %3967 = vrot.lane.b32.xlu0 %v3966_v42, %s14478_s15 }
  0x6d   : > { %3969 = vrot.lane.b32.xlu1 %v2984_v44, %s14478_s15  ;;  %s14494_s15 = smov 96  }
  0x6f   : > { %4445 = vrot.lane.b32.xlu0 %v4437_v45, %s14482_s24  ;;  %v5862_v45 = vld [vmem:[%s14594_s9 + $0x20] sm:$0x77] }
  0x71   : > { %4447 = vrot.lane.b32.xlu1 %v4418_v46, %s14482_s24 }
  0x73   : > { %4443 = vrot.lane.b32.xlu0 %v4417_v43, %s14482_s24  ;;  %v5881_v43 = vcombine.high %v5861_v38, %v5861_v38 }
  0x75   : > { %4449 = vrot.lane.b32.xlu1 %v4438_v47, %s14482_s24 }
  0x77   : > { %4451 = vrot.lane.b32.xlu0 %v4419_v48, %s14482_s24 }
  0x79   : > { %4428 = vrot.lane.b32.xlu1 %v14584_v0, %s14483_s28  ;;  %s14495_s28 = smov 83  }
  0x7b   : > { %4453 = vrot.lane.b32.xlu0 %v4439_v49, %s14482_s24 }
  0x7d   : > { %4455 = vrot.lane.b32.xlu1 %v4420_v50, %s14482_s24  ;;  %v5882_v50 = vcombine.high %v5862_v45, %v5862_v45 }
  0x7f   : > { %4457 = vrot.lane.b32.xlu0 %v4440_v51, %s14482_s24 }
  0x81   : > { %4459 = vrot.lane.b32.xlu1 %v4421_v52, %s14482_s24 }
  0x82   : > { %v210_v58 = vpop.permute.xlu0 %209 }
  0x83   : > { %4461 = vrot.lane.b32.xlu0 %v4441_v53, %s14482_s24  ;;  %13461 = vmatmul.mubr.msk.f32.vlgmr.msra.gmra.mrb[0].mxu0 %vm223_vm1, %v210_v58  ;;  %v5863_v53 = vld [vmem:[%s14594_s9 + $0x28] sm:$0x77] }
  0x84   : > { %13464 = vmatmul.mubr.msk.f32.vlgmr.msra.gmra.mrb[0].mxu1 %vm223_vm1, %v210_v58  ;;  %13466 = vmatpush1.msk.msra.mxu0 %vm226_vm0, %v14615_v11 }
  0x85   : > { %4463 = vrot.lane.b32.xlu1 %v4422_v54, %s14482_s24  ;;  %457 = vmatprep.mubr.f32.mxu0 %v14472_v1 }
  0x86   : > { %13469 = vmatpush1.msk.msra.mxu1 %vm226_vm0, %v14627_v15  ;;  %528 = vmatprep.mubr.f32.mxu1 %v14472_v1 }
  0x87   : > { %4465 = vrot.lane.b32.xlu0 %v4442_v55, %s14482_s24  ;;  %13467 = vmatmul.mubr.msk.f32.vlgmr.msra.gmra.mrb[2].mxu0 %vm223_vm1, %v210_v58 }
  0x88   : > { %13470 = vmatmul.mubr.msk.f32.vlgmr.msra.gmra.mrb[2].mxu1 %vm223_vm1, %v210_v58  ;;  %13471 = vmatprep.subr.msk.mxu0 %vm226_vm0, %v14727_v61 }
  0x89   : > { %4467 = vrot.lane.b32.xlu1 %v4423_v56, %s14482_s24  ;;  %13474 = vmatprep.subr.msk.mxu1 %vm226_vm0, %v222_v62  ;;  %v5883_v56 = vcombine.high %v5863_v53, %v5863_v53 }
  0x8a   : > { %13472 = vmatpush1.msk.msra.mxu0 %vm226_vm0, %v14717_v57  ;;  %599 = vmatprep.mubr.f32.mxu0 %v14472_v1 }
  0x8b   : > { %4948 = vrot.lane.b32.xlu0 %v14584_v0, %s14484_s29  ;;  %13475 = vmatpush1.msk.msra.mxu1 %vm226_vm0, %v206_v59  ;;  %s14496_s29 = smov 56  }
  0x8c   : > { %670 = vmatprep.mubr.f32.mxu1 %v14472_v1  ;;  %13473 = vmatmul.mubr.msk.f32.vlgmr.msra.gmra.mrb[4].mxu0 %vm223_vm1, %v210_v58 }
  0x8d   : > { %4952 = vrot.lane.b32.xlu1 %v4951_v60, %s14482_s24  ;;  %13476 = vmatmul.mubr.msk.f32.vlgmr.msra.gmra.mrb[4].mxu1 %vm223_vm1, %v210_v58  ;;  %v5864_v60 = vld [vmem:[%s14594_s9 + $0x30] sm:$0x77] }
  0x8e   : > { %13477 = vmatprep.subr.msk.mxu0 %vm226_vm0, %v679_v6  ;;  %13480 = vmatprep.subr.msk.mxu1 %vm226_vm0, %v14753_v8 }
  0x8f   : > { %v14744_v4 = vpop.permute.xlu1 %1147  ;;  %4954 = vrot.lane.b32.xlu0 %v4424_v63, %s14482_s24  ;;  %13478 = vmatpush1.msk.msra.mxu0 %vm226_vm0, %v199_v2  ;;  %v5866_v2 = vld [vmem:[%s14594_s9 + $0x40] sm:$0x7] }
  0x90   : > { %755 = vmatprep.mubr.f32.mxu0 %v14472_v1  ;;  %13481 = vmatpush1.msk.msra.mxu1 %vm226_vm0, %v14739_v3 }
  0x91   : > { %v1146_v12 = vpop.permute.xlu0 %1145  ;;  %5404 = vrot.lane.b32.xlu1 %v14584_v0, %s14485_s30  ;;  %826 = vmatprep.mubr.f32.mxu1 %v14472_v1  ;;  %s14497_s30 = smov 107  }
  0x92   : > { %13479 = vmatmul.mubr.msk.f32.vlgmr.msra.gmra.mrb[0].mxu0 %vm223_vm1, %v14584_v0  ;;  %13482 = vmatmul.mubr.msk.f32.vlgmr.msra.gmra.mrb[0].mxu1 %vm223_vm1, %v14584_v0  ;;  %v1171_v29 = vsel %vm1169_vm2, %v1146_v12, %v14744_v4 }
  0x93   : > { %v1144_v18 = vpop.permute.xlu1 %1143  ;;  %5408 = vrot.lane.b32.xlu0 %v5407_v5, %s14482_s24  ;;  %13483 = vmatprep.subr.msk.mxu0 %vm226_vm0, %v14609_v9 }
  0x94   : > { %13486 = vmatprep.subr.msk.mxu1 %vm226_vm0, %v14620_v13  ;;  %13484 = vmatpush1.msk.msra.mxu0 %vm226_vm0, %v14604_v7  ;;  %v1170_v33 = vsel %vm1169_vm2, %v1144_v18, %v1146_v12  ;;  %v7300_v12 = vld [vmem:[%s14594_s9 + $0x8] sm:$0x77] }
  0x95   : > { %v1150_v20 = vpop.permute.xlu0 %1149  ;;  %5410 = vrot.lane.b32.xlu1 %v4425_v19, %s14482_s24  ;;  %13487 = vmatpush1.msk.msra.mxu1 %vm226_vm0, %v14612_v10 }
  0x96   : > { %897 = vmatprep.mubr.f32.mxu0 %v14472_v1  ;;  %968 = vmatprep.mubr.f32.mxu1 %v14472_v1  ;;  %v14824_v35 = vsel %vm1169_vm2, %v14744_v4, %v1150_v20 }
  0x97   : > { %v1152_v22 = vpop.permute.xlu1 %1151  ;;  %5886 = vrot.lane.b32.xlu0 %v5878_v21, %s14486_s5  ;;  %13489 = vmatprep.subr.msk.mxu0 %vm226_vm0, %v14624_v14 }
  0x98   : > { %13492 = vmatprep.subr.msk.mxu1 %vm226_vm0, %v14634_v16  ;;  %13485 = vmatmul.mubr.msk.f32.vlgmr.msra.gmra.mrb[2].mxu0 %vm223_vm1, %v14584_v0  ;;  %v14798_v26 = vsel %vm1169_vm2, %v1150_v20, %v1152_v22  ;;  %v7320_v20 = vcombine.high %v7300_v12, %v7300_v12 }
  0x99   : > { %v14781_v23 = vpop.permute.xlu0 %1128  ;;  %5888 = vrot.lane.b32.xlu1 %v5859_v24, %s14486_s5  ;;  %13488 = vmatmul.mubr.msk.f32.vlgmr.msra.gmra.mrb[2].mxu1 %vm223_vm1, %v14584_v0 }
  0x9a   : > { %13490 = vmatpush1.msk.msra.mxu0 %vm226_vm0, %v14615_v11  ;;  %13493 = vmatpush1.msk.msra.mxu1 %vm226_vm0, %v14627_v15 }
  0x9b   : > { %v1154_v25 = vpop.permute.xlu1 %1153  ;;  %13495 = vmatprep.subr.msk.mxu0 %vm226_vm0, %v1171_v29  ;;  %13498 = vmatprep.subr.msk.mxu1 %vm226_vm0, %v14798_v26  ;;  %v7302_v29 = vld [vmem:[%s14594_s9 + $0x18] sm:$0x77] }
  0x9c   : > { %5884 = vrot.lane.b32.xlu0 %v5858_v17, %s14486_s5  ;;  %1039 = vmatprep.mubr.f32.mxu0 %v14472_v1  ;;  %v14842_v41 = vsel %vm1169_vm2, %v1152_v22, %v1154_v25 }
  0x9d   : > { %v1156_v27 = vpop.permute.xlu0 %1155  ;;  %1110 = vmatprep.mubr.f32.mxu1 %v14472_v1  ;;  %5890 = vrot.lane.b32.xlu1 %v5879_v28, %s14486_s5 }
  0x9e   : > { %13491 = vmatmul.mubr.msk.f32.vlgmr.msra.gmra.mrb[4].mxu0 %vm223_vm1, %v14584_v0  ;;  %v14820_v34 = vsel %vm1169_vm2, %v1154_v25, %v1156_v27  ;;  %13494 = vmatmul.mubr.msk.f32.vlgmr.msra.gmra.mrb[4].mxu1 %vm223_vm1, %v14584_v0 }
  0x9f   : > { %v1158_v30 = vpop.permute.xlu1 %1157  ;;  %13496 = vmatpush1.msk.msra.mxu0 %vm226_vm0, %v1170_v33  ;;  %13499 = vmatpush1.msk.msra.mxu1 %vm226_vm0, %v14824_v35 }
  0xa0   : > { %5892 = vrot.lane.b32.xlu0 %v5860_v31, %s14486_s5  ;;  %13501 = vmatprep.subr.msk.mxu0 %vm226_vm0, %v14820_v34  ;;  %v14852_v44 = vsel %vm1169_vm2, %v1156_v27, %v1158_v30 }
  0xa1   : > { %v1160_v32 = vpop.permute.xlu0 %1159  ;;  %1272 = vmatprep.mubr.f32.mxu0 %v14472_v1  ;;  %1343 = vmatprep.mubr.f32.mxu1 %v14472_v1 }
  0xa2   : > { %5869 = vrot.lane.b32.xlu1 %v14584_v0, %s14487_s6  ;;  %v14839_v40 = vsel %vm1169_vm2, %v1158_v30, %v1160_v32  ;;  %13497 = vmatmul.mubr.msk.f32.vlgmr.msra.gmra.mrb[0].mxu0 %vm223_vm1, %v14781_v23  ;;  %s14498_s6 = smov 80  }
  0xa3   : > { %v1162_v36 = vpop.permute.xlu1 %1161  ;;  %13500 = vmatmul.mubr.msk.f32.vlgmr.msra.gmra.mrb[0].mxu1 %vm223_vm1, %v14781_v23  ;;  %13502 = vmatpush1.msk.msra.mxu0 %vm226_vm0, %v14842_v41 }
  0xa4   : > { %5894 = vrot.lane.b32.xlu0 %v5880_v37, %s14486_s5  ;;  %13504 = vmatprep.subr.msk.mxu1 %vm226_vm0, %v14839_v40  ;;  %v14879_v51 = vsel %vm1169_vm2, %v1160_v32, %v1162_v36  ;;  %v7322_v32 = vcombine.high %v7302_v29, %v7302_v29  ;;  %v7303_v37 = vld [vmem:[%s14594_s9 + $0x20] sm:$0x77] }
  0xa5   : > { %v1164_v39 = vpop.permute.xlu0 %1163  ;;  %1414 = vmatprep.mubr.f32.mxu0 %v14472_v1  ;;  %13505 = vmatpush1.msk.msra.mxu1 %vm226_vm0, %v14852_v44 }
  0xa6   : > { %1485 = vmatprep.mubr.f32.mxu1 %v14472_v1  ;;  %v14864_v47 = vsel %vm1169_vm2, %v1162_v36, %v1164_v39  ;;  %5896 = vrot.lane.b32.xlu1 %v5861_v38, %s14486_s5 }
  0xa7   : > { %v1166_v42 = vpop.permute.xlu1 %1165  ;;  %13503 = vmatmul.mubr.msk.f32.vlgmr.msra.gmra.mrb[2].mxu0 %vm223_vm1, %v14781_v23  ;;  %13506 = vmatmul.mubr.msk.f32.vlgmr.msra.gmra.mrb[2].mxu1 %vm223_vm1, %v14781_v23 }
  0xa8   : > { %5898 = vrot.lane.b32.xlu0 %v5881_v43, %s14486_s5  ;;  %13507 = vmatprep.subr.msk.mxu0 %vm226_vm0, %v14864_v47  ;;  %v14897_v55 = vsel %vm1169_vm2, %v1164_v39, %v1166_v42 }
  0xa9   : > { %v14858_v46 = vpop.permute.xlu0 %1167  ;;  %1556 = vmatprep.mubr.f32.mxu0 %v14472_v1  ;;  %13508 = vmatpush1.msk.msra.mxu0 %vm226_vm0, %v14879_v51 }
  0xaa   : > { %v14873_v49 = vsel %vm1169_vm2, %v1166_v42, %v14858_v46  ;;  %5900 = vrot.lane.b32.xlu1 %v5862_v45, %s14486_s5  ;;  %13513 = vmatprep.subr.msk.mxu0 %vm226_vm0, %v14753_v8 }
  0xab   : > { %v14869_v48 = vpop.permute.xlu1 %1634  ;;  %13510 = vmatprep.subr.msk.mxu1 %vm226_vm0, %v14873_v49  ;;  %13509 = vmatmul.mubr.msk.f32.vlgmr.msra.gmra.mrb[4].mxu0 %vm223_vm1, %v14781_v23 }
  0xac   : > { %5902 = vrot.lane.b32.xlu0 %v5882_v50, %s14486_s5  ;;  %13511 = vmatpush1.msk.msra.mxu1 %vm226_vm0, %v14897_v55 }
  0xad   : > { %v14884_v52 = vpop.permute.xlu0 %2066  ;;  %1627 = vmatprep.mubr.f32.mxu1 %v14472_v1  ;;  %13514 = vmatpush1.msk.msra.mxu0 %vm226_vm0, %v14739_v3 }
  0xae   : > { %1702 = vmatprep.mubr.f32.mxu0 %v14472_v1  ;;  %5904 = vrot.lane.b32.xlu1 %v5863_v53, %s14486_s5 }
  0xaf   : > { %v14894_v54 = vpop.permute.xlu1 %2070  ;;  %13512 = vmatmul.mubr.msk.f32.vlgmr.msra.gmra.mrb[4].mxu1 %vm223_vm1, %v14781_v23  ;;  %13515 = vmatmul.mubr.msk.f32.vlgmr.msra.gmra.mrb[0].mxu0 %vm223_vm1, %v14869_v48  ;;  %v7301_v23 = vld [vmem:[%s14594_s9 + $0x10] sm:$0x77] }
  0xb0   : > { %13519 = vmatprep.subr.msk.mxu0 %vm226_vm0, %v14620_v13  ;;  %5906 = vrot.lane.b32.xlu0 %v5883_v56, %s14486_s5  ;;  %v2074_v18 = vsel %vm1169_vm2, %v14858_v46, %v14894_v54 }
  0xb1   : > { %v14905_v58 = vpop.permute.xlu0 %2072  ;;  %13516 = vmatprep.subr.msk.mxu1 %vm226_vm0, %v14609_v9  ;;  %13520 = vmatpush1.msk.msra.mxu0 %vm226_vm0, %v14612_v10 }
  0xb2   : > { %13517 = vmatpush1.msk.msra.mxu1 %vm226_vm0, %v14604_v7  ;;  %1773 = vmatprep.mubr.f32.mxu1 %v14472_v1  ;;  %v6392_v7 = vcombine.high %v5864_v60, %v5864_v60  ;;  %v2075_v6 = vsel %vm1169_vm2, %v14894_v54, %v14905_v58 }
  0xb3   : > { %v14913_v59 = vpop.permute.xlu1 %2522  ;;  %1844 = vmatprep.mubr.f32.mxu0 %v14472_v1  ;;  %13525 = vmatprep.subr.msk.mxu0 %vm226_vm0, %v14634_v16 }
  0xb4   : > { %5908 = vrot.lane.b32.xlu1 %v5864_v60, %s14486_s5  ;;  %13518 = vmatmul.mubr.msk.f32.vlgmr.msra.gmra.mrb[0].mxu1 %vm223_vm1, %v14869_v48 }
  0xb5   : > { %v14923_v62 = vpop.permute.xlu0 %2526  ;;  %13521 = vmatmul.mubr.msk.f32.vlgmr.msra.gmra.mrb[2].mxu0 %vm223_vm1, %v14869_v48  ;;  %13522 = vmatprep.subr.msk.mxu1 %vm226_vm0, %v14624_v14  ;;  %v5865_v14 = vld [vmem:[%s14594_s9 + $0x38] sm:$0x77] }
  0xb6   : > { %13526 = vmatpush1.msk.msra.mxu0 %vm226_vm0, %v14627_v15  ;;  %6389 = vrot.lane.b32.xlu0 %v14584_v0, %s14488_s7  ;;  %v6848_v16 = vcombine.high %v5865_v14, %v5865_v14  ;;  %s14499_s7 = smov 53  }
  0xb7   : > { %v14931_v63 = vpop.permute.xlu1 %2528  ;;  %13531 = vmatprep.subr.msk.mxu0 %vm226_vm0, %v14798_v26  ;;  %13523 = vmatpush1.msk.msra.mxu1 %vm226_vm0, %v14615_v11  ;;  %v7321_v26 = vcombine.high %v7301_v23, %v7301_v23 }
  0xb8   : > { %1915 = vmatprep.mubr.f32.mxu1 %v14472_v1  ;;  %1986 = vmatprep.mubr.f32.mxu0 %v14472_v1  ;;  %v2531_v28 = vsel %vm1169_vm2, %v14923_v62, %v14931_v63 }
  0xb9   : > { %v14940_v9 = vpop.permute.xlu0 %3004  ;;  %13528 = vmatprep.subr.msk.mxu1 %vm226_vm0, %v14727_v61  ;;  %6393 = vrot.lane.b32.xlu1 %v6392_v7, %s14486_s5  ;;  %v7299_v61 = vld [vmem:[%s14594_s9] sm:$0x77] }
  0xba   : > { %13524 = vmatmul.mubr.msk.f32.vlgmr.msra.gmra.mrb[2].mxu1 %vm223_vm1, %v14869_v48  ;;  %13527 = vmatmul.mubr.msk.f32.vlgmr.msra.gmra.mrb[4].mxu0 %vm223_vm1, %v14869_v48  ;;  %v7319_v4 = vcombine.high %v7299_v61, %v7299_v61 }
  0xbb   : > { %v14949_v10 = vpop.permute.xlu1 %3006  ;;  %13529 = vmatpush1.msk.msra.mxu1 %vm226_vm0, %v14717_v57  ;;  %13532 = vmatpush1.msk.msra.mxu0 %vm226_vm0, %v14824_v35 }
  0xbc   : > { %13534 = vmatprep.subr.msk.mxu1 %vm226_vm0, %v14820_v34  ;;  %13537 = vmatprep.subr.msk.mxu0 %vm226_vm0, %v14839_v40  ;;  %v3030_v30 = vsel %vm3028_vm3, %v14940_v9, %v14949_v10 }
  0xbd   : > { %v14957_v13 = vpop.permute.xlu0 %3002  ;;  %6395 = vrot.lane.b32.xlu0 %v5865_v14, %s14486_s5  ;;  %2057 = vmatprep.mubr.f32.mxu1 %v14472_v1 }
  0xbe   : > { %2146 = vmatprep.mubr.f32.mxu0 %v14472_v1  ;;  %6845 = vrot.lane.b32.xlu1 %v14584_v0, %s14489_s8  ;;  %v3029_v35 = vsel %vm3028_vm3, %v14957_v13, %v14940_v9  ;;  %v7306_v9 = vld [vmem:[%s14594_s9 + $0x38] sm:$0x77]  ;;  %s14500_s8 = smov 94  }
  0xbf   : > { %v14967_v11 = vpop.permute.xlu1 %3008  ;;  %13530 = vmatmul.mubr.msk.f32.vlgmr.msra.gmra.mrb[4].mxu1 %vm223_vm1, %v14869_v48  ;;  %13533 = vmatmul.mubr.msk.f32.vlgmr.msra.gmra.mrb[0].mxu0 %vm223_vm1, %v14884_v52  ;;  %v8289_v13 = vcombine.high %v7306_v9, %v7306_v9 }
  0xc0   : > { %13535 = vmatpush1.msk.msra.mxu1 %vm226_vm0, %v14842_v41  ;;  %13538 = vmatpush1.msk.msra.mxu0 %vm226_vm0, %v14852_v44  ;;  %v3031_v42 = vsel %vm3028_vm3, %v14949_v10, %v14967_v11 }
  0xc1   : > { %v14976_v15 = vpop.permute.xlu0 %3010  ;;  %13540 = vmatprep.subr.msk.mxu1 %vm226_vm0, %v14864_v47  ;;  %13543 = vmatprep.subr.msk.mxu0 %vm226_vm0, %v14873_v49 }
  0xc2   : > { %6849 = vrot.lane.b32.xlu0 %v6848_v16, %s14486_s5  ;;  %2217 = vmatprep.mubr.f32.mxu1 %v14472_v1  ;;  %v3032_v36 = vsel %vm3028_vm3, %v14967_v11, %v14976_v15 }
  0xc3   : > { %v14983_v57 = vpop.permute.xlu1 %2987  ;;  %2288 = vmatprep.mubr.f32.mxu0 %v14472_v1  ;;  %6851 = vrot.lane.b32.xlu1 %v5866_v2, %s14486_s5 }
  0xc4   : > { %13536 = vmatmul.mubr.msk.f32.vlgmr.msra.gmra.mrb[0].mxu1 %vm223_vm1, %v14884_v52  ;;  %13539 = vmatmul.mubr.msk.f32.vlgmr.msra.gmra.mrb[2].mxu0 %vm223_vm1, %v14884_v52 }
  0xc5   : > { %v14995_v3 = vpop.permute.xlu0 %3012  ;;  %13541 = vmatpush1.msk.msra.mxu1 %vm226_vm0, %v14879_v51  ;;  %13544 = vmatpush1.msk.msra.mxu0 %vm226_vm0, %v14897_v55 }
  0xc6   : > { %13546 = vmatprep.subr.msk.mxu1 %vm226_vm0, %v2075_v6  ;;  %13549 = vmatprep.subr.msk.mxu0 %vm226_vm0, %v14820_v34  ;;  %v2530_v34 = vsel %vm1169_vm2, %v14905_v58, %v14923_v62  ;;  %v15145_v45 = vsel %vm3028_vm3, %v14976_v15, %v14995_v3  ;;  %v8740_v15 = vld [vmem:[%s14594_s9] sm:$0x77] }
  0xc7   : > { %v15002_v5 = vpop.permute.xlu1 %3014  ;;  %7327 = vrot.lane.b32.xlu0 %v7319_v4, %s14490_s11  ;;  %2359 = vmatprep.mubr.f32.mxu1 %v14472_v1  ;;  %v8741_v4 = vld [vmem:[%s14594_s9 + $0x8] sm:$0x77] }
  0xc8   : > { %2430 = vmatprep.mubr.f32.mxu0 %v14472_v1  ;;  %7329 = vrot.lane.b32.xlu1 %v7300_v12, %s14490_s11  ;;  %v15120_v39 = vsel %vm3028_vm3, %v14995_v3, %v15002_v5 }
  0xc9   : > { %v15014_v8 = vpop.permute.xlu0 %3016  ;;  %13542 = vmatmul.mubr.msk.f32.vlgmr.msra.gmra.mrb[2].mxu1 %vm223_vm1, %v14884_v52  ;;  %13545 = vmatmul.mubr.msk.f32.vlgmr.msra.gmra.mrb[4].mxu0 %vm223_vm1, %v14884_v52 }
  0xca   : > { %13547 = vmatpush1.msk.msra.mxu1 %vm226_vm0, %v2074_v18  ;;  %13550 = vmatpush1.msk.msra.mxu0 %vm226_vm0, %v14842_v41  ;;  %v7323_v41 = vcombine.high %v7303_v37, %v7303_v37 }
  0xcb   : > { %v15023_v17 = vpop.permute.xlu1 %3018  ;;  %13552 = vmatprep.subr.msk.mxu1 %vm226_vm0, %v14839_v40  ;;  %13555 = vmatprep.subr.msk.mxu0 %vm226_vm0, %v14864_v47  ;;  %v7304_v47 = vld [vmem:[%s14594_s9 + $0x28] sm:$0x77] }
  0xcc   : > { %7325 = vrot.lane.b32.xlu0 %v7299_v61, %s14490_s11  ;;  %2501 = vmatprep.mubr.f32.mxu1 %v14472_v1  ;;  %v15153_v46 = vsel %vm3028_vm3, %v15014_v8, %v15023_v17 }
  0xcd   : > { %v15033_v19 = vpop.permute.xlu0 %3020  ;;  %2602 = vmatprep.mubr.f32.mxu0 %v14472_v1  ;;  %7331 = vrot.lane.b32.xlu1 %v7320_v20, %s14490_s11 }
  0xce   : > { %13548 = vmatmul.mubr.msk.f32.vlgmr.msra.gmra.mrb[4].mxu1 %vm223_vm1, %v14884_v52  ;;  %13551 = vmatmul.mubr.msk.f32.vlgmr.msra.gmra.mrb[0].mxu0 %vm223_vm1, %v14913_v59  ;;  %v15177_v52 = vsel %vm3028_vm3, %v15002_v5, %v15014_v8  ;;  %v15185_v53 = vsel %vm3028_vm3, %v15023_v17, %v15033_v19  ;;  %v8761_v8 = vcombine.high %v8741_v4, %v8741_v4  ;;  %v8742_v17 = vld [vmem:[%s14594_s9 + $0x10] sm:$0x77] }
  0xcf   : > { %v15042_v21 = vpop.permute.xlu1 %3022  ;;  %13553 = vmatpush1.msk.msra.mxu1 %vm226_vm0, %v14852_v44  ;;  %13556 = vmatpush1.msk.msra.mxu0 %vm226_vm0, %v14879_v51 }
  0xd0   : > { %13558 = vmatprep.subr.msk.mxu1 %vm226_vm0, %v14873_v49  ;;  %13561 = vmatprep.subr.msk.mxu0 %vm226_vm0, %v2075_v6  ;;  %v15138_v43 = vsel %vm3028_vm3, %v15033_v19, %v15042_v21  ;;  %v7324_v49 = vcombine.high %v7304_v47, %v7304_v47 }
  0xd1   : > { %v15049_v22 = vpop.permute.xlu0 %3024  ;;  %7333 = vrot.lane.b32.xlu0 %v7301_v23, %s14490_s11  ;;  %2673 = vmatprep.mubr.f32.mxu1 %v14472_v1  ;;  %v8762_v23 = vcombine.high %v8742_v17, %v8742_v17 }
  0xd2   : > { %2744 = vmatprep.mubr.f32.mxu0 %v14472_v1  ;;  %7310 = vrot.lane.b32.xlu1 %v14584_v0, %s14491_s12  ;;  %v15207_v58 = vsel %vm3028_vm3, %v15042_v21, %v15049_v22  ;;  %v15340_v21 = vld [vmem:[%s16625_s1] sm:$0xff]  ;;  %s14503_s12 = smov 50  }
  0xd3   : > { %v15059_v24 = vpop.permute.xlu1 %3026  ;;  %13554 = vmatmul.mubr.msk.f32.vlgmr.msra.gmra.mrb[0].mxu1 %vm223_vm1, %v14913_v59  ;;  %13557 = vmatmul.mubr.msk.f32.vlgmr.msra.gmra.mrb[2].mxu0 %vm223_vm1, %v14913_v59 }
  0xd4   : > { %13559 = vmatpush1.msk.msra.mxu1 %vm226_vm0, %v14897_v55  ;;  %13562 = vmatpush1.msk.msra.mxu0 %vm226_vm0, %v2074_v18  ;;  %v15170_v50 = vsel %vm3028_vm3, %v15049_v22, %v15059_v24  ;;  %v7305_v55 = vld [vmem:[%s14594_s9 + $0x30] sm:$0x77] }
  0xd5   : > { %v15067_v25 = vpop.permute.xlu0 %3507  ;;  %13564 = vmatprep.subr.msk.mxu1 %vm226_vm0, %v2531_v28  ;;  %13567 = vmatprep.subr.msk.mxu0 %vm226_vm0, %v3030_v30  ;;  %v7833_v60 = vcombine.high %v7305_v55, %v7305_v55 }
  0xd6   : > { %7335 = vrot.lane.b32.xlu0 %v7321_v26, %s14490_s11  ;;  %2815 = vmatprep.mubr.f32.mxu1 %v14472_v1 }
  0xd7   : > { %v15074_v27 = vpop.permute.xlu1 %3511  ;;  %2886 = vmatprep.mubr.f32.mxu0 %v14472_v1  ;;  %7337 = vrot.lane.b32.xlu1 %v7302_v29, %s14490_s11  ;;  %v8743_v29 = vld [vmem:[%s14594_s9 + $0x18] sm:$0x77] }
  0xd8   : > { %13560 = vmatmul.mubr.msk.f32.vlgmr.msra.gmra.mrb[2].mxu1 %vm223_vm1, %v14913_v59  ;;  %13563 = vmatmul.mubr.msk.f32.vlgmr.msra.gmra.mrb[4].mxu0 %vm223_vm1, %v14913_v59  ;;  %v3515_v2 = vsel %vm3028_vm3, %v15059_v24, %v15074_v27 }
  0xd9   : > { %v15089_v31 = vpop.permute.xlu0 %3513  ;;  %13565 = vmatpush1.msk.msra.mxu1 %vm226_vm0, %v2530_v34  ;;  %13568 = vmatpush1.msk.msra.mxu0 %vm226_vm0, %v3029_v35  ;;  %v8744_v35 = vld [vmem:[%s14594_s9 + $0x20] sm:$0x77] }
  0xda   : > { %13570 = vmatprep.subr.msk.mxu1 %vm226_vm0, %v3032_v36  ;;  %13573 = vmatprep.subr.msk.mxu0 %vm226_vm0, %v15120_v39  ;;  %v3516_v11 = vsel %vm3028_vm3, %v15074_v27, %v15089_v31 }
  0xdb   : > { %v15095_v33 = vpop.permute.xlu1 %3963  ;;  %7339 = vrot.lane.b32.xlu0 %v7322_v32, %s14490_s11  ;;  %2957 = vmatprep.mubr.f32.mxu1 %v14472_v1 }
  0xdc   : > { %3131 = vmatprep.mubr.f32.mxu0 %v14472_v1  ;;  %7341 = vrot.lane.b32.xlu1 %v7303_v37, %s14490_s11 }
  0xdd   : > { %v15113_v38 = vpop.permute.xlu0 %3967  ;;  %13566 = vmatmul.mubr.msk.f32.vlgmr.msra.gmra.mrb[4].mxu1 %vm223_vm1, %v14913_v59  ;;  %13569 = vmatmul.mubr.msk.f32.vlgmr.msra.gmra.mrb[0].mxu0 %vm223_vm1, %v14983_v57 }
  0xde   : > { %13571 = vmatpush1.msk.msra.mxu1 %vm226_vm0, %v3031_v42  ;;  %13574 = vmatpush1.msk.msra.mxu0 %vm226_vm0, %v15145_v45  ;;  %v3971_v24 = vsel %vm3028_vm3, %v15089_v31, %v15113_v38  ;;  %v8763_v31 = vcombine.high %v8743_v29, %v8743_v29 }
  0xdf   : > { %v15125_v40 = vpop.permute.xlu1 %3969  ;;  %13576 = vmatprep.subr.msk.mxu1 %vm226_vm0, %v15153_v46  ;;  %13579 = vmatprep.subr.msk.mxu0 %vm226_vm0, %v15138_v43 }
  0xe0   : > { %7343 = vrot.lane.b32.xlu0 %v7323_v41, %s14490_s11  ;;  %3202 = vmatprep.mubr.f32.mxu1 %v14472_v1  ;;  %v3972_v19 = vsel %vm3028_vm3, %v15113_v38, %v15125_v40 }
  0xe1   : > { %v15140_v44 = vpop.permute.xlu0 %4445  ;;  %3273 = vmatprep.mubr.f32.mxu0 %v14472_v1  ;;  %7345 = vrot.lane.b32.xlu1 %v7304_v47, %s14490_s11 }
  0xe2   : > { %13572 = vmatmul.mubr.msk.f32.vlgmr.msra.gmra.mrb[0].mxu1 %vm223_vm1, %v14983_v57  ;;  %13575 = vmatmul.mubr.msk.f32.vlgmr.msra.gmra.mrb[2].mxu0 %vm223_vm1, %v14983_v57 }
  0xe3   : > { %v15160_v48 = vpop.permute.xlu1 %4447  ;;  %13577 = vmatpush1.msk.msra.mxu1 %vm226_vm0, %v15177_v52  ;;  %13580 = vmatpush1.msk.msra.mxu0 %vm226_vm0, %v15185_v53 }
  0xe4   : > { %13582 = vmatprep.subr.msk.mxu1 %vm226_vm0, %v15170_v50  ;;  %13585 = vmatprep.subr.msk.mxu0 %vm226_vm0, %v3032_v36  ;;  %v4471_v20 = vsel %vm4469_vm4, %v15140_v44, %v15160_v48 }
  0xe5   : > { %v15172_v51 = vpop.permute.xlu0 %4443  ;;  %7347 = vrot.lane.b32.xlu0 %v7324_v49, %s14490_s11  ;;  %3344 = vmatprep.mubr.f32.mxu1 %v14472_v1  ;;  %v8746_v49 = vld [vmem:[%s14594_s9 + $0x30] sm:$0x77] }
  0xe6   : > { %3415 = vmatprep.mubr.f32.mxu0 %v14472_v1  ;;  %7349 = vrot.lane.b32.xlu1 %v7305_v55, %s14490_s11  ;;  %v4470_v27 = vsel %vm4469_vm4, %v15172_v51, %v15140_v44  ;;  %v8747_v55 = vld [vmem:[%s14594_s9 + $0x38] sm:$0x77] }
  0xe7   : > { %v15191_v54 = vpop.permute.xlu1 %4449  ;;  %13578 = vmatmul.mubr.msk.f32.vlgmr.msra.gmra.mrb[2].mxu1 %vm223_vm1, %v14983_v57  ;;  %13581 = vmatmul.mubr.msk.f32.vlgmr.msra.gmra.mrb[4].mxu0 %vm223_vm1, %v14983_v57 }
  0xe8   : > { %13583 = vmatpush1.msk.msra.mxu1 %vm226_vm0, %v15207_v58  ;;  %13586 = vmatpush1.msk.msra.mxu0 %vm226_vm0, %v3031_v42  ;;  %v4472_v34 = vsel %vm4469_vm4, %v15160_v48, %v15191_v54  ;;  %v8745_v42 = vld [vmem:[%s14594_s9 + $0x28] sm:$0x77] }
  0xe9   : > { %v15200_v56 = vpop.permute.xlu0 %4451  ;;  %13588 = vmatprep.subr.msk.mxu1 %vm226_vm0, %v15120_v39  ;;  %13591 = vmatprep.subr.msk.mxu0 %vm226_vm0, %v15153_v46 }
  0xea   : > { %7830 = vrot.lane.b32.xlu0 %v14584_v0, %s14492_s13  ;;  %3486 = vmatprep.mubr.f32.mxu1 %v14472_v1  ;;  %v4473_v28 = vsel %vm4469_vm4, %v15191_v54, %v15200_v56  ;;  %s189_s13 = sand.u32 1, %s14461_s18  }
  0xeb   : > { %v15212_v59 = vpop.permute.xlu1 %4428  ;;  %3587 = vmatprep.mubr.f32.mxu0 %v14472_v1  ;;  %7834 = vrot.lane.b32.xlu1 %v7833_v60, %s14490_s11  ;;  %v9730_v60 = vcombine.high %v8747_v55, %v8747_v55  ;;  %s190_s16 = scalar_lea.vmem [#allocation3], %s189_s13 }
  0xec   : > { %13584 = vmatmul.mubr.msk.f32.vlgmr.msra.gmra.mrb[4].mxu1 %vm223_vm1, %v14983_v57  ;;  %13587 = vmatmul.mubr.msk.f32.vlgmr.msra.gmra.mrb[0].mxu0 %vm223_vm1, %v15067_v25  ;;  %v8760_v57 = vcombine.high %v8740_v15, %v8740_v15  ;;  %s13399_s23 = sshll.u32 %s190_s16, 4  ;;  %s16584_s23 = int_to_ptr.vmem [resolvable:$true] %s13399_s23 }
  0xed   : > { %v15221_v62 = vpop.permute.xlu0 %4453  ;;  %13589 = vmatpush1.msk.msra.mxu1 %vm226_vm0, %v15145_v45  ;;  %13592 = vmatpush1.msk.msra.mxu0 %vm226_vm0, %v15177_v52 }
  0xee   : > { %13594 = vmatprep.subr.msk.mxu1 %vm226_vm0, %v15138_v43  ;;  %13597 = vmatprep.subr.msk.mxu0 %vm226_vm0, %v15170_v50  ;;  %v15396_v36 = vsel %vm4469_vm4, %v15200_v56, %v15221_v62 }
  0xef   : > { %v15228_v63 = vpop.permute.xlu1 %4455  ;;  %7836 = vrot.lane.b32.xlu0 %v7306_v9, %s14490_s11  ;;  %3658 = vmatprep.mubr.f32.mxu1 %v14472_v1  ;;  %v10181_v9 = vld [vmem:[%s14594_s9] sm:$0x77] }
  0xf0   : > { %3729 = vmatprep.mubr.f32.mxu0 %v14472_v1  ;;  %8286 = vrot.lane.b32.xlu1 %v14584_v0, %s14493_s14  ;;  %v7307_v0 = vld [vmem:[%s14594_s9 + $0x40] sm:$0x7]  ;;  %s198_s14 = sld [smem:[#allocation2]] }
  0xf1   : > { %v15238_v7 = vpop.permute.xlu0 %4457  ;;  %13590 = vmatmul.mubr.msk.f32.vlgmr.msra.gmra.mrb[0].mxu1 %vm223_vm1, %v15067_v25  ;;  %13593 = vmatmul.mubr.msk.f32.vlgmr.msra.gmra.mrb[2].mxu0 %vm223_vm1, %v15067_v25 }
  0xf2   : > { %13595 = vmatpush1.msk.msra.mxu1 %vm226_vm0, %v15185_v53  ;;  %13598 = vmatpush1.msk.msra.mxu0 %vm226_vm0, %v15207_v58  ;;  %v15421_v40 = vsel %vm4469_vm4, %v15228_v63, %v15238_v7 }
  0xf3   : > { %v15247_v10 = vpop.permute.xlu1 %4459  ;;  %13600 = vmatprep.subr.msk.mxu1 %vm226_vm0, %v3516_v11  ;;  %13603 = vmatprep.subr.msk.mxu0 %vm226_vm0, %v15120_v39 }
  0xf4   : > { %8290 = vrot.lane.b32.xlu0 %v8289_v13, %s14490_s11  ;;  %3800 = vmatprep.mubr.f32.mxu1 %v14472_v1  ;;  %v15384_v32 = vsel %vm4469_vm4, %v15238_v7, %v15247_v10  ;;  %v8748_v7 = vld [vmem:[%s14594_s9 + $0x40] sm:$0x7]  ;;  %v10201_v13 = vcombine.high %v10181_v9, %v10181_v9 }
  0xf5   : > { %v15254_v14 = vpop.permute.xlu0 %4461  ;;  %3871 = vmatprep.mubr.f32.mxu0 %v14472_v1  ;;  %8292 = vrot.lane.b32.xlu1 %v7307_v0, %s14490_s11 }
  0xf6   : > { %13596 = vmatmul.mubr.msk.f32.vlgmr.msra.gmra.mrb[2].mxu1 %vm223_vm1, %v15067_v25  ;;  %13599 = vmatmul.mubr.msk.f32.vlgmr.msra.gmra.mrb[4].mxu0 %vm223_vm1, %v15067_v25  ;;  %v15430_v41 = vsel %vm4469_vm4, %v15247_v10, %v15254_v14 }
  0xf7   : > { %v15268_v16 = vpop.permute.xlu1 %4463  ;;  %13601 = vmatpush1.msk.msra.mxu1 %vm226_vm0, %v3515_v2  ;;  %13604 = vmatpush1.msk.msra.mxu0 %vm226_vm0, %v15145_v45 }
  0xf8   : > { %13606 = vmatprep.subr.msk.mxu1 %vm226_vm0, %v15153_v46  ;;  %13609 = vmatprep.subr.msk.mxu0 %vm226_vm0, %v15138_v43  ;;  %v15412_v38 = vsel %vm4469_vm4, %v15254_v14, %v15268_v16  ;;  %v8765_v46 = vcombine.high %v8745_v42, %v8745_v42 }
  0xf9   : > { %v15275_v61 = vpop.permute.xlu0 %4465  ;;  %8768 = vrot.lane.b32.xlu0 %v8760_v57, %s14494_s15  ;;  %3942 = vmatprep.mubr.f32.mxu1 %v14472_v1 }
  0xfa   : > { %4043 = vmatprep.mubr.f32.mxu0 %v14472_v1  ;;  %8770 = vrot.lane.b32.xlu1 %v8741_v4, %s14494_s15  ;;  %v15462_v48 = vsel %vm4469_vm4, %v15268_v16, %v15275_v61  ;;  %v10183_v4 = vld [vmem:[%s14594_s9 + $0x10] sm:$0x77] }
  0xfb   : > { %v15286_v3 = vpop.permute.xlu1 %4467  ;;  %13602 = vmatmul.mubr.msk.f32.vlgmr.msra.gmra.mrb[4].mxu1 %vm223_vm1, %v15067_v25  ;;  %13605 = vmatmul.mubr.msk.f32.vlgmr.msra.gmra.mrb[0].mxu0 %vm223_vm1, %v15095_v33  ;;  %v15358_v25 = vsel %vm4469_vm4, %v15221_v62, %v15228_v63 }
  0xfc   : > { %13607 = vmatpush1.msk.msra.mxu1 %vm226_vm0, %v15177_v52  ;;  %13610 = vmatpush1.msk.msra.mxu0 %vm226_vm0, %v15185_v53  ;;  %v15447_v44 = vsel %vm4469_vm4, %v15275_v61, %v15286_v3  ;;  %v9274_v52 = vcombine.high %v8746_v49, %v8746_v49 }
  0xfd   : > { %v15296_v5 = vpop.permute.xlu0 %4948  ;;  %13612 = vmatprep.subr.msk.mxu1 %vm226_vm0, %v15170_v50  ;;  %13615 = vmatprep.subr.msk.mxu0 %vm226_vm0, %v3516_v11  ;;  %v10182_v11 = vld [vmem:[%s14594_s9 + $0x8] sm:$0x77] }
  0xfe   : > { %8766 = vrot.lane.b32.xlu0 %v8740_v15, %s14494_s15  ;;  %4114 = vmatprep.mubr.f32.mxu1 %v14472_v1  ;;  %v10202_v16 = vcombine.high %v10182_v11, %v10182_v11 }
  0xff   : > { %v15303_v6 = vpop.permute.xlu1 %4952  ;;  %4185 = vmatprep.mubr.f32.mxu0 %v14472_v1  ;;  %8772 = vrot.lane.b32.xlu1 %v8761_v8, %s14494_s15 }
 0x100   : > { %13608 = vmatmul.mubr.msk.f32.vlgmr.msra.gmra.mrb[0].mxu1 %vm223_vm1, %v15095_v33  ;;  %13611 = vmatmul.mubr.msk.f32.vlgmr.msra.gmra.mrb[2].mxu0 %vm223_vm1, %v15095_v33  ;;  %v4956_v62 = vsel %vm4469_vm4, %v15286_v3, %v15303_v6 }
 0x101   : > { %v15313_v12 = vpop.permute.xlu0 %4954  ;;  %13613 = vmatpush1.msk.msra.mxu1 %vm226_vm0, %v15207_v58  ;;  %13616 = vmatpush1.msk.msra.mxu0 %vm226_vm0, %v3515_v2 }
 0x102   : > { %13618 = vmatprep.subr.msk.mxu1 %vm226_vm0, %v3972_v19  ;;  %13621 = vmatprep.subr.msk.mxu0 %vm226_vm0, %v4471_v20  ;;  %v4957_v58 = vsel %vm4469_vm4, %v15303_v6, %v15313_v12  ;;  %v10184_v19 = vld [vmem:[%s14594_s9 + $0x18] sm:$0x77] }
 0x103   : > { %v15323_v18 = vpop.permute.xlu1 %5404  ;;  %8774 = vrot.lane.b32.xlu0 %v8742_v17, %s14494_s15  ;;  %4256 = vmatprep.mubr.f32.mxu1 %v14472_v1 }
 0x104   : > { %4327 = vmatprep.mubr.f32.mxu0 %v14472_v1  ;;  %8751 = vrot.lane.b32.xlu1 %v15340_v21, %s14490_s11  ;;  %s14502_s11 = smov 77  }
 0x105   : > { %v15342_v22 = vpop.permute.xlu0 %5408  ;;  %13614 = vmatmul.mubr.msk.f32.vlgmr.msra.gmra.mrb[2].mxu1 %vm223_vm1, %v15095_v33  ;;  %13617 = vmatmul.mubr.msk.f32.vlgmr.msra.gmra.mrb[4].mxu0 %vm223_vm1, %v15095_v33 }
 0x106   : > { %13619 = vmatpush1.msk.msra.mxu1 %vm226_vm0, %v3971_v24  ;;  %13622 = vmatpush1.msk.msra.mxu0 %vm226_vm0, %v4470_v27  ;;  %v5412_v3 = vsel %vm4469_vm4, %v15313_v12, %v15342_v22  ;;  %v10203_v12 = vcombine.high %v10183_v4, %v10183_v4  ;;  %v10204_v24 = vcombine.high %v10184_v19, %v10184_v19 }
 0x107   : > { %v15360_v26 = vpop.permute.xlu1 %5410  ;;  %13624 = vmatprep.subr.msk.mxu1 %vm226_vm0, %v4473_v28  ;;  %13627 = vmatprep.subr.msk.mxu0 %vm226_vm0, %v15358_v25 }
 0x108   : > { %8776 = vrot.lane.b32.xlu0 %v8762_v23, %s14494_s15  ;;  %4398 = vmatprep.mubr.f32.mxu1 %v14472_v1  ;;  %v5413_v0 = vsel %vm4469_vm4, %v15342_v22, %v15360_v26  ;;  %v10185_v26 = vld [vmem:[%s14594_s9 + $0x20] sm:$0x77] }
 0x109   : > { %v15377_v30 = vpop.permute.xlu0 %5886  ;;  %4572 = vmatprep.mubr.f32.mxu0 %v14472_v1  ;;  %8778 = vrot.lane.b32.xlu1 %v8743_v29, %s14494_s15 }
 0x10a   : > { %13620 = vmatmul.mubr.msk.f32.vlgmr.msra.gmra.mrb[4].mxu1 %vm223_vm1, %v15095_v33  ;;  %13623 = vmatmul.mubr.msk.f32.vlgmr.msra.gmra.mrb[0].mxu0 %vm223_vm1, %v15212_v59  ;;  %v8764_v33 = vcombine.high %v8744_v35, %v8744_v35 }
 0x10b   : > { %13625 = vmatpush1.msk.msra.mxu1 %vm226_vm0, %v4472_v34  ;;  %v15401_v37 = vpop.permute.xlu1 %5888  ;;  %13628 = vmatpush1.msk.msra.mxu0 %vm226_vm0, %v15396_v36 }
 0x10c   : > { %13630 = vmatprep.subr.msk.mxu1 %vm226_vm0, %v15384_v32  ;;  %8780 = vrot.lane.b32.xlu0 %v8763_v31, %s14494_s15  ;;  %v5912_v57 = vsel %vm5910_vm5, %v15377_v30, %v15401_v37 }
 0x10d   : > { %4643 = vmatprep.mubr.f32.mxu1 %v14472_v1  ;;  %4714 = vmatprep.mubr.f32.mxu0 %v14472_v1 }
 0x10e   : > { %8782 = vrot.lane.b32.xlu1 %v8744_v35, %s14494_s15  ;;  %v15416_v39 = vpop.permute.xlu0 %5884  ;;  %13626 = vmatmul.mubr.msk.f32.vlgmr.msra.gmra.mrb[0].mxu1 %vm223_vm1, %v15212_v59 }
 0x10f   : > { %13629 = vmatmul.mubr.msk.f32.vlgmr.msra.gmra.mrb[2].mxu0 %vm223_vm1, %v15212_v59  ;;  %13631 = vmatpush1.msk.msra.mxu1 %vm226_vm0, %v15421_v40  ;;  %v15437_v43 = vpop.permute.xlu1 %5890 }
 0x110   : > { %13633 = vmatprep.subr.msk.mxu0 %vm226_vm0, %v15412_v38  ;;  %8784 = vrot.lane.b32.xlu0 %v8764_v33, %s14494_s15  ;;  %v5913_v22 = vsel %vm5910_vm5, %v15401_v37, %v15437_v43 }
 0x111   : > { %13634 = vmatpush1.msk.msra.mxu0 %vm226_vm0, %v15430_v41  ;;  %4785 = vmatprep.mubr.f32.mxu1 %v14472_v1 }
 0x112   : > { %13639 = vmatprep.subr.msk.mxu0 %vm226_vm0, %v4473_v28  ;;  %v15449_v45 = vpop.permute.xlu0 %5892  ;;  %4856 = vmatprep.mubr.f32.mxu0 %v14472_v1 }
 0x113   : > { %8786 = vrot.lane.b32.xlu1 %v8745_v42, %s14494_s15  ;;  %13632 = vmatmul.mubr.msk.f32.vlgmr.msra.gmra.mrb[2].mxu1 %vm223_vm1, %v15212_v59  ;;  %v5914_v6 = vsel %vm5910_vm5, %v15437_v43, %v15449_v45 }
 0x114   : > { %13635 = vmatmul.mubr.msk.f32.vlgmr.msra.gmra.mrb[4].mxu0 %vm223_vm1, %v15212_v59  ;;  %v15457_v47 = vpop.permute.xlu1 %5869  ;;  %13636 = vmatprep.subr.msk.mxu1 %vm226_vm0, %v15447_v44 }
 0x115   : > { %13640 = vmatpush1.msk.msra.mxu0 %vm226_vm0, %v4472_v34  ;;  %13637 = vmatpush1.msk.msra.mxu1 %vm226_vm0, %v15462_v48  ;;  %v10186_v34 = vld [vmem:[%s14594_s9 + $0x28] sm:$0x77] }
 0x116   : > { %13645 = vmatprep.subr.msk.mxu0 %vm226_vm0, %v15384_v32  ;;  %v15472_v50 = vpop.permute.xlu0 %5894  ;;  %8788 = vrot.lane.b32.xlu0 %v8765_v46, %s14494_s15  ;;  %v10206_v37 = vcombine.high %v10186_v34, %v10186_v34 }
 0x117   : > { %13642 = vmatprep.subr.msk.mxu1 %vm226_vm0, %v15358_v25  ;;  %4927 = vmatprep.mubr.f32.mxu1 %v14472_v1  ;;  %v15633_v23 = vsel %vm5910_vm5, %v15449_v45, %v15472_v50  ;;  %v10188_v45 = vld [vmem:[%s14594_s9 + $0x38] sm:$0x77] }
 0x118   : > { %5028 = vmatprep.mubr.f32.mxu0 %v14472_v1  ;;  %8790 = vrot.lane.b32.xlu1 %v8746_v49, %s14494_s15  ;;  %v15482_v51 = vpop.permute.xlu1 %5896  ;;  %v11171_v49 = vcombine.high %v10188_v45, %v10188_v45 }
 0x119   : > { %13638 = vmatmul.mubr.msk.f32.vlgmr.msra.gmra.mrb[4].mxu1 %vm223_vm1, %v15212_v59  ;;  %13641 = vmatmul.mubr.msk.f32.vlgmr.msra.gmra.mrb[0].mxu0 %vm223_vm1, %v15296_v5  ;;  %v15616_v17 = vsel %vm5910_vm5, %v15472_v50, %v15482_v51 }
 0x11a   : > { %13643 = vmatpush1.msk.msra.mxu1 %vm226_vm0, %v15396_v36  ;;  %v15488_v53 = vpop.permute.xlu0 %5898  ;;  %13646 = vmatpush1.msk.msra.mxu0 %vm226_vm0, %v15421_v40 }
 0x11b   : > { %13648 = vmatprep.subr.msk.mxu1 %vm226_vm0, %v15412_v38  ;;  %13651 = vmatprep.subr.msk.mxu0 %vm226_vm0, %v15447_v44  ;;  %v15664_v29 = vsel %vm5910_vm5, %v15482_v51, %v15488_v53  ;;  %v11622_v51 = vld [vmem:[%s14594_s9] sm:$0x77] }
 0x11c   : > { %9271 = vrot.lane.b32.xlu0 %v15340_v21, %s14495_s28  ;;  %5099 = vmatprep.mubr.f32.mxu1 %v14472_v1  ;;  %v15499_v54 = vpop.permute.xlu1 %5900 }
 0x11d   : > { %5170 = vmatprep.mubr.f32.mxu0 %v14472_v1  ;;  %9275 = vrot.lane.b32.xlu1 %v9274_v52, %s14494_s15 }
 0x11e   : > { %13644 = vmatmul.mubr.msk.f32.vlgmr.msra.gmra.mrb[0].mxu1 %vm223_vm1, %v15296_v5  ;;  %v15505_v56 = vpop.permute.xlu0 %5902  ;;  %13647 = vmatmul.mubr.msk.f32.vlgmr.msra.gmra.mrb[2].mxu0 %vm223_vm1, %v15296_v5 }
 0x11f   : > { %13649 = vmatpush1.msk.msra.mxu1 %vm226_vm0, %v15430_v41  ;;  %13652 = vmatpush1.msk.msra.mxu0 %vm226_vm0, %v15462_v48 }
 0x120   : > { %13654 = vmatprep.subr.msk.mxu1 %vm226_vm0, %v4957_v58  ;;  %13657 = vmatprep.subr.msk.mxu0 %vm226_vm0, %v15358_v25  ;;  %v15520_v59 = vpop.permute.xlu1 %5904 }
 0x121   : > { %9277 = vrot.lane.b32.xlu0 %v8747_v55, %s14494_s15  ;;  %5241 = vmatprep.mubr.f32.mxu1 %v14472_v1  ;;  %v15657_v27 = vsel %vm5910_vm5, %v15505_v56, %v15520_v59 }
 0x122   : > { %5312 = vmatprep.mubr.f32.mxu0 %v14472_v1  ;;  %9727 = vrot.lane.b32.xlu1 %v15340_v21, %s14496_s29  ;;  %v15530_v63 = vpop.permute.xlu0 %5906 }
 0x123   : > { %13650 = vmatmul.mubr.msk.f32.vlgmr.msra.gmra.mrb[2].mxu1 %vm223_vm1, %v15296_v5  ;;  %13653 = vmatmul.mubr.msk.f32.vlgmr.msra.gmra.mrb[4].mxu0 %vm223_vm1, %v15296_v5  ;;  %v15706_v33 = vsel %vm5910_vm5, %v15520_v59, %v15530_v63 }
 0x124   : > { %13655 = vmatpush1.msk.msra.mxu1 %vm226_vm0, %v4956_v62  ;;  %13658 = vmatpush1.msk.msra.mxu0 %vm226_vm0, %v15396_v36 }
 0x125   : > { %13660 = vmatprep.subr.msk.mxu1 %vm226_vm0, %v15384_v32  ;;  %13663 = vmatprep.subr.msk.mxu0 %vm226_vm0, %v15412_v38  ;;  %v15681_v32 = vsel %vm5910_vm5, %v15499_v54, %v15505_v56 }
 0x126   : > { %9731 = vrot.lane.b32.xlu0 %v9730_v60, %s14494_s15  ;;  %v15544_v10 = vpop.permute.xlu1 %5908  ;;  %5383 = vmatprep.mubr.f32.mxu1 %v14472_v1 }
 0x127   : > { %5484 = vmatprep.mubr.f32.mxu0 %v14472_v1  ;;  %9733 = vrot.lane.b32.xlu1 %v8748_v7, %s14494_s15  ;;  %v15690_v35 = vsel %vm5910_vm5, %v15530_v63, %v15544_v10  ;;  %s13945_s15 = sshll.u32 %s14554_s3, 4  ;;  %s14504_s3 = smov [#allocation3]  }
 0x128   : > { %13656 = vmatmul.mubr.msk.f32.vlgmr.msra.gmra.mrb[4].mxu1 %vm223_vm1, %v15296_v5  ;;  %13659 = vmatmul.mubr.msk.f32.vlgmr.msra.gmra.mrb[0].mxu0 %vm223_vm1, %v15323_v18  ;;  %v15555_v14 = vpop.permute.xlu0 %6389  ;;  %v5911_v5 = vsel %vm5910_vm5, %v15416_v39, %v15377_v30  ;;  %v10205_v30 = vcombine.high %v10185_v26, %v10185_v26 }
 0x129   : > { %13661 = vmatpush1.msk.msra.mxu1 %vm226_vm0, %v15421_v40  ;;  %13664 = vmatpush1.msk.msra.mxu0 %vm226_vm0, %v15430_v41  ;;  %v10187_v40 = vld [vmem:[%s14594_s9 + $0x30] sm:$0x77] }
 0x12a   : > { %13666 = vmatprep.subr.msk.mxu1 %vm226_vm0, %v15447_v44  ;;  %13669 = vmatprep.subr.msk.mxu0 %vm226_vm0, %v4957_v58  ;;  %v10715_v43 = vcombine.high %v10187_v40, %v10187_v40  ;;  %v11623_v58 = vld [vmem:[%s14594_s9 + $0x8] sm:$0x77] }
 0x12b   : > { %10209 = vrot.lane.b32.xlu0 %v10201_v13, %s14480_s21  ;;  %5555 = vmatprep.mubr.f32.mxu1 %v14472_v1  ;;  %v15566_v15 = vpop.permute.xlu1 %6393  ;;  %v11643_v63 = vcombine.high %v11623_v58, %v11623_v58 }
 0x12c   : > { %5626 = vmatprep.mubr.f32.mxu0 %v14472_v1  ;;  %10211 = vrot.lane.b32.xlu1 %v10182_v11, %s14480_s21 }
 0x12d   : > { %13662 = vmatmul.mubr.msk.f32.vlgmr.msra.gmra.mrb[0].mxu1 %vm223_vm1, %v15323_v18  ;;  %13665 = vmatmul.mubr.msk.f32.vlgmr.msra.gmra.mrb[2].mxu0 %vm223_vm1, %v15323_v18 }
 0x12e   : > { %13667 = vmatpush1.msk.msra.mxu1 %vm226_vm0, %v15462_v48  ;;  %13670 = vmatpush1.msk.msra.mxu0 %vm226_vm0, %v4956_v62  ;;  %v6397_v48 = vsel %vm5910_vm5, %v15544_v10, %v15566_v15 }
 0x12f   : > { %13672 = vmatprep.subr.msk.mxu1 %vm226_vm0, %v5413_v0  ;;  %v15583_v61 = vpop.permute.xlu0 %6395  ;;  %13675 = vmatprep.subr.msk.mxu0 %vm226_vm0, %v5912_v57 }
 0x130   : > { %10207 = vrot.lane.b32.xlu0 %v10181_v9, %s14480_s21  ;;  %5697 = vmatprep.mubr.f32.mxu1 %v14472_v1  ;;  %v15589_v2 = vpop.permute.xlu1 %6845  ;;  %v6398_v44 = vsel %vm5910_vm5, %v15566_v15, %v15583_v61 }
 0x131   : > { %5768 = vmatprep.mubr.f32.mxu0 %v14472_v1  ;;  %10213 = vrot.lane.b32.xlu1 %v10202_v16, %s14480_s21 }
 0x132   : > { %13668 = vmatmul.mubr.msk.f32.vlgmr.msra.gmra.mrb[2].mxu1 %vm223_vm1, %v15323_v18  ;;  %13671 = vmatmul.mubr.msk.f32.vlgmr.msra.gmra.mrb[4].mxu0 %vm223_vm1, %v15323_v18 }
 0x133   : > { %13673 = vmatpush1.msk.msra.mxu1 %vm226_vm0, %v5412_v3  ;;  %13676 = vmatpush1.msk.msra.mxu0 %vm226_vm0, %v5911_v5 }
 0x134   : > { %13678 = vmatprep.subr.msk.mxu1 %vm226_vm0, %v5914_v6  ;;  %v15609_v8 = vpop.permute.xlu0 %6849  ;;  %10215 = vrot.lane.b32.xlu0 %v10183_v4, %s14480_s21 }
 0x135   : > { %5839 = vmatprep.mubr.f32.mxu1 %v14472_v1  ;;  %6013 = vmatprep.mubr.f32.mxu0 %v14472_v1  ;;  %v15621_v20 = vpop.permute.xlu1 %6851  ;;  %v6853_v10 = vsel %vm5910_vm5, %v15583_v61, %v15609_v8  ;;  %v11625_v61 = vld [vmem:[%s14594_s9 + $0x18] sm:$0x77] }
 0x136   : > { %10192 = vrot.lane.b32.xlu1 %v15340_v21, %s14497_s30  ;;  %13674 = vmatmul.mubr.msk.f32.vlgmr.msra.gmra.mrb[4].mxu1 %vm223_vm1, %v15323_v18  ;;  %v15644_v18 = vsel %vm5910_vm5, %v15488_v53, %v15499_v54  ;;  %v10189_v53 = vld [vmem:[%s14594_s9 + $0x40] sm:$0x7]  ;;  %v11642_v54 = vcombine.high %v11622_v51, %v11622_v51  ;;  %v6854_v59 = vsel %vm5910_vm5, %v15609_v8, %v15621_v20 }
 0x137   : > { %13677 = vmatmul.mubr.msk.f32.vlgmr.msra.gmra.mrb[0].mxu0 %vm223_vm1, %v15457_v47  ;;  %13679 = vmatpush1.msk.msra.mxu1 %vm226_vm0, %v5913_v22  ;;  %v11645_v5 = vcombine.high %v11625_v61, %v11625_v61  ;;  %v11626_v8 = vld [vmem:[%s14594_s9 + $0x20] sm:$0x77] }
 0x138   : > { %13681 = vmatprep.subr.msk.mxu0 %vm226_vm0, %v15616_v17  ;;  %10217 = vrot.lane.b32.xlu0 %v10203_v12, %s14480_s21 }
 0x139   : > { %13682 = vmatpush1.msk.msra.mxu0 %vm226_vm0, %v15633_v23  ;;  %v15646_v25 = vpop.permute.xlu0 %7327  ;;  %6084 = vmatprep.mubr.f32.mxu1 %v14472_v1 }
 0x13a   : > { %6155 = vmatprep.mubr.f32.mxu0 %v14472_v1  ;;  %10219 = vrot.lane.b32.xlu1 %v10184_v19, %s14480_s21  ;;  %v15659_v28 = vpop.permute.xlu1 %7329 }
 0x13b   : > { %13680 = vmatmul.mubr.msk.f32.vlgmr.msra.gmra.mrb[0].mxu1 %vm223_vm1, %v15457_v47  ;;  %13683 = vmatmul.mubr.msk.f32.vlgmr.msra.gmra.mrb[2].mxu0 %vm223_vm1, %v15457_v47  ;;  %v7353_v60 = vsel %vm7351_vm6, %v15646_v25, %v15659_v28 }
 0x13c   : > { %13684 = vmatprep.subr.msk.mxu1 %vm226_vm0, %v15644_v18  ;;  %10221 = vrot.lane.b32.xlu0 %v10204_v24, %s14480_s21 }
 0x13d   : > { %13685 = vmatpush1.msk.msra.mxu1 %vm226_vm0, %v15664_v29  ;;  %6226 = vmatprep.mubr.f32.mxu1 %v14472_v1 }
 0x13e   : > { %13687 = vmatprep.subr.msk.mxu0 %vm226_vm0, %v15657_v27  ;;  %v15676_v31 = vpop.permute.xlu0 %7325  ;;  %10223 = vrot.lane.b32.xlu1 %v10185_v26, %s14480_s21 }
 0x13f   : > { %13686 = vmatmul.mubr.msk.f32.vlgmr.msra.gmra.mrb[2].mxu1 %vm223_vm1, %v15457_v47  ;;  %13688 = vmatpush1.msk.msra.mxu0 %vm226_vm0, %v15681_v32  ;;  %v15695_v36 = vpop.permute.xlu1 %7331  ;;  %v7352_v13 = vsel %vm7351_vm6, %v15676_v31, %v15646_v25 }
 0x140   : > { %6297 = vmatprep.mubr.f32.mxu0 %v14472_v1  ;;  %10225 = vrot.lane.b32.xlu0 %v10205_v30, %s14480_s21  ;;  %v7354_v16 = vsel %vm7351_vm6, %v15659_v28, %v15695_v36 }
 0x141   : > { %13689 = vmatmul.mubr.msk.f32.vlgmr.msra.gmra.mrb[4].mxu0 %vm223_vm1, %v15457_v47  ;;  %13693 = vmatprep.subr.msk.mxu0 %vm226_vm0, %v5914_v6 }
 0x142   : > { %13690 = vmatprep.subr.msk.mxu1 %vm226_vm0, %v15690_v35  ;;  %13694 = vmatpush1.msk.msra.mxu0 %vm226_vm0, %v5913_v22  ;;  %v11646_v22 = vcombine.high %v11626_v8, %v11626_v8 }
 0x143   : > { %10227 = vrot.lane.b32.xlu1 %v10186_v34, %s14480_s21  ;;  %v15710_v38 = vpop.permute.xlu0 %7333  ;;  %13699 = vmatprep.subr.msk.mxu0 %vm226_vm0, %v15644_v18 }
 0x144   : > { %13691 = vmatpush1.msk.msra.mxu1 %vm226_vm0, %v15706_v33  ;;  %6368 = vmatprep.mubr.f32.mxu1 %v14472_v1  ;;  %v15718_v39 = vpop.permute.xlu1 %7310  ;;  %v7355_v7 = vsel %vm7351_vm6, %v15695_v36, %v15710_v38 }
 0x145   : > { %6469 = vmatprep.mubr.f32.mxu0 %v14472_v1  ;;  %10229 = vrot.lane.b32.xlu0 %v10206_v37, %s14480_s21 }
 0x146   : > { %13692 = vmatmul.mubr.msk.f32.vlgmr.msra.gmra.mrb[4].mxu1 %vm223_vm1, %v15457_v47  ;;  %13695 = vmatmul.mubr.msk.f32.vlgmr.msra.gmra.mrb[0].mxu0 %vm223_vm1, %v15555_v14 }
 0x147   : > { %13696 = vmatprep.subr.msk.mxu1 %vm226_vm0, %v15616_v17  ;;  %13700 = vmatpush1.msk.msra.mxu0 %vm226_vm0, %v15664_v29 }
 0x148   : > { %13697 = vmatpush1.msk.msra.mxu1 %vm226_vm0, %v15633_v23  ;;  %v15732_v41 = vpop.permute.xlu0 %7335  ;;  %13705 = vmatprep.subr.msk.mxu0 %vm226_vm0, %v15690_v35 }
 0x149   : > { %10231 = vrot.lane.b32.xlu1 %v10187_v40, %s14480_s21  ;;  %13702 = vmatprep.subr.msk.mxu1 %vm226_vm0, %v15657_v27  ;;  %v15740_v42 = vpop.permute.xlu1 %7337  ;;  %v15876_v3 = vsel %vm7351_vm6, %v15710_v38, %v15732_v41 }
 0x14a   : > { %6540 = vmatprep.mubr.f32.mxu1 %v14472_v1  ;;  %6611 = vmatprep.mubr.f32.mxu0 %v14472_v1  ;;  %v15859_v15 = vsel %vm7351_vm6, %v15732_v41, %v15740_v42 }
 0x14b   : > { %10712 = vrot.lane.b32.xlu0 %v15340_v21, %s14498_s6  ;;  %13698 = vmatmul.mubr.msk.f32.vlgmr.msra.gmra.mrb[0].mxu1 %vm223_vm1, %v15555_v14 }
 0x14c   : > { %13701 = vmatmul.mubr.msk.f32.vlgmr.msra.gmra.mrb[2].mxu0 %vm223_vm1, %v15555_v14  ;;  %13703 = vmatpush1.msk.msra.mxu1 %vm226_vm0, %v15681_v32 }
 0x14d   : > { %13706 = vmatpush1.msk.msra.mxu0 %vm226_vm0, %v15706_v33  ;;  %v15756_v46 = vpop.permute.xlu0 %7339  ;;  %13708 = vmatprep.subr.msk.mxu1 %vm226_vm0, %v6398_v44 }
 0x14e   : > { %13711 = vmatprep.subr.msk.mxu0 %vm226_vm0, %v15616_v17  ;;  %10716 = vrot.lane.b32.xlu1 %v10715_v43, %s14480_s21  ;;  %v15763_v47 = vpop.permute.xlu1 %7341  ;;  %v15908_v17 = vsel %vm7351_vm6, %v15740_v42, %v15756_v46 }
 0x14f   : > { %6682 = vmatprep.mubr.f32.mxu1 %v14472_v1  ;;  %6753 = vmatprep.mubr.f32.mxu0 %v14472_v1 }
 0x150   : > { %10718 = vrot.lane.b32.xlu0 %v10188_v45, %s14480_s21  ;;  %13704 = vmatmul.mubr.msk.f32.vlgmr.msra.gmra.mrb[2].mxu1 %vm223_vm1, %v15555_v14 }
 0x151   : > { %13707 = vmatmul.mubr.msk.f32.vlgmr.msra.gmra.mrb[4].mxu0 %vm223_vm1, %v15555_v14  ;;  %13709 = vmatpush1.msk.msra.mxu1 %vm226_vm0, %v6397_v48 }
 0x152   : > { %13712 = vmatpush1.msk.msra.mxu0 %vm226_vm0, %v15633_v23  ;;  %v15777_v50 = vpop.permute.xlu0 %7343  ;;  %13714 = vmatprep.subr.msk.mxu1 %vm226_vm0, %v15644_v18  ;;  %v11627_v23 = vld [vmem:[%s14594_s9 + $0x28] sm:$0x77] }
 0x153   : > { %13717 = vmatprep.subr.msk.mxu0 %vm226_vm0, %v15657_v27  ;;  %11168 = vrot.lane.b32.xlu1 %v15340_v21, %s14499_s7  ;;  %v15786_v52 = vpop.permute.xlu1 %7345  ;;  %v15921_v20 = vsel %vm7351_vm6, %v15763_v47, %v15777_v50  ;;  %v11647_v25 = vcombine.high %v11627_v23, %v11627_v23  ;;  %s16582_s7 = scalar_lea.hbm %s16628_s4, %s13945_s15 }
 0x154   : > { %6824 = vmatprep.mubr.f32.mxu1 %v14472_v1  ;;  %6925 = vmatprep.mubr.f32.mxu0 %v14472_v1  ;;  %v15903_v12 = vsel %vm7351_vm6, %v15777_v50, %v15786_v52 }
 0x155   : > { %11172 = vrot.lane.b32.xlu0 %v11171_v49, %s14480_s21  ;;  %13710 = vmatmul.mubr.msk.f32.vlgmr.msra.gmra.mrb[4].mxu1 %vm223_vm1, %v15555_v14  ;;  %v11624_v14 = vld [vmem:[%s14594_s9 + $0x10] sm:$0x77] }
 0x156   : > { %13713 = vmatmul.mubr.msk.f32.vlgmr.msra.gmra.mrb[0].mxu0 %vm223_vm1, %v15589_v2  ;;  %13715 = vmatpush1.msk.msra.mxu1 %vm226_vm0, %v15664_v29  ;;  %v11644_v57 = vcombine.high %v11624_v14, %v11624_v14  ;;  %v11628_v29 = vld [vmem:[%s14594_s9 + $0x30] sm:$0x77] }
 0x157   : > { %13718 = vmatpush1.msk.msra.mxu0 %vm226_vm0, %v15681_v32  ;;  %v15799_v55 = vpop.permute.xlu0 %7347  ;;  %13720 = vmatprep.subr.msk.mxu1 %vm226_vm0, %v15690_v35  ;;  %v12156_v32 = vcombine.high %v11628_v29, %v11628_v29 }
 0x158   : > { %13723 = vmatprep.subr.msk.mxu0 %vm226_vm0, %v6398_v44  ;;  %11174 = vrot.lane.b32.xlu1 %v10189_v53, %s14480_s21  ;;  %v15806_v56 = vpop.permute.xlu1 %7349  ;;  %s14501_s21 = smov 104   ;;  %v15950_v27 = vsel %vm7351_vm6, %v15786_v52, %v15799_v55 }
 0x159   : > { %6996 = vmatprep.mubr.f32.mxu1 %v14472_v1  ;;  %7067 = vmatprep.mubr.f32.mxu0 %v14472_v1  ;;  %v15938_v18 = vsel %vm7351_vm6, %v15799_v55, %v15806_v56 }
 0x15a   : > { %11650 = vrot.lane.b32.xlu0 %v11642_v54, %s14500_s8  ;;  %13716 = vmatmul.mubr.msk.f32.vlgmr.msra.gmra.mrb[0].mxu1 %vm223_vm1, %v15589_v2 }
 0x15b   : > { %13719 = vmatmul.mubr.msk.f32.vlgmr.msra.gmra.mrb[2].mxu0 %vm223_vm1, %v15589_v2  ;;  %13721 = vmatpush1.msk.msra.mxu1 %vm226_vm0, %v15706_v33  ;;  %v11629_v33 = vld [vmem:[%s14594_s9 + $0x38] sm:$0x77] }
 0x15c   : > { %13724 = vmatpush1.msk.msra.mxu0 %vm226_vm0, %v6397_v48  ;;  %v15824_v62 = vpop.permute.xlu0 %7830  ;;  %13726 = vmatprep.subr.msk.mxu1 %vm226_vm0, %v6854_v59  ;;  %v12612_v40 = vcombine.high %v11629_v33, %v11629_v33 }
 0x15d   : > { %13729 = vmatprep.subr.msk.mxu0 %vm226_vm0, %v7353_v60  ;;  %11652 = vrot.lane.b32.xlu1 %v11623_v58, %s14500_s8  ;;  %v15830_v9 = vpop.permute.xlu1 %7834 }
 0x15e   : > { %7138 = vmatprep.mubr.f32.mxu1 %v14472_v1  ;;  %7209 = vmatprep.mubr.f32.mxu0 %v14472_v1  ;;  %v7838_v37 = vsel %vm7351_vm6, %v15806_v56, %v15830_v9 }
 0x15f   : > { %11648 = vrot.lane.b32.xlu0 %v11622_v51, %s14500_s8  ;;  %13722 = vmatmul.mubr.msk.f32.vlgmr.msra.gmra.mrb[2].mxu1 %vm223_vm1, %v15589_v2 }
 0x160   : > { %13725 = vmatmul.mubr.msk.f32.vlgmr.msra.gmra.mrb[4].mxu0 %vm223_vm1, %v15589_v2  ;;  %13727 = vmatpush1.msk.msra.mxu1 %vm226_vm0, %v6853_v10 }
 0x161   : > { %13730 = vmatpush1.msk.msra.mxu0 %vm226_vm0, %v7352_v13  ;;  %v15850_v11 = vpop.permute.xlu0 %7836  ;;  %13732 = vmatprep.subr.msk.mxu1 %vm226_vm0, %v7355_v7 }
 0x162   : > { %11654 = vrot.lane.b32.xlu1 %v11643_v63, %s14500_s8  ;;  %7280 = vmatprep.mubr.f32.mxu1 %v14472_v1  ;;  %v15861_v0 = vpop.permute.xlu1 %8286  ;;  %v7839_v34 = vsel %vm7351_vm6, %v15830_v9, %v15850_v11 }
 0x163   : > { %7454 = vmatprep.mubr.f32.mxu0 %v14472_v1  ;;  %11656 = vrot.lane.b32.xlu0 %v11624_v14, %s14500_s8 }
 0x164   : > { %13728 = vmatmul.mubr.msk.f32.vlgmr.msra.gmra.mrb[4].mxu1 %vm223_vm1, %v15589_v2  ;;  %13731 = vmatmul.mubr.msk.f32.vlgmr.msra.gmra.mrb[0].mxu0 %vm223_vm1, %v15718_v39  ;;  %v15889_v2 = vsel %vm7351_vm6, %v15756_v46, %v15763_v47  ;;  %v11630_v47 = vld [vmem:[%s14594_s9 + $0x40] sm:$0x7] }
 0x165   : > { %13733 = vmatpush1.msk.msra.mxu1 %vm226_vm0, %v7354_v16  ;;  %13735 = vmatprep.subr.msk.mxu0 %vm226_vm0, %v15859_v15 }
 0x166   : > { %11633 = vrot.lane.b32.xlu1 %v15340_v21, %s14501_s21  ;;  %v15881_v4 = vpop.permute.xlu0 %8290  ;;  %7525 = vmatprep.mubr.f32.mxu1 %v14472_v1  ;;  %s14407_s21 = scalar_lea.vmem %s16584_s23, 16 }
 0x167   : > { %13736 = vmatpush1.msk.msra.mxu0 %vm226_vm0, %v15876_v3  ;;  %7596 = vmatprep.mubr.f32.mxu0 %v14472_v1  ;;  %v15893_v6 = vpop.permute.xlu1 %8292  ;;  %p14408_p11 = scmp.ne.s32.totalorder %s16584_s23, %s14407_s21 }
 0x168   : > { %11658 = vrot.lane.b32.xlu0 %v11644_v57, %s14500_s8  ;;  %13734 = vmatmul.mubr.msk.f32.vlgmr.msra.gmra.mrb[0].mxu1 %vm223_vm1, %v15718_v39  ;;  %v8295_v43 = vsel %vm7351_vm6, %v15881_v4, %v15893_v6 }
 0x169   : > { %13737 = vmatmul.mubr.msk.f32.vlgmr.msra.gmra.mrb[2].mxu0 %vm223_vm1, %v15718_v39  ;;  %13738 = vmatprep.subr.msk.mxu1 %vm226_vm0, %v15889_v2  ;;  %p14409_p12 = pnand %p14408_p11, %p14571_p5 }
 0x16a   : > { %11660 = vrot.lane.b32.xlu1 %v11625_v61, %s14500_s8  ;;  %13739 = vmatpush1.msk.msra.mxu1 %vm226_vm0, %v15908_v17 }
 0x16b   : > { %7667 = vmatprep.mubr.f32.mxu1 %v14472_v1  ;;  %v15916_v19 = vpop.permute.xlu0 %8768  ;;  %13741 = vmatprep.subr.msk.mxu0 %vm226_vm0, %v15903_v12  ;;  %p14410_p13 = pneg %p14409_p12 }
 0x16c   : > { %11662 = vrot.lane.b32.xlu0 %v11645_v5, %s14500_s8  ;;  %13740 = vmatmul.mubr.msk.f32.vlgmr.msra.gmra.mrb[2].mxu1 %vm223_vm1, %v15718_v39  ;;  %v15931_v24 = vpop.permute.xlu1 %8770 }
 0x16d   : > { %13742 = vmatpush1.msk.msra.mxu0 %vm226_vm0, %v15921_v20  ;;  %7738 = vmatprep.mubr.f32.mxu0 %v14472_v1  ;;  %v8794_v44 = vsel %vm8792_vm7, %v15916_v19, %v15931_v24 }
 0x16e   : > { %11664 = vrot.lane.b32.xlu1 %v11626_v8, %s14500_s8  ;;  %13743 = vmatmul.mubr.msk.f32.vlgmr.msra.gmra.mrb[4].mxu0 %vm223_vm1, %v15718_v39 }
 0x16f   : > { %13747 = vmatprep.subr.msk.mxu0 %vm226_vm0, %v7355_v7  ;;  %13744 = vmatprep.subr.msk.mxu1 %vm226_vm0, %v15938_v18 }
 0x170   : > { %11666 = vrot.lane.b32.xlu0 %v11646_v22, %s14500_s8  ;;  %13748 = vmatpush1.msk.msra.mxu0 %vm226_vm0, %v7354_v16  ;;  %v15945_v26 = vpop.permute.xlu0 %8766 }
 0x171   : > { %13753 = vmatprep.subr.msk.mxu0 %vm226_vm0, %v15889_v2  ;;  %13745 = vmatpush1.msk.msra.mxu1 %vm226_vm0, %v15950_v27  ;;  %v15959_v28 = vpop.permute.xlu1 %8772  ;;  %v8793_v49 = vsel %vm8792_vm7, %v15945_v26, %v15916_v19 }
 0x172   : > { %11668 = vrot.lane.b32.xlu1 %v11627_v23, %s14500_s8  ;;  %7809 = vmatprep.mubr.f32.mxu1 %v14472_v1  ;;  %v8795_v52 = vsel %vm8792_vm7, %v15931_v24, %v15959_v28 }
 0x173   : > { %7910 = vmatprep.mubr.f32.mxu0 %v14472_v1  ;;  %13746 = vmatmul.mubr.msk.f32.vlgmr.msra.gmra.mrb[4].mxu1 %vm223_vm1, %v15718_v39 }
 0x174   : > { %11670 = vrot.lane.b32.xlu0 %v11647_v25, %s14500_s8  ;;  %13749 = vmatmul.mubr.msk.f32.vlgmr.msra.gmra.mrb[0].mxu0 %vm223_vm1, %v15824_v62 }
 0x175   : > { %13750 = vmatprep.subr.msk.mxu1 %vm226_vm0, %v15859_v15  ;;  %v15971_v30 = vpop.permute.xlu0 %8774  ;;  %13754 = vmatpush1.msk.msra.mxu0 %vm226_vm0, %v15908_v17 }
 0x176   : > { %13751 = vmatpush1.msk.msra.mxu1 %vm226_vm0, %v15876_v3  ;;  %13759 = vmatprep.subr.msk.mxu0 %vm226_vm0, %v15938_v18  ;;  %v15980_v31 = vpop.permute.xlu1 %8751  ;;  %v8796_v46 = vsel %vm8792_vm7, %v15959_v28, %v15971_v30 }
 0x177   : > { %11672 = vrot.lane.b32.xlu1 %v11628_v29, %s14500_s8  ;;  %13756 = vmatprep.subr.msk.mxu1 %vm226_vm0, %v15903_v12 }
 0x178   : > { %7981 = vmatprep.mubr.f32.mxu1 %v14472_v1  ;;  %8052 = vmatprep.mubr.f32.mxu0 %v14472_v1 }
 0x179   : > { %13752 = vmatmul.mubr.msk.f32.vlgmr.msra.gmra.mrb[0].mxu1 %vm223_vm1, %v15824_v62  ;;  %13755 = vmatmul.mubr.msk.f32.vlgmr.msra.gmra.mrb[2].mxu0 %vm223_vm1, %v15824_v62 }
 0x17a   : > { %13757 = vmatpush1.msk.msra.mxu1 %vm226_vm0, %v15921_v20  ;;  %v15995_v35 = vpop.permute.xlu0 %8776  ;;  %13760 = vmatpush1.msk.msra.mxu0 %vm226_vm0, %v15950_v27 }
 0x17b   : > { %12153 = vrot.lane.b32.xlu0 %v15340_v21, %s14502_s11  ;;  %13762 = vmatprep.subr.msk.mxu1 %vm226_vm0, %v7839_v34  ;;  %v16003_v36 = vpop.permute.xlu1 %8778  ;;  %v8797_v55 = vsel %vm8792_vm7, %v15971_v30, %v15995_v35  ;;  %s14411_s11 = sshll.u32 %s14504_s3, 4  ;;  %s14412_s11 = int_to_ptr.vmem [resolvable:$false] %s14411_s11 }
 0x17c   : > { %13765 = vmatprep.subr.msk.mxu0 %vm226_vm0, %v15859_v15  ;;  %12157 = vrot.lane.b32.xlu1 %v12156_v32, %s14500_s8  ;;  %v8798_v50 = vsel %vm8792_vm7, %v15995_v35, %v16003_v36  ;;  %p14414_p0 = scmp.lt.s32.totalorder %s16584_s23, %s14412_s11 }
 0x17d   : > { %8123 = vmatprep.mubr.f32.mxu1 %v14472_v1  ;;  %8194 = vmatprep.mubr.f32.mxu0 %v14472_v1 }
 0x17e   : > { %13758 = vmatmul.mubr.msk.f32.vlgmr.msra.gmra.mrb[2].mxu1 %vm223_vm1, %v15824_v62  ;;  %13761 = vmatmul.mubr.msk.f32.vlgmr.msra.gmra.mrb[4].mxu0 %vm223_vm1, %v15824_v62  ;;  %v16017_v38 = vpop.permute.xlu0 %8780 }
 0x17f   : > { %13763 = vmatpush1.msk.msra.mxu1 %vm226_vm0, %v7838_v37  ;;  %13766 = vmatpush1.msk.msra.mxu0 %vm226_vm0, %v15876_v3  ;;  %v8799_v59 = vsel %vm8792_vm7, %v16003_v36, %v16017_v38 }
 0x180   : > { %13768 = vmatprep.subr.msk.mxu1 %vm226_vm0, %v15889_v2  ;;  %v16023_v39 = vpop.permute.xlu1 %8782  ;;  %13771 = vmatprep.subr.msk.mxu0 %vm226_vm0, %v15903_v12 }
 0x181   : > { %12159 = vrot.lane.b32.xlu0 %v11629_v33, %s14500_s8  ;;  %8265 = vmatprep.mubr.f32.mxu1 %v14472_v1  ;;  %v8800_v53 = vsel %vm8792_vm7, %v16017_v38, %v16023_v39 }
 0x182   : > { %8366 = vmatprep.mubr.f32.mxu0 %v14472_v1  ;;  %13764 = vmatmul.mubr.msk.f32.vlgmr.msra.gmra.mrb[4].mxu1 %vm223_vm1, %v15824_v62  ;;  %v8785_v41 = vpop.permute.xlu0 %8784 }
 0x183   : > { %13767 = vmatmul.mubr.msk.f32.vlgmr.msra.gmra.mrb[0].mxu0 %vm223_vm1, %v15861_v0  ;;  %13769 = vmatpush1.msk.msra.mxu1 %vm226_vm0, %v15908_v17  ;;  %v8801_v63 = vsel %vm8792_vm7, %v16023_v39, %v8785_v41 }
 0x184   : > { %13772 = vmatpush1.msk.msra.mxu0 %vm226_vm0, %v15921_v20  ;;  %13774 = vmatprep.subr.msk.mxu1 %vm226_vm0, %v15938_v18 }
 0x185   : > { %13777 = vmatprep.subr.msk.mxu0 %vm226_vm0, %v7839_v34  ;;  %v8787_v42 = vpop.permute.xlu1 %8786  ;;  %12613 = vrot.lane.b32.xlu0 %v12612_v40, %s14500_s8 }
 0x186   : > { %8437 = vmatprep.mubr.f32.mxu1 %v14472_v1  ;;  %8508 = vmatprep.mubr.f32.mxu0 %v14472_v1  ;;  %v8802_v56 = vsel %vm8792_vm7, %v8785_v41, %v8787_v42 }
 0x187   : > { %13770 = vmatmul.mubr.msk.f32.vlgmr.msra.gmra.mrb[0].mxu1 %vm223_vm1, %v15861_v0  ;;  %13773 = vmatmul.mubr.msk.f32.vlgmr.msra.gmra.mrb[2].mxu0 %vm223_vm1, %v15861_v0 }
 0x188   : > { %13775 = vmatpush1.msk.msra.mxu1 %vm226_vm0, %v15950_v27  ;;  %13778 = vmatpush1.msk.msra.mxu0 %vm226_vm0, %v7838_v37  ;;  %v8789_v45 = vpop.permute.xlu0 %8788 }
 0x189   : > { %12609 = vrot.lane.b32.xlu1 %v15340_v21, %s14503_s12  ;;  %13780 = vmatprep.subr.msk.mxu1 %vm226_vm0, %v8295_v43  ;;  %v8294_v21 = vsel %vm7351_vm6, %v15850_v11, %v15881_v4  ;;  %v8803_v9 = vsel %vm8792_vm7, %v8787_v42, %v8789_v45  ;;  %s14413_s12 = scalar_lea.vmem %s14412_s11, 32 }
 0x18a   : > { %13783 = vmatprep.subr.msk.mxu0 %vm226_vm0, %v8794_v44  ;;  %8579 = vmatprep.mubr.f32.mxu1 %v14472_v1  ;;  %v16066_v48 = vpop.permute.xlu1 %8790  ;;  %p14415_p1 = scmp.lt.s32.totalorder %s14413_s12, %s14407_s21 }
 0x18b   : > { %8650 = vmatprep.mubr.f32.mxu0 %v14472_v1  ;;  %13776 = vmatmul.mubr.msk.f32.vlgmr.msra.gmra.mrb[2].mxu1 %vm223_vm1, %v15861_v0  ;;  %v8804_v60 = vsel %vm8792_vm7, %v8789_v45, %v16066_v48 }
 0x18c   : > { %13779 = vmatmul.mubr.msk.f32.vlgmr.msra.gmra.mrb[4].mxu0 %vm223_vm1, %v15861_v0  ;;  %13781 = vmatpush1.msk.msra.mxu1 %vm226_vm0, %v8294_v21  ;;  %p14416_p2 = por %p14415_p1, %p14414_p0 }
 0x18d   : > { %13784 = vmatpush1.msk.msra.mxu0 %vm226_vm0, %v8793_v49  ;;  %13786 = vmatprep.subr.msk.mxu1 %vm226_vm0, %v8796_v46 }
 0x18e   : > { %12615 = vrot.lane.b32.xlu1 %v11630_v47, %s14500_s8  ;;  %v16085_v51 = vpop.permute.xlu0 %9271  ;;  %8721 = vmatprep.mubr.f32.mxu1 %v14472_v1  ;;  %s13387_s8 = scalar_lea.sflag [#allocation4], %s189_s13  ;;  %p14417_p3 = pnand %p14416_p2, %p14410_p13 }
 0x18f   : > { %8895 = vmatprep.mubr.f32.mxu0 %v14472_v1  ;;  %13782 = vmatmul.mubr.msk.f32.vlgmr.msra.gmra.mrb[4].mxu1 %vm223_vm1, %v15861_v0  ;;  %v9276_v54 = vpop.permute.xlu1 %9275 }
 0x190   : > { %13785 = vmatmul.mubr.msk.f32.vlgmr.msra.gmra.mrb[0].mxu0 %vm223_vm1, %v15980_v31  ;;  %13787 = vmatpush1.msk.msra.mxu1 %vm226_vm0, %v8795_v52  ;;  %v9279_v0 = vsel %vm8792_vm7, %v16066_v48, %v9276_v54 }
 0x191   : > { %13789 = vmatprep.subr.msk.mxu0 %vm226_vm0, %v8798_v50  ;;  %8966 = vmatprep.mubr.f32.mxu1 %v14472_v1 }
 0x192   : > { %13790 = vmatpush1.msk.msra.mxu0 %vm226_vm0, %v8797_v55  ;;  %9037 = vmatprep.mubr.f32.mxu0 %v14472_v1 }
 0x193   : > { %13792 = vmatprep.subr.msk.mxu1 %vm226_vm0, %v8800_v53  ;;  %v16109_v58 = vpop.permute.xlu0 %9277  ;;  %13788 = vmatmul.mubr.msk.f32.vlgmr.msra.gmra.mrb[0].mxu1 %vm223_vm1, %v15980_v31 }
 0x194   : > { %13791 = vmatmul.mubr.msk.f32.vlgmr.msra.gmra.mrb[2].mxu0 %vm223_vm1, %v15980_v31  ;;  %13793 = vmatpush1.msk.msra.mxu1 %vm226_vm0, %v8799_v59  ;;  %v16122_v62 = vpop.permute.xlu1 %9727  ;;  %v9280_v14 = vsel %vm8792_vm7, %v9276_v54, %v16109_v58 }
 0x195   : > { %9108 = vmatprep.mubr.f32.mxu1 %v14472_v1  ;;  %13795 = vmatprep.subr.msk.mxu0 %vm226_vm0, %v8802_v56 }
 0x196   : > { %9179 = vmatprep.mubr.f32.mxu0 %v14472_v1  ;;  %13796 = vmatpush1.msk.msra.mxu0 %vm226_vm0, %v8801_v63 }
 0x197   : > { %13798 = vmatprep.subr.msk.mxu1 %vm226_vm0, %v8804_v60  ;;  %13794 = vmatmul.mubr.msk.f32.vlgmr.msra.gmra.mrb[2].mxu1 %vm223_vm1, %v15980_v31 }
 0x198   : > { %13797 = vmatmul.mubr.msk.f32.vlgmr.msra.gmra.mrb[4].mxu0 %vm223_vm1, %v15980_v31  ;;  %v16135_v7 = vpop.permute.xlu0 %9731  ;;  %13801 = vmatprep.subr.msk.mxu0 %vm226_vm0, %v8796_v46 }
 0x199   : > { %13799 = vmatpush1.msk.msra.mxu1 %vm226_vm0, %v8803_v9  ;;  %13802 = vmatpush1.msk.msra.mxu0 %vm226_vm0, %v8795_v52  ;;  %v9734_v10 = vpop.permute.xlu1 %9733  ;;  %v9735_v12 = vsel %vm8792_vm7, %v16109_v58, %v16135_v7 }
 0x19a   : > { %9250 = vmatprep.mubr.f32.mxu1 %v14472_v1  ;;  %13807 = vmatprep.subr.msk.mxu0 %vm226_vm0, %v8800_v53  ;;  %v9736_v4 = vsel %vm8792_vm7, %v16135_v7, %v9734_v10 }
 0x19b   : > { %9351 = vmatprep.mubr.f32.mxu0 %v14472_v1  ;;  %13800 = vmatmul.mubr.msk.f32.vlgmr.msra.gmra.mrb[4].mxu1 %vm223_vm1, %v15980_v31 }
 0x19c   : > { %13803 = vmatmul.mubr.msk.f32.vlgmr.msra.gmra.mrb[0].mxu0 %vm223_vm1, %v16085_v51  ;;  %13804 = vmatprep.subr.msk.mxu1 %vm226_vm0, %v8798_v50 }
 0x19d   : > { %13808 = vmatpush1.msk.msra.mxu0 %vm226_vm0, %v8799_v59  ;;  %v10210_v13 = vpop.permute.xlu0 %10209  ;;  %13805 = vmatpush1.msk.msra.mxu1 %vm226_vm0, %v8797_v55 }
 0x19e   : > { %13813 = vmatprep.subr.msk.mxu0 %vm226_vm0, %v8804_v60  ;;  %13810 = vmatprep.subr.msk.mxu1 %vm226_vm0, %v8802_v56  ;;  %v10212_v11 = vpop.permute.xlu1 %10211 }
 0x19f   : > { %9422 = vmatprep.mubr.f32.mxu1 %v14472_v1  ;;  %9493 = vmatprep.mubr.f32.mxu0 %v14472_v1  ;;  %v10235_v5 = vsel %vm10233_vm8, %v10210_v13, %v10212_v11 }
 0x1a0   : > { %13806 = vmatmul.mubr.msk.f32.vlgmr.msra.gmra.mrb[0].mxu1 %vm223_vm1, %v16085_v51  ;;  %13809 = vmatmul.mubr.msk.f32.vlgmr.msra.gmra.mrb[2].mxu0 %vm223_vm1, %v16085_v51 }
 0x1a1   : > { %13811 = vmatpush1.msk.msra.mxu1 %vm226_vm0, %v8801_v63  ;;  %13814 = vmatpush1.msk.msra.mxu0 %vm226_vm0, %v8803_v9 }
 0x1a2   : > { %13816 = vmatprep.subr.msk.mxu1 %vm226_vm0, %v9280_v14  ;;  %v10208_v15 = vpop.permute.xlu0 %10207  ;;  %13819 = vmatprep.subr.msk.mxu0 %vm226_vm0, %v8798_v50 }
 0x1a3   : > { %9564 = vmatprep.mubr.f32.mxu1 %v14472_v1  ;;  %9635 = vmatprep.mubr.f32.mxu0 %v14472_v1  ;;  %v10214_v16 = vpop.permute.xlu1 %10213  ;;  %v10234_v17 = vsel %vm10233_vm8, %v10208_v15, %v10210_v13 }
 0x1a4   : > { %13812 = vmatmul.mubr.msk.f32.vlgmr.msra.gmra.mrb[2].mxu1 %vm223_vm1, %v16085_v51  ;;  %13815 = vmatmul.mubr.msk.f32.vlgmr.msra.gmra.mrb[4].mxu0 %vm223_vm1, %v16085_v51  ;;  %v10236_v23 = vsel %vm10233_vm8, %v10212_v11, %v10214_v16 }
 0x1a5   : > { %13817 = vmatpush1.msk.msra.mxu1 %vm226_vm0, %v9279_v0  ;;  %13820 = vmatpush1.msk.msra.mxu0 %vm226_vm0, %v8797_v55 }
 0x1a6   : > { %13822 = vmatprep.subr.msk.mxu1 %vm226_vm0, %v8800_v53  ;;  %13825 = vmatprep.subr.msk.mxu0 %vm226_vm0, %v8802_v56  ;;  %v10216_v57 = vpop.permute.xlu0 %10215 }
 0x1a7   : > { %9706 = vmatprep.mubr.f32.mxu1 %v14472_v1  ;;  %9807 = vmatprep.mubr.f32.mxu0 %v14472_v1  ;;  %v10237_v6 = vsel %vm10233_vm8, %v10214_v16, %v10216_v57 }
 0x1a8   : > { %13818 = vmatmul.mubr.msk.f32.vlgmr.msra.gmra.mrb[4].mxu1 %vm223_vm1, %v16085_v51  ;;  %v16180_v61 = vpop.permute.xlu1 %10192  ;;  %13821 = vmatmul.mubr.msk.f32.vlgmr.msra.gmra.mrb[0].mxu0 %vm223_vm1, %v16122_v62 }
 0x1a9   : > { %13823 = vmatpush1.msk.msra.mxu1 %vm226_vm0, %v8799_v59  ;;  %13826 = vmatpush1.msk.msra.mxu0 %vm226_vm0, %v8801_v63 }
 0x1aa   : > { %13828 = vmatprep.subr.msk.mxu1 %vm226_vm0, %v8804_v60  ;;  %13831 = vmatprep.subr.msk.mxu0 %vm226_vm0, %v9280_v14  ;;  %v10218_v3 = vpop.permute.xlu0 %10217 }
 0x1ab   : > { %9878 = vmatprep.mubr.f32.mxu1 %v14472_v1  ;;  %9949 = vmatprep.mubr.f32.mxu0 %v14472_v1  ;;  %v10238_v18 = vsel %vm10233_vm8, %v10216_v57, %v10218_v3 }
 0x1ac   : > { %13824 = vmatmul.mubr.msk.f32.vlgmr.msra.gmra.mrb[0].mxu1 %vm223_vm1, %v16122_v62  ;;  %13827 = vmatmul.mubr.msk.f32.vlgmr.msra.gmra.mrb[2].mxu0 %vm223_vm1, %v16122_v62  ;;  %v10220_v2 = vpop.permute.xlu1 %10219 }
 0x1ad   : > { %13829 = vmatpush1.msk.msra.mxu1 %vm226_vm0, %v8803_v9  ;;  %13832 = vmatpush1.msk.msra.mxu0 %vm226_vm0, %v9279_v0  ;;  %v10239_v19 = vsel %vm10233_vm8, %v10218_v3, %v10220_v2 }
 0x1ae   : > { %13834 = vmatprep.subr.msk.mxu1 %vm226_vm0, %v9736_v4  ;;  %13837 = vmatprep.subr.msk.mxu0 %vm226_vm0, %v10235_v5  ;;  %v10222_v8 = vpop.permute.xlu0 %10221 }
 0x1af   : > { %10020 = vmatprep.mubr.f32.mxu1 %v14472_v1  ;;  %10091 = vmatprep.mubr.f32.mxu0 %v14472_v1  ;;  %v10240_v27 = vsel %vm10233_vm8, %v10220_v2, %v10222_v8 }
 0x1b0   : > { %13830 = vmatmul.mubr.msk.f32.vlgmr.msra.gmra.mrb[2].mxu1 %vm223_vm1, %v16122_v62  ;;  %13833 = vmatmul.mubr.msk.f32.vlgmr.msra.gmra.mrb[4].mxu0 %vm223_vm1, %v16122_v62  ;;  %v10224_v20 = vpop.permute.xlu1 %10223 }
 0x1b1   : > { %13835 = vmatpush1.msk.msra.mxu1 %vm226_vm0, %v9735_v12  ;;  %13838 = vmatpush1.msk.msra.mxu0 %vm226_vm0, %v10234_v17  ;;  %v10241_v24 = vsel %vm10233_vm8, %v10222_v8, %v10224_v20 }
 0x1b2   : > { %13840 = vmatprep.subr.msk.mxu1 %vm226_vm0, %v10237_v6  ;;  %10162 = vmatprep.mubr.f32.mxu1 %v14472_v1  ;;  %v10226_v22 = vpop.permute.xlu0 %10225 }
 0x1b3   : > { %10336 = vmatprep.mubr.f32.mxu0 %v14472_v1  ;;  %13843 = vmatprep.subr.msk.mxu0 %vm226_vm0, %v10239_v19  ;;  %v10242_v29 = vsel %vm10233_vm8, %v10224_v20, %v10226_v22 }
 0x1b4   : > { %13836 = vmatmul.mubr.msk.f32.vlgmr.msra.gmra.mrb[4].mxu1 %vm223_vm1, %v16122_v62  ;;  %13839 = vmatmul.mubr.msk.f32.vlgmr.msra.gmra.mrb[0].mxu0 %vm223_vm1, %v16180_v61 }
 0x1b5   : > { %13841 = vmatpush1.msk.msra.mxu1 %vm226_vm0, %v10236_v23  ;;  %v10228_v25 = vpop.permute.xlu1 %10227  ;;  %10407 = vmatprep.mubr.f32.mxu1 %v14472_v1 }
 0x1b6   : > { %13844 = vmatpush1.msk.msra.mxu0 %vm226_vm0, %v10238_v18  ;;  %v10243_v26 = vsel %vm10233_vm8, %v10226_v22, %v10228_v25  ;;  %10478 = vmatprep.mubr.f32.mxu0 %v14472_v1 }
 0x1b7   : > { %13846 = vmatprep.subr.msk.mxu1 %vm226_vm0, %v10241_v24  ;;  %v10230_v28 = vpop.permute.xlu0 %10229  ;;  %13849 = vmatprep.subr.msk.mxu0 %vm226_vm0, %v10243_v26 }
 0x1b8   : > { %13842 = vmatmul.mubr.msk.f32.vlgmr.msra.gmra.mrb[0].mxu1 %vm223_vm1, %v16180_v61  ;;  %13845 = vmatmul.mubr.msk.f32.vlgmr.msra.gmra.mrb[2].mxu0 %vm223_vm1, %v16180_v61  ;;  %v10244_v32 = vsel %vm10233_vm8, %v10228_v25, %v10230_v28 }
 0x1b9   : > { %13847 = vmatpush1.msk.msra.mxu1 %vm226_vm0, %v10240_v27  ;;  %10549 = vmatprep.mubr.f32.mxu1 %v14472_v1 }
 0x1ba   : > { %13850 = vmatpush1.msk.msra.mxu0 %vm226_vm0, %v10242_v29  ;;  %10620 = vmatprep.mubr.f32.mxu0 %v14472_v1 }
 0x1bb   : > { %v10232_v30 = vpop.permute.xlu1 %10231  ;;  %13855 = vmatprep.subr.msk.mxu0 %vm226_vm0, %v10237_v6 }
 0x1bc   : > { %13848 = vmatmul.mubr.msk.f32.vlgmr.msra.gmra.mrb[2].mxu1 %vm223_vm1, %v16180_v61  ;;  %v10245_v31 = vsel %vm10233_vm8, %v10230_v28, %v10232_v30  ;;  %13851 = vmatmul.mubr.msk.f32.vlgmr.msra.gmra.mrb[4].mxu0 %vm223_vm1, %v16180_v61 }
 0x1bd   : > { %v10713_v34 = vpop.permute.xlu0 %10712  ;;  %13852 = vmatprep.subr.msk.mxu1 %vm226_vm0, %v10245_v31  ;;  %13856 = vmatpush1.msk.msra.mxu0 %vm226_vm0, %v10236_v23 }
 0x1be   : > { %13853 = vmatpush1.msk.msra.mxu1 %vm226_vm0, %v10244_v32  ;;  %13861 = vmatprep.subr.msk.mxu0 %vm226_vm0, %v10241_v24 }
 0x1bf   : > { %10691 = vmatprep.mubr.f32.mxu1 %v14472_v1  ;;  %10792 = vmatprep.mubr.f32.mxu0 %v14472_v1 }
 0x1c0   : > { %13854 = vmatmul.mubr.msk.f32.vlgmr.msra.gmra.mrb[4].mxu1 %vm223_vm1, %v16180_v61  ;;  %v10717_v35 = vpop.permute.xlu1 %10716  ;;  %13857 = vmatmul.mubr.msk.f32.vlgmr.msra.gmra.mrb[0].mxu0 %vm223_vm1, %v10713_v34 }
 0x1c1   : > { %13858 = vmatprep.subr.msk.mxu1 %vm226_vm0, %v10239_v19  ;;  %13862 = vmatpush1.msk.msra.mxu0 %vm226_vm0, %v10240_v27  ;;  %v10720_v39 = vsel %vm10233_vm8, %v10232_v30, %v10717_v35 }
 0x1c2   : > { %13859 = vmatpush1.msk.msra.mxu1 %vm226_vm0, %v10238_v18  ;;  %v10719_v36 = vpop.permute.xlu0 %10718  ;;  %13867 = vmatprep.subr.msk.mxu0 %vm226_vm0, %v10245_v31 }
 0x1c3   : > { %13864 = vmatprep.subr.msk.mxu1 %vm226_vm0, %v10243_v26  ;;  %v10721_v37 = vsel %vm10233_vm8, %v10717_v35, %v10719_v36  ;;  %10863 = vmatprep.mubr.f32.mxu1 %v14472_v1 }
 0x1c4   : > { %10934 = vmatprep.mubr.f32.mxu0 %v14472_v1  ;;  %13860 = vmatmul.mubr.msk.f32.vlgmr.msra.gmra.mrb[0].mxu1 %vm223_vm1, %v10713_v34 }
 0x1c5   : > { %13863 = vmatmul.mubr.msk.f32.vlgmr.msra.gmra.mrb[2].mxu0 %vm223_vm1, %v10713_v34  ;;  %v11169_v33 = vpop.permute.xlu1 %11168  ;;  %13865 = vmatpush1.msk.msra.mxu1 %vm226_vm0, %v10242_v29 }
 0x1c6   : > { %13868 = vmatpush1.msk.msra.mxu0 %vm226_vm0, %v10244_v32  ;;  %13870 = vmatprep.subr.msk.mxu1 %vm226_vm0, %v10721_v37 }
 0x1c7   : > { %13873 = vmatprep.subr.msk.mxu0 %vm226_vm0, %v10239_v19  ;;  %v11173_v38 = vpop.permute.xlu0 %11172  ;;  %11005 = vmatprep.mubr.f32.mxu1 %v14472_v1 }
 0x1c8   : > { %11076 = vmatprep.mubr.f32.mxu0 %v14472_v1  ;;  %13866 = vmatmul.mubr.msk.f32.vlgmr.msra.gmra.mrb[2].mxu1 %vm223_vm1, %v10713_v34  ;;  %v11176_v47 = vsel %vm10233_vm8, %v10719_v36, %v11173_v38 }
 0x1c9   : > { %13869 = vmatmul.mubr.msk.f32.vlgmr.msra.gmra.mrb[4].mxu0 %vm223_vm1, %v10713_v34  ;;  %13871 = vmatpush1.msk.msra.mxu1 %vm226_vm0, %v10720_v39 }
 0x1ca   : > { %13874 = vmatpush1.msk.msra.mxu0 %vm226_vm0, %v10238_v18  ;;  %v11175_v40 = vpop.permute.xlu1 %11174  ;;  %13876 = vmatprep.subr.msk.mxu1 %vm226_vm0, %v10241_v24 }
 0x1cb   : > { %13879 = vmatprep.subr.msk.mxu0 %vm226_vm0, %v10243_v26  ;;  %11147 = vmatprep.mubr.f32.mxu1 %v14472_v1  ;;  %v11177_v44 = vsel %vm10233_vm8, %v11173_v38, %v11175_v40 }
 0x1cc   : > { %v11651_v41 = vpop.permute.xlu0 %11650  ;;  %11248 = vmatprep.mubr.f32.mxu0 %v14472_v1  ;;  %13872 = vmatmul.mubr.msk.f32.vlgmr.msra.gmra.mrb[4].mxu1 %vm223_vm1, %v10713_v34 }
 0x1cd   : > { %13875 = vmatmul.mubr.msk.f32.vlgmr.msra.gmra.mrb[0].mxu0 %vm223_vm1, %v11169_v33  ;;  %13877 = vmatpush1.msk.msra.mxu1 %vm226_vm0, %v10240_v27 }
 0x1ce   : > { %13880 = vmatpush1.msk.msra.mxu0 %vm226_vm0, %v10242_v29  ;;  %13882 = vmatprep.subr.msk.mxu1 %vm226_vm0, %v10245_v31 }
 0x1cf   : > { %13885 = vmatprep.subr.msk.mxu0 %vm226_vm0, %v10721_v37  ;;  %v11653_v42 = vpop.permute.xlu1 %11652  ;;  %11319 = vmatprep.mubr.f32.mxu1 %v14472_v1 }
 0x1d0   : > { %11390 = vmatprep.mubr.f32.mxu0 %v14472_v1  ;;  %13878 = vmatmul.mubr.msk.f32.vlgmr.msra.gmra.mrb[0].mxu1 %vm223_vm1, %v11169_v33  ;;  %v11676_v45 = vsel %vm11674_vm9, %v11651_v41, %v11653_v42 }
 0x1d1   : > { %v11649_v43 = vpop.permute.xlu0 %11648  ;;  %13881 = vmatmul.mubr.msk.f32.vlgmr.msra.gmra.mrb[2].mxu0 %vm223_vm1, %v11169_v33  ;;  %13883 = vmatpush1.msk.msra.mxu1 %vm226_vm0, %v10244_v32 }
 0x1d2   : > { %13886 = vmatpush1.msk.msra.mxu0 %vm226_vm0, %v10720_v39  ;;  %13888 = vmatprep.subr.msk.mxu1 %vm226_vm0, %v11177_v44  ;;  %v11675_v48 = vsel %vm11674_vm9, %v11649_v43, %v11651_v41  ;;  %v13303_v44 = vlaneseq }
 0x1d3   : > { %13891 = vmatprep.subr.msk.mxu0 %vm226_vm0, %v11676_v45  ;;  %11461 = vmatprep.mubr.f32.mxu1 %v14472_v1 }
 0x1d4   : > { %v11655_v46 = vpop.permute.xlu1 %11654  ;;  %11532 = vmatprep.mubr.f32.mxu0 %v14472_v1  ;;  %13884 = vmatmul.mubr.msk.f32.vlgmr.msra.gmra.mrb[2].mxu1 %vm223_vm1, %v11169_v33 }
 0x1d5   : > { %13887 = vmatmul.mubr.msk.f32.vlgmr.msra.gmra.mrb[4].mxu0 %vm223_vm1, %v11169_v33  ;;  %v11657_v21 = vpop.permute.xlu0 %11656  ;;  %13889 = vmatpush1.msk.msra.mxu1 %vm226_vm0, %v11176_v47  ;;  %v11677_v51 = vsel %vm11674_vm9, %v11653_v42, %v11655_v46 }
 0x1d6   : > { %13892 = vmatpush1.msk.msra.mxu0 %vm226_vm0, %v11675_v48  ;;  %v11678_v49 = vsel %vm11674_vm9, %v11655_v46, %v11657_v21  ;;  %11603 = vmatprep.mubr.f32.mxu1 %v14472_v1 }
 0x1d7   : > { %11777 = vmatprep.mubr.f32.mxu0 %v14472_v1  ;;  %13894 = vmatprep.subr.msk.mxu1 %vm226_vm0, %v11678_v49 }
 0x1d8   : > { %v11634_v50 = vpop.permute.xlu1 %11633  ;;  %13890 = vmatmul.mubr.msk.f32.vlgmr.msra.gmra.mrb[4].mxu1 %vm223_vm1, %v11169_v33 }
 0x1d9   : > { %13893 = vmatmul.mubr.msk.f32.vlgmr.msra.gmra.mrb[0].mxu0 %vm223_vm1, %v11634_v50  ;;  %13895 = vmatpush1.msk.msra.mxu1 %vm226_vm0, %v11677_v51 }
 0x1da   : > { %v11659_v52 = vpop.permute.xlu0 %11658  ;;  %11848 = vmatprep.mubr.f32.mxu1 %v14472_v1  ;;  %11919 = vmatprep.mubr.f32.mxu0 %v14472_v1 }
 0x1db   : > { %v11679_v55 = vsel %vm11674_vm9, %v11657_v21, %v11659_v52 }
 0x1dc   : > { %v11661_v53 = vpop.permute.xlu1 %11660  ;;  %13896 = vmatmul.mubr.msk.f32.vlgmr.msra.gmra.mrb[0].mxu1 %vm223_vm1, %v11634_v50 }
 0x1dd   : > { %v11680_v54 = vsel %vm11674_vm9, %v11659_v52, %v11661_v53  ;;  %11990 = vmatprep.mubr.f32.mxu1 %v14472_v1 }
 0x1de   : > { %v11663_v56 = vpop.permute.xlu0 %11662  ;;  %13897 = vmatprep.subr.msk.mxu0 %vm226_vm0, %v11680_v54 }
 0x1df   : > { %13898 = vmatpush1.msk.msra.mxu0 %vm226_vm0, %v11679_v55  ;;  %v11681_v60 = vsel %vm11674_vm9, %v11661_v53, %v11663_v56 }
 0x1e0   : > { %v11665_v58 = vpop.permute.xlu1 %11664  ;;  %13899 = vmatmul.mubr.msk.f32.vlgmr.msra.gmra.mrb[2].mxu0 %vm223_vm1, %v11634_v50 }
 0x1e1   : > { %v11682_v59 = vsel %vm11674_vm9, %v11663_v56, %v11665_v58  ;;  %12061 = vmatprep.mubr.f32.mxu0 %v14472_v1 }
 0x1e2   : > { %v11667_v62 = vpop.permute.xlu0 %11666  ;;  %13900 = vmatprep.subr.msk.mxu1 %vm226_vm0, %v11682_v59 }
 0x1e3   : > { %13901 = vmatpush1.msk.msra.mxu1 %vm226_vm0, %v11681_v60  ;;  %v11683_v7 = vsel %vm11674_vm9, %v11665_v58, %v11667_v62 }
 0x1e4   : > { %v11669_v63 = vpop.permute.xlu1 %11668  ;;  %13902 = vmatmul.mubr.msk.f32.vlgmr.msra.gmra.mrb[2].mxu1 %vm223_vm1, %v11634_v50 }
 0x1e5   : > { %v11684_v9 = vsel %vm11674_vm9, %v11667_v62, %v11669_v63  ;;  %12132 = vmatprep.mubr.f32.mxu1 %v14472_v1 }
 0x1e6   : > { %13903 = vmatprep.subr.msk.mxu0 %vm226_vm0, %v11684_v9  ;;  %v11671_v10 = vpop.permute.xlu0 %11670 }
 0x1e7   : > { %13904 = vmatpush1.msk.msra.mxu0 %vm226_vm0, %v11683_v7  ;;  %v11685_v11 = vsel %vm11674_vm9, %v11669_v63, %v11671_v10 }
 0x1e8   : > { %13905 = vmatmul.mubr.msk.f32.vlgmr.msra.gmra.mrb[4].mxu0 %vm223_vm1, %v11634_v50  ;;  %13909 = vmatprep.subr.msk.mxu0 %vm226_vm0, %v11678_v49 }
 0x1e9   : > { %v11673_v13 = vpop.permute.xlu1 %11672  ;;  %13910 = vmatpush1.msk.msra.mxu0 %vm226_vm0, %v11677_v51  ;;  %12233 = vmatprep.mubr.f32.mxu0 %v14472_v1 }
 0x1ea   : > { %v11686_v14 = vsel %vm11674_vm9, %v11671_v10, %v11673_v13  ;;  %13915 = vmatprep.subr.msk.mxu0 %vm226_vm0, %v11682_v59 }
 0x1eb   : > { %13906 = vmatprep.subr.msk.mxu1 %vm226_vm0, %v11686_v14 }
 0x1ec   : > { %13907 = vmatpush1.msk.msra.mxu1 %vm226_vm0, %v11685_v11 }
 0x1ed   : > { %v12154_v15 = vpop.permute.xlu0 %12153  ;;  %13908 = vmatmul.mubr.msk.f32.vlgmr.msra.gmra.mrb[4].mxu1 %vm223_vm1, %v11634_v50  ;;  %13912 = vmatprep.subr.msk.mxu1 %vm226_vm0, %v11680_v54 }
 0x1ee   : > { %13911 = vmatmul.mubr.msk.f32.vlgmr.msra.gmra.mrb[0].mxu0 %vm223_vm1, %v12154_v15  ;;  %13913 = vmatpush1.msk.msra.mxu1 %vm226_vm0, %v11679_v55  ;;  %v12158_v0 = vpop.permute.xlu1 %12157 }
 0x1ef   : > { %13916 = vmatpush1.msk.msra.mxu0 %vm226_vm0, %v11681_v60  ;;  %13918 = vmatprep.subr.msk.mxu1 %vm226_vm0, %v11684_v9  ;;  %v12161_v61 = vsel %vm11674_vm9, %v11673_v13, %v12158_v0 }
 0x1f0   : > { %13921 = vmatprep.subr.msk.mxu0 %vm226_vm0, %v11686_v14  ;;  %12304 = vmatprep.mubr.f32.mxu1 %v14472_v1 }
 0x1f1   : > { %12375 = vmatprep.mubr.f32.mxu0 %v14472_v1  ;;  %13914 = vmatmul.mubr.msk.f32.vlgmr.msra.gmra.mrb[0].mxu1 %vm223_vm1, %v12154_v15 }
 0x1f2   : > { %13917 = vmatmul.mubr.msk.f32.vlgmr.msra.gmra.mrb[2].mxu0 %vm223_vm1, %v12154_v15  ;;  %13919 = vmatpush1.msk.msra.mxu1 %vm226_vm0, %v11683_v7 }
 0x1f3   : > { %v12160_v16 = vpop.permute.xlu0 %12159  ;;  %13922 = vmatpush1.msk.msra.mxu0 %vm226_vm0, %v11685_v11  ;;  %12446 = vmatprep.mubr.f32.mxu1 %v14472_v1 }
 0x1f4   : > { %v12162_v57 = vsel %vm11674_vm9, %v12158_v0, %v12160_v16  ;;  %13927 = vmatprep.subr.msk.mxu0 %vm226_vm0, %v11680_v54  ;;  %12517 = vmatprep.mubr.f32.mxu0 %v14472_v1  ;;  %v16501_v54 = vshrl.u32 %v13303_v44, 7 }
 0x1f5   : > { %13924 = vmatprep.subr.msk.mxu1 %vm226_vm0, %v12162_v57  ;;  %13920 = vmatmul.mubr.msk.f32.vlgmr.msra.gmra.mrb[2].mxu1 %vm223_vm1, %v12154_v15 }
 0x1f6   : > { %13923 = vmatmul.mubr.msk.f32.vlgmr.msra.gmra.mrb[4].mxu0 %vm223_vm1, %v12154_v15  ;;  %13925 = vmatpush1.msk.msra.mxu1 %vm226_vm0, %v12161_v61  ;;  %v13305_v10 = vsub.s32 0, %v16501_v54 }
 0x1f7   : > { %13928 = vmatpush1.msk.msra.mxu0 %vm226_vm0, %v11679_v55  ;;  %13930 = vmatprep.subr.msk.mxu1 %vm226_vm0, %v11682_v59  ;;  %v12614_v4 = vpop.permute.xlu0 %12613 }
 0x1f8   : > { %13933 = vmatprep.subr.msk.mxu0 %vm226_vm0, %v11684_v9  ;;  %12588 = vmatprep.mubr.f32.mxu1 %v14472_v1  ;;  %v12617_v6 = vsel %vm11674_vm9, %v12160_v16, %v12614_v4 }
 0x1f9   : > { %12689 = vmatprep.mubr.f32.mxu0 %v14472_v1  ;;  %13926 = vmatmul.mubr.msk.f32.vlgmr.msra.gmra.mrb[4].mxu1 %vm223_vm1, %v12154_v15 }
 0x1fa   : > { %13931 = vmatpush1.msk.msra.mxu1 %vm226_vm0, %v11681_v60  ;;  %12760 = vmatprep.mubr.f32.mxu1 %v14472_v1 }
 0x1fb   : > { %v12610_v3 = vpop.permute.xlu1 %12609  ;;  %13936 = vmatprep.subr.msk.mxu1 %vm226_vm0, %v11686_v14  ;;  %v16511_v14 = vld [vmem:[%s16626_s2] sm:$0xff] }
 0x1fc   : > { %13929 = vmatmul.mubr.msk.f32.vlgmr.msra.gmra.mrb[0].mxu0 %vm223_vm1, %v12610_v3 }
 0x1fd   : > { %13934 = vmatpush1.msk.msra.mxu0 %vm226_vm0, %v11683_v7  ;;  %12831 = vmatprep.mubr.f32.mxu0 %v14472_v1 }
 0x1fe   : > { %13939 = vmatprep.subr.msk.mxu0 %vm226_vm0, %v12162_v57  ;;  %13932 = vmatmul.mubr.msk.f32.vlgmr.msra.gmra.mrb[0].mxu1 %vm223_vm1, %v12610_v3  ;;  %v13309_v57 = vsub.s32 1, %v16501_v54 }
 0x1ff   : > { %13937 = vmatpush1.msk.msra.mxu1 %vm226_vm0, %v11685_v11  ;;  %12902 = vmatprep.mubr.f32.mxu1 %v14472_v1 }
 0x200   : > { %13935 = vmatmul.mubr.msk.f32.vlgmr.msra.gmra.mrb[2].mxu0 %vm223_vm1, %v12610_v3  ;;  %v12616_v2 = vpop.permute.xlu1 %12615 }
 0x201   : > { %13940 = vmatpush1.msk.msra.mxu0 %vm226_vm0, %v12161_v61  ;;  %v12618_v5 = vsel %vm11674_vm9, %v12614_v4, %v12616_v2  ;;  %12973 = vmatprep.mubr.f32.mxu0 %v14472_v1  ;;  %v13306_v4 = vrot.slane %v16511_v14, %v13305_v10 }
 0x202   : > { %13942 = vmatprep.subr.msk.mxu1 %vm226_vm0, %v12618_v5  ;;  %13938 = vmatmul.mubr.msk.f32.vlgmr.msra.gmra.mrb[2].mxu1 %vm223_vm1, %v12610_v3 }
 0x203   : > { %13943 = vmatpush1.msk.msra.mxu1 %vm226_vm0, %v12617_v6  ;;  %13044 = vmatprep.mubr.f32.mxu1 %v14472_v1 }
 0x204   : > { %13941 = vmatmul.mubr.msk.f32.vlgmr.msra.gmra.mrb[4].mxu0 %vm223_vm1, %v12610_v3 }
 0x206   : > { %13944 = vmatmul.mubr.msk.f32.vlgmr.msra.gmra.mrb[4].mxu1 %vm223_vm1, %v12610_v3 }
 0x2cf   : > { %v16394_v8 = vpop.f32.mrb[0].mxu0 }
 0x2d0   : > { %13183 = vrot.lane.b32.xlu1 %v16394_v8, %s14486_s5  ;;  %13085 = vrot.lane.b32.xlu0 %v16394_v8, %s14473_s10  ;;  %v16400_v12 = vpop.f32.mrb[1].mxu0 }
 0x2d1   : > { %v16402_v17 = vpop.f32.mrb[0].mxu1 }
 0x2d2   : > { %v16404_v19 = vpop.f32.mrb[1].mxu1 }
 0x2d3   : > { %v16406_v20 = vpop.f32.mrb[2].mxu0 }
 0x2d4   : > { %13187 = vrot.lane.b32.xlu1 %v16402_v17, %s14486_s5  ;;  %13089 = vrot.lane.b32.xlu0 %v16402_v17, %s14473_s10  ;;  %v16412_v1 = vpop.f32.mrb[3].mxu0 }
 0x2d5   : > { %v16414_v22 = vpop.f32.mrb[2].mxu1 }
 0x2d6   : > { %v16416_v23 = vpop.f32.mrb[3].mxu1 }
 0x2d7   : > { %v16418_v24 = vpop.f32.mrb[4].mxu0 }
 0x2d8   : > { %13134 = vrot.lane.b32.xlu0 %v16394_v8, %s14482_s24  ;;  %13087 = vrot.lane.b32.xlu1 %v16400_v12, %s14473_s10  ;;  %v16424_v18 = vpop.f32.mrb[5].mxu0 }
 0x2d9   : > { %v16426_v25 = vpop.f32.mrb[4].mxu1 }
 0x2da   : > { %v16428_v26 = vpop.f32.mrb[5].mxu1 }
 0x2dc   : > { %13138 = vrot.lane.b32.xlu0 %v16402_v17, %s14482_s24  ;;  %13091 = vrot.lane.b32.xlu1 %v16404_v19, %s14473_s10 }
 0x2e0   : > { %13140 = vrot.lane.b32.xlu0 %v16404_v19, %s14482_s24  ;;  %13136 = vrot.lane.b32.xlu1 %v16400_v12, %s14482_s24 }
 0x2e4   : > { %13185 = vrot.lane.b32.xlu0 %v16400_v12, %s14486_s5  ;;  %13093 = vrot.lane.b32.xlu1 %v16406_v20, %s14473_s10 }
 0x2e8   : > { %13189 = vrot.lane.b32.xlu0 %v16404_v19, %s14486_s5  ;;  %13142 = vrot.lane.b32.xlu1 %v16406_v20, %s14482_s24 }
 0x2ec   : > { %13097 = vrot.lane.b32.xlu1 %v16414_v22, %s14473_s10  ;;  %13095 = vrot.lane.b32.xlu0 %v16412_v1, %s14473_s10 }
 0x2f0   : > { %13191 = vrot.lane.b32.xlu1 %v16406_v20, %s14486_s5  ;;  %13144 = vrot.lane.b32.xlu0 %v16412_v1, %s14482_s24 }
 0x2f4   : > { %13146 = vrot.lane.b32.xlu1 %v16414_v22, %s14482_s24  ;;  %13099 = vrot.lane.b32.xlu0 %v16416_v23, %s14473_s10 }
 0x2f8   : > { %13195 = vrot.lane.b32.xlu1 %v16414_v22, %s14486_s5  ;;  %13193 = vrot.lane.b32.xlu0 %v16412_v1, %s14486_s5 }
 0x2fc   : > { %13148 = vrot.lane.b32.xlu0 %v16416_v23, %s14482_s24  ;;  %13101 = vrot.lane.b32.xlu1 %v16418_v24, %s14473_s10 }
 0x300   : > { %13197 = vrot.lane.b32.xlu0 %v16416_v23, %s14486_s5  ;;  %13150 = vrot.lane.b32.xlu1 %v16418_v24, %s14482_s24 }
 0x304   : > { %13199 = vrot.lane.b32.xlu0 %v16418_v24, %s14486_s5  ;;  %13152 = vrot.lane.b32.xlu1 %v16424_v18, %s14482_s24 }
 0x308   : > { %13201 = vrot.lane.b32.xlu1 %v16424_v18, %s14486_s5  ;;  %13103 = vrot.lane.b32.xlu0 %v16424_v18, %s14473_s10 }
 0x30c   : > { %13246 = vrot.lane.b32.xlu1 %v16428_v26, %s14473_s10  ;;  %13244 = vrot.lane.b32.xlu0 %v16426_v25, %s14473_s10 }
 0x310   : > { %13265 = vrot.lane.b32.xlu1 %v16428_v26, %s14482_s24  ;;  %13263 = vrot.lane.b32.xlu0 %v16426_v25, %s14482_s24 }
 0x314   : > { %13284 = vrot.lane.b32.xlu1 %v16428_v26, %s14486_s5  ;;  %13282 = vrot.lane.b32.xlu0 %v16426_v25, %s14486_s5 }
 0x342   : > { %v13184_v27 = vpop.permute.xlu1 %13183  ;;  %v13086_v28 = vpop.permute.xlu0 %13085 }
 0x346   : > { %v13188_v29 = vpop.permute.xlu1 %13187  ;;  %v13090_v30 = vpop.permute.xlu0 %13089 }
 0x34a   : > { %v13135_v31 = vpop.permute.xlu0 %13134  ;;  %v13088_v32 = vpop.permute.xlu1 %13087 }
 0x34b   : > { %v13105_v36 = vsel %vm1169_vm2, %v13086_v28, %v13088_v32  ;;  %v13106_v37 = vsel %vm1169_vm2, %v13088_v32, %v13090_v30 }
 0x34c   : > { %v13124_v41 = vmax.f32 %v16394_v8, %v13105_v36  ;;  %v13125_v42 = vmax.f32 %v16400_v12, %v13106_v37  ;;  %v13310_v8 = vrot.slane %v16511_v14, %v13309_v57 }
 0x34e   : > { %v13139_v34 = vpop.permute.xlu0 %13138  ;;  %v13092_v35 = vpop.permute.xlu1 %13091 }
 0x34f   : > { %v13107_v43 = vsel %vm1169_vm2, %v13090_v30, %v13092_v35 }
 0x350   : > { %v13126_v51 = vmax.f32 %v16402_v17, %v13107_v43 }
 0x352   : > { %v13141_v33 = vpop.permute.xlu0 %13140  ;;  %v13137_v38 = vpop.permute.xlu1 %13136 }
 0x353   : > { %v13154_v39 = vsel %vm4469_vm4, %v13135_v31, %v13137_v38  ;;  %v13155_v40 = vsel %vm4469_vm4, %v13137_v38, %v13139_v34  ;;  %v13156_v21 = vsel %vm4469_vm4, %v13139_v34, %v13141_v33  ;;  %v13313_v31 = vsub.s32 2, %v16501_v54 }
 0x354   : > { %v13173_v45 = vmax.f32 %v13124_v41, %v13154_v39  ;;  %v13174_v46 = vmax.f32 %v13125_v42, %v13155_v40  ;;  %v13175_v55 = vmax.f32 %v13126_v51, %v13156_v21  ;;  %v13317_v40 = vsub.s32 3, %v16501_v54 }
 0x356   : > { %v13186_v47 = vpop.permute.xlu0 %13185  ;;  %v13094_v48 = vpop.permute.xlu1 %13093 }
 0x357   : > { %v13203_v49 = vsel %vm5910_vm5, %v13184_v27, %v13186_v47  ;;  %v13204_v50 = vsel %vm5910_vm5, %v13186_v47, %v13188_v29  ;;  %v13108_v7 = vsel %vm1169_vm2, %v13092_v35, %v13094_v48 }
 0x358   : > { %v13222_v52 = vmax.f32 %v13173_v45, %v13203_v49  ;;  %v13223_v53 = vmax.f32 %v13174_v46, %v13204_v50  ;;  %v13127_v3 = vmax.f32 %v16404_v19, %v13108_v7  ;;  %v13314_v45 = vrot.slane %v16511_v14, %v13313_v31 }
 0x35a   : > { %v13232_v56 = vmax.f32 %v13222_v52, %v16402_v17  ;;  %v13233_v58 = vmax.f32 %v13223_v53, %v16404_v19  ;;  %v13190_v59 = vpop.permute.xlu0 %13189  ;;  %v13143_v60 = vpop.permute.xlu1 %13142 }
 0x35b   : > { %v13205_v62 = vsel %vm5910_vm5, %v13188_v29, %v13190_v59  ;;  %v13157_v61 = vsel %vm4469_vm4, %v13141_v33, %v13143_v60 }
 0x35c   : > { %v13224_v63 = vmax.f32 %v13175_v55, %v13205_v62  ;;  %v13253_v9 = vmax.f32 %v13232_v56, %v13107_v43  ;;  %v13254_v13 = vmax.f32 %v13233_v58, %v13108_v7  ;;  %v13176_v5 = vmax.f32 %v13127_v3, %v13157_v61 }
 0x35d   : > { %v13321_v7 = vsub.s32 4, %v16501_v54 }
 0x35e   : > { %v13272_v11 = vmax.f32 %v13253_v9, %v13156_v21  ;;  %v13098_v15 = vpop.permute.xlu1 %13097  ;;  %v13234_v0 = vmax.f32 %v13224_v63, %v16406_v20  ;;  %v13096_v16 = vpop.permute.xlu0 %13095  ;;  %v13273_v6 = vmax.f32 %v13254_v13, %v13157_v61 }
 0x35f   : > { %v13109_v28 = vsel %vm1169_vm2, %v13094_v48, %v13096_v16  ;;  %v13110_v19 = vsel %vm1169_vm2, %v13096_v16, %v13098_v15 }
 0x360   : > { %v13291_v2 = vmax.f32 %v13272_v11, %v13205_v62  ;;  %v13128_v33 = vmax.f32 %v16406_v20, %v13109_v28  ;;  %v13129_v41 = vmax.f32 %v16412_v1, %v13110_v19  ;;  %v13255_v42 = vmax.f32 %v13234_v0, %v13109_v28 }
 0x361   : > { %v13318_v20 = vrot.slane %v16511_v14, %v13317_v40 }
 0x362   : > { %v13192_v12 = vpop.permute.xlu1 %13191  ;;  %v13145_v17 = vpop.permute.xlu0 %13144  ;;  %v13353_v32 = vmul.f32 %v13306_v4, %v13291_v2 }
 0x363   : > { %v13206_v27 = vsel %vm5910_vm5, %v13190_v59, %v13192_v12  ;;  %v13158_v38 = vsel %vm4469_vm4, %v13143_v60, %v13145_v17 }
 0x364   : > { %v13225_v29 = vmax.f32 %v13176_v5, %v13206_v27  ;;  %v13292_v30 = vmax.f32 %v13273_v6, %v13206_v27  ;;  %v13177_v46 = vmax.f32 %v13128_v33, %v13158_v38  ;;  %v13274_v47 = vmax.f32 %v13255_v42, %v13158_v38 }
 0x365   : > { %v13322_v6 = vrot.slane %v16511_v14, %v13321_v7  ;;  %v13333_v7 = vsub.s32 7, %v16501_v54 }
 0x366   : > { %v13235_v34 = vmax.f32 %v13225_v29, %v16412_v1  ;;  %v13354_v35 = vmul.f32 %v13310_v8, %v13292_v30  ;;  %v13147_v36 = vpop.permute.xlu1 %13146  ;;  %v13100_v37 = vpop.permute.xlu0 %13099 }
 0x367   : > { %v13159_v39 = vsel %vm4469_vm4, %v13145_v17, %v13147_v36  ;;  %v13111_v58 = vsel %vm1169_vm2, %v13098_v15, %v13100_v37  ;;  %v13325_v15 = vsub.s32 5, %v16501_v54 }
 0x368   : > { %v13363_v43 = vadd.f32 %v13354_v35, %v13353_v32  ;;  %v13256_v44 = vmax.f32 %v13235_v34, %v13110_v19  ;;  %v13178_v48 = vmax.f32 %v13129_v41, %v13159_v39  ;;  %v13130_v11 = vmax.f32 %v16414_v22, %v13111_v58 }
 0x369   : > { %v13326_v19 = vrot.slane %v16511_v14, %v13325_v15 }
 0x36a   : > { %v13275_v21 = vmax.f32 %v13256_v44, %v13159_v39  ;;  %v13196_v49 = vpop.permute.xlu1 %13195  ;;  %v13194_v50 = vpop.permute.xlu0 %13193 }
 0x36b   : > { %v13207_v51 = vsel %vm5910_vm5, %v13192_v12, %v13194_v50  ;;  %v13208_v52 = vsel %vm5910_vm5, %v13194_v50, %v13196_v49 }
 0x36c   : > { %v13226_v53 = vmax.f32 %v13177_v46, %v13207_v51  ;;  %v13227_v55 = vmax.f32 %v13178_v48, %v13208_v52  ;;  %v13293_v1 = vmax.f32 %v13274_v47, %v13207_v51  ;;  %v13294_v56 = vmax.f32 %v13275_v21, %v13208_v52 }
 0x36e   : > { %v13236_v59 = vmax.f32 %v13226_v53, %v16414_v22  ;;  %v13355_v60 = vmul.f32 %v13314_v45, %v13293_v1  ;;  %v13149_v62 = vpop.permute.xlu0 %13148  ;;  %v13237_v63 = vmax.f32 %v13227_v55, %v16416_v23  ;;  %v13102_v9 = vpop.permute.xlu1 %13101  ;;  %v13356_v0 = vmul.f32 %v13318_v20, %v13294_v56 }
 0x36f   : > { %v13160_v13 = vsel %vm4469_vm4, %v13147_v36, %v13149_v62  ;;  %v13112_v3 = vsel %vm1169_vm2, %v13100_v37, %v13102_v9 }
 0x370   : > { %v13364_v16 = vadd.f32 %v13363_v43, %v13355_v60  ;;  %v13257_v61 = vmax.f32 %v13236_v59, %v13111_v58  ;;  %v13179_v2 = vmax.f32 %v13130_v11, %v13160_v13  ;;  %v13131_v22 = vmax.f32 %v16416_v23, %v13112_v3 }
 0x371   : > { %v13258_v28 = vmax.f32 %v13237_v63, %v13112_v3  ;;  %v13329_v23 = vsub.s32 6, %v16501_v54 }
 0x372   : > { %v13365_v4 = vadd.f32 %v13364_v16, %v13356_v0  ;;  %v13276_v5 = vmax.f32 %v13257_v61, %v13160_v13  ;;  %v13198_v8 = vpop.permute.xlu0 %13197  ;;  %v13151_v12 = vpop.permute.xlu1 %13150 }
 0x373   : > { %v13209_v17 = vsel %vm5910_vm5, %v13196_v49, %v13198_v8  ;;  %v13161_v27 = vsel %vm4469_vm4, %v13149_v62, %v13151_v12  ;;  %v13330_v20 = vrot.slane %v16511_v14, %v13329_v23 }
 0x374   : > { %v13228_v29 = vmax.f32 %v13179_v2, %v13209_v17  ;;  %v13295_v30 = vmax.f32 %v13276_v5, %v13209_v17  ;;  %v13180_v34 = vmax.f32 %v13131_v22, %v13161_v27  ;;  %v13277_v35 = vmax.f32 %v13258_v28, %v13161_v27 }
 0x376   : > { %v13238_v31 = vmax.f32 %v13228_v29, %v16418_v24  ;;  %v13357_v32 = vmul.f32 %v13322_v6, %v13295_v30  ;;  %v13200_v36 = vpop.permute.xlu0 %13199  ;;  %v13153_v37 = vpop.permute.xlu1 %13152  ;;  %v13334_v6 = vrot.slane %v16511_v14, %v13333_v7 }
 0x377   : > { %v13210_v33 = vsel %vm5910_vm5, %v13198_v8, %v13200_v36  ;;  %v13162_v49 = vsel %vm4469_vm4, %v13151_v12, %v13153_v37 }
 0x378   : > { %v13366_v38 = vadd.f32 %v13365_v4, %v13357_v32  ;;  %v13229_v39 = vmax.f32 %v13180_v34, %v13210_v33  ;;  %v13296_v40 = vmax.f32 %v13277_v35, %v13210_v33 }
 0x37a   : > { %v13358_v41 = vmul.f32 %v13326_v19, %v13296_v40  ;;  %v13202_v42 = vpop.permute.xlu1 %13201  ;;  %v13104_v43 = vpop.permute.xlu0 %13103  ;;  %v13239_v44 = vmax.f32 %v13229_v39, %v16424_v18 }
 0x37b   : > { %v13113_v45 = vsel %vm1169_vm2, %v13102_v9, %v13104_v43  ;;  %v13133_v46 = vmax.f32 %v16424_v18, %v13104_v43  ;;  %v13211_v1 = vsel %vm5910_vm5, %v13200_v36, %v13202_v42 }
 0x37c   : > { %v13367_v47 = vadd.f32 %v13366_v38, %v13358_v41  ;;  %v13132_v48 = vmax.f32 %v16418_v24, %v13113_v45  ;;  %v13259_v21 = vmax.f32 %v13238_v31, %v13113_v45 }
 0x37d   : > { %v13182_v50 = vmax.f32 %v13133_v46, %v13153_v37 }
 0x37e   : > { %v13181_v51 = vmax.f32 %v13132_v48, %v13162_v49  ;;  %v13278_v52 = vmax.f32 %v13259_v21, %v13162_v49  ;;  %v13247_v53 = vpop.permute.xlu1 %13246  ;;  %v13245_v55 = vpop.permute.xlu0 %13244 }
 0x37f   : > { %v13231_v56 = vmax.f32 %v13182_v50, %v13202_v42  ;;  %v13248_v60 = vsel %vm1169_vm2, %v13104_v43, %v13245_v55  ;;  %v13249_v11 = vsel %vm1169_vm2, %v13245_v55, %v13247_v53 }
 0x380   : > { %v13297_v58 = vmax.f32 %v13278_v52, %v13211_v1  ;;  %v13230_v59 = vmax.f32 %v13181_v51, %v13211_v1  ;;  %v13260_v16 = vmax.f32 %v13239_v44, %v13248_v60 }
 0x381   : > { %v13241_v18 = vmax.f32 %v13231_v56, %v16428_v26  ;;  %v197_v26 = vld [vmem:[%s16626_s2 + $0x8] sm:$0x3] }
 0x382   : > { %v13359_v24 = vmul.f32 %v13330_v20, %v13297_v58  ;;  %v13240_v62 = vmax.f32 %v13230_v59, %v16426_v25  ;;  %v13266_v63 = vpop.permute.xlu1 %13265  ;;  %v13264_v9 = vpop.permute.xlu0 %13263  ;;  %v13342_v12 = vrot.slane %v197_v26, %v13309_v57  ;;  %v13338_v28 = vrot.slane %v197_v26, %v13305_v10 }
 0x383   : > { %v13262_v13 = vmax.f32 %v13241_v18, %v13247_v53  ;;  %v13267_v0 = vsel %vm4469_vm4, %v13153_v37, %v13264_v9  ;;  %v13268_v4 = vsel %vm4469_vm4, %v13264_v9, %v13266_v63 }
 0x384   : > { %v13261_v61 = vmax.f32 %v13240_v62, %v13249_v11  ;;  %v13368_v3 = vadd.f32 %v13367_v47, %v13359_v24  ;;  %v13279_v25 = vmax.f32 %v13260_v16, %v13267_v0 }
 0x385   : > { %v13281_v15 = vmax.f32 %v13262_v13, %v13266_v63 }
 0x386   : > { %v13280_v2 = vmax.f32 %v13261_v61, %v13268_v4  ;;  %v13285_v5 = vpop.permute.xlu1 %13284  ;;  %v13283_v8 = vpop.permute.xlu0 %13282 }
 0x387   : > { %v13300_v17 = vmax.f32 %v13281_v15, %v13285_v5  ;;  %v13286_v27 = vsel %vm5910_vm5, %v13202_v42, %v13283_v8  ;;  %v13287_v22 = vsel %vm5910_vm5, %v13283_v8, %v13285_v5 }
 0x388   : > { %v13298_v29 = vmax.f32 %v13279_v25, %v13286_v27  ;;  %v13299_v30 = vmax.f32 %v13280_v2, %v13287_v22 }
 0x389   : > { %v13362_v31 = vmul.f32 %v13342_v12, %v13300_v17 }
 0x38a   : > { %v13360_v19 = vmul.f32 %v13334_v6, %v13298_v29  ;;  %v13361_v32 = vmul.f32 %v13338_v28, %v13299_v30 }
 0x38b   : > { %v13372_v35 = vsel %vm13371_vm10, %v13362_v31, 0.0 }
 0x38c   : > { %v13369_v14 = vadd.f32 %v13368_v3, %v13360_v19 }
 0x38e   : > { %v13370_v34 = vadd.f32 %v13369_v14, %v13361_v32 }
 0x390   : > { %v13373_v57 = vadd.f32 %v13372_v35, %v13370_v34 }
 0x392   : > { %13374 = vadd.xlane.f32.xlu0 %v13373_v57 }
 0x41f   : > { %v13375_v36 = vpop.xlane.xlu0 %13374 }
 0x420   : > { %v13376_v37 = vrot.slane %v13375_v36, 4 }
 0x422   : > { %v13377_v33 = vadd.f32 %v13376_v37, %v13375_v36 }
 0x424   : > { %v13378_v38 = vrot.slane %v13377_v33, 2 }
 0x426   : > { %v13379_v39 = vadd.f32 %v13378_v38, %v13377_v33 }
 0x428   : > { %v13380_v54 = vrot.slane %v13379_v39, 1 }
 0x42a   : > { %v13381_v10 = vadd.f32 %v13380_v54, %v13379_v39 }
 0x42c   : > { %14261 = vpush %v13381_v10 }
 0x45d   : > { %s14262_s28 = spop %14261 }
 0x45e   : > { %s13383_s29 = sadd.f32 %s14262_s28, %s198_s14 }
 0x460   : > { %v13384_v40 = vstv %s13383_s29 }
 0x461   : > { %13385 = vst [vmem:[%s190_s16] sm:$0x1] %v13384_v40 }
 0x462   : > { %14420 = shalt.err (!%p14417_p3)
}
 0x463   : > { %s14421_s9 = scalar_lea.hbm %s16582_s7, 16  ;;  %s14425_s5 = scalar_lea.hbm %s16628_s4, 32 }
 0x464   : > { %p14422_p4 = scmp.ne.s32.totalorder %s16582_s7, %s14421_s9  ;;  %p14426_p9 = scmp.lt.u32.totalorder %s16582_s7, %s16628_s4 }
 0x465   : > { %p14427_p10 = scmp.lt.u32.totalorder %s14425_s5, %s14421_s9  ;;  %p14429_p12 = scmp.lt.u32.totalorder %s14421_s9, %s16582_s7 }
 0x466   : > { %p14423_p7 = pnand %p14422_p4, %p14571_p5 }
 0x467   : > { %p14428_p11 = por %p14427_p10, %p14426_p9 }
 0x468   : > { %p14424_p8 = pneg %p14423_p7 }
 0x469   : > { %p14430_p13 = por %p14429_p12, %p14428_p11 }
 0x46b   : > { %p14431_p0 = pnand %p14430_p13, %p14424_p8 }
 0x46d   : > { %14434 = shalt.err (!%p14431_p0)
}
 0x46e   : > { %14263 = dma.vmem_to_hbm [thread:$0]  (%p14571_p5), %s16584_s23, 16, %s16582_s7, %s13387_s8  }
 0x46f PF: > { %p14269_p1 = scmp.ge.s32.totalorder %s14469_s20, 2  ;;  %s13411_s15 = sand.u32 1, %s14457_s17  }
 0x470   : > { %s13412_s16 = scalar_lea.sflag [#allocation4], %s13411_s15 }
 0x471   : > { %p14266_p2 = pnand %p14269_p1, %p14575_p6 }
 0x473   : > { %14452 = dma.done.wait (!%p14266_p2), %s13412_s16, 16  }
 0x474   : > { %14454 = vsyncadd (!%p14266_p2), %s13412_s16, 4294967280  ;;  %p15_p3 = scmp.ge.s32.totalorder %s14558_s22, 4   ;;  %s16631_s17 = smov %s14461_s18 }
 0x475   : > { %s16632_s18 = smov %s14465_s19  ;;  %s16633_s19 = smov %s14569_s25 }
 0x476   : > { %s16634_s20 = smov %s14558_s22  ;;  %17 = sbr.rel (!%p15_p3) target bundleno = 5 (0x5), region = 71 }
 0x47d   :  { %13416 = vsyncpa [#allocation4], 1 }
 0x47e   :  { %13418 = vsyncpa [#allocation4 + $0x1], 1 }

</bundles_post_ra>
